<compile_context>
chip_gen: v7x
topology: tpu7x:2x2x1
jax: 0.10.0
libtpu: 0.0.40
codegen_flags: <defaults>
</compile_context>

<pallas_src>
import jax
import jax.numpy as jnp
from jax.experimental import pallas as pl
from jax.experimental.pallas import tpu as pltpu

HIDDEN = 128      # LSTM hidden size
Z_FEAT = 162      # LSTM input feature size
X_FEAT = 373      # x feature size
PRED_FEAT = 75    # pred feature size
MLP = 512         # dense layer width

# Lane-friendly padded contraction dims (weights + activations zero-padded).
Z_PAD = 256
X_PAD = 384
PRED_PAD = 128


def _round_up(n, m):
    return ((n + m - 1) // m) * m


def _device_kind():
    try:
        return jax.devices()[0].device_kind.lower()
    except Exception:
        return ""


def _reorder_gates_ifgo_to_ifog(w):
    """PyTorch LSTM gate packing (i, f, g, o) -> kernel packing (i, f, o, g)."""
    H = HIDDEN
    return jnp.concatenate(
        [w[..., 0:H], w[..., H:2 * H], w[..., 3 * H:4 * H], w[..., 2 * H:3 * H]],
        axis=-1)


def make_landlord_kernel(act_dtype):
    """act_dtype: dtype for the EUP transcendentals inside the recurrence.

    bfloat16 on v6e/v7x (bf16-native VPU/EUP), float32 on v5e / unknown chips.
    The cell state c is always accumulated in float32.
    """

    def landlord_kernel(z_ref, x_ref, pred_ref,
                        w_ih_ref, w_hh_ref, b_lstm_ref,
                        w1h_ref, w1x_ref, w1p_ref, b1_ref,
                        w2_ref, b2_ref, w3_ref, b3_ref,
                        w4_ref, b4_ref, w5_ref, b5_ref,
                        w6_ref, b6_ref,
                        out_ref):
        T, TB, ZP = z_ref.shape          # z is time-major bf16: (T, TB, Z_PAD)
        H = HIDDEN
        bf16 = jnp.bfloat16
        f32 = jnp.float32

        # ---- LSTM input projection, hoisted: ONE (T*TB, ZP) @ (ZP, 4H) matmul.
        z_bf = z_ref[...].reshape(T * TB, ZP)                     # already bf16
        gates_z = (jnp.dot(z_bf, w_ih_ref[...], preferred_element_type=f32)
                   + b_lstm_ref[...])                             # (T*TB, 4H) f32
        gates_z = gates_z.reshape(T, TB, 4 * H)

        # ---- unrolled recurrence: only h @ W_hh sits on the serial path ------
        # gates_z[t] is a free leading-axis slice (time-major layout).
        # Gate packing is (i, f, o, g): sigmoids on [:, :3H], tanh on [:, 3H:].
        h = jnp.zeros((TB, H), f32)
        c = jnp.zeros((TB, H), f32)
        for t in range(T):                                        # static -> full unroll
            gates = gates_z[t] + jnp.dot(h.astype(bf16), w_hh_ref[...],
                                         preferred_element_type=f32)
            sig = jax.nn.sigmoid(gates[:, :3 * H].astype(act_dtype)).astype(f32)
            i_g = sig[:, 0 * H:1 * H]
            f_g = sig[:, 1 * H:2 * H]
            o_g = sig[:, 2 * H:3 * H]
            g_g = jnp.tanh(gates[:, 3 * H:].astype(act_dtype)).astype(f32)
            c = f_g * c + i_g * g_g                               # f32 cell state
            h = o_g * jnp.tanh(c.astype(act_dtype)).astype(f32)   # == lstm_out[:, t, :]

        # ---- dense1 over concat([h, x, pred]) as split matmuls (same math) ---
        a = (jnp.dot(h.astype(bf16), w1h_ref[...], preferred_element_type=f32)
             + jnp.dot(x_ref[...], w1x_ref[...], preferred_element_type=f32)
             + jnp.dot(pred_ref[...], w1p_ref[...], preferred_element_type=f32)
             + b1_ref[...])
        a = jnp.maximum(a, 0.0)

        # ---- dense2..dense5 + relu ----
        for w_ref, b_ref in ((w2_ref, b2_ref), (w3_ref, b3_ref),
                             (w4_ref, b4_ref), (w5_ref, b5_ref)):
            a = jnp.maximum(
                jnp.dot(a.astype(bf16), w_ref[...],
                        preferred_element_type=f32) + b_ref[...],
                0.0)

        # ---- dense6 (512 -> 1): VPU multiply + lane reduction -----------------
        out_ref[...] = (jnp.sum(a * w6_ref[...], axis=-1, keepdims=True)
                        + b6_ref[...])

    return landlord_kernel


def init_params(key):
    """Deterministic synthetic parameters (PyTorch-style uniform fan-in init).

    Weights are stored transposed (in_features, out_features), zero-padded to
    the padded contraction dims, gate-reordered to (i, f, o, g), and cast to
    bfloat16; biases stay f32.
    """
    def u(k, shape, fan_in):
        bound = 1.0 / float(fan_in) ** 0.5
        return jax.random.uniform(k, shape, jnp.float32, -bound, bound)

    ks = jax.random.split(key, 20)
    H = HIDDEN
    p = {}
    # LSTM: PyTorch weight_ih_l0 (4H,162), weight_hh_l0 (4H,H) -> transposed +
    # gate-reordered so the kernel's three sigmoids read one contiguous slice.
    w_ih = _reorder_gates_ifgo_to_ifog(u(ks[0], (Z_FEAT, 4 * H), H))
    p['w_ih'] = jnp.pad(w_ih, ((0, Z_PAD - Z_FEAT), (0, 0))).astype(jnp.bfloat16)
    p['w_hh'] = _reorder_gates_ifgo_to_ifog(
        u(ks[1], (H, 4 * H), H)).astype(jnp.bfloat16)
    p['b_lstm'] = _reorder_gates_ifgo_to_ifog(
        u(ks[2], (1, 4 * H), H) + u(ks[3], (1, 4 * H), H))       # b_ih + b_hh, f32
    # dense1: in_features = 128 + 373 + 75 = 576, split into 3 blocks.
    d1_in = H + X_FEAT + PRED_FEAT
    p['w1h'] = u(ks[4], (H, MLP), d1_in).astype(jnp.bfloat16)
    w1x = u(ks[5], (X_FEAT, MLP), d1_in)
    p['w1x'] = jnp.pad(w1x, ((0, X_PAD - X_FEAT), (0, 0))).astype(jnp.bfloat16)
    w1p = u(ks[6], (PRED_FEAT, MLP), d1_in)
    p['w1p'] = jnp.pad(w1p, ((0, PRED_PAD - PRED_FEAT), (0, 0))).astype(jnp.bfloat16)
    p['b1'] = u(ks[7], (1, MLP), d1_in)
    for j, i in enumerate(range(2, 6)):
        p[f'w{i}'] = u(ks[8 + 2 * j], (MLP, MLP), MLP).astype(jnp.bfloat16)
        p[f'b{i}'] = u(ks[9 + 2 * j], (1, MLP), MLP)
    p['w6'] = u(ks[16], (1, MLP), MLP)       # row vector, f32 (VPU reduction path)
    p['b6'] = u(ks[17], (1, 1), MLP)
    return p


def landlord_forward(z, x, pred, params, return_value=False, batch_tile=256):
    """z: (B, T, 162) batch-first (PyTorch convention); x: (B, 373); pred: (B, 75)."""
    B, T, _ = z.shape
    kind = _device_kind()
    # bf16 gate math only on chips with a bf16 EUP/VPU (v6e, v7x).
    act_dtype = jnp.bfloat16 if ("v6" in kind or "v7" in kind) else jnp.float32
    vmem_limit = (48 if "v7" in kind else 64) * 1024 * 1024

    # ---- batch tiling: minimize padding; >=2 tiles on v7x (two TensorCores) --
    min_tiles = 2 if ("v7" in kind and B >= 16) else 1
    n_tiles = max(pl.cdiv(B, batch_tile), min_tiles)
    tb = _round_up(pl.cdiv(B, n_tiles), 8)
    b_pad = _round_up(B, tb)
    grid = (b_pad // tb,)

    # ---- stream inputs as bf16, lane-padded; z fed TIME-MAJOR ---------------
    bf16 = jnp.bfloat16
    z_p = jnp.pad(z.astype(bf16), ((0, b_pad - B), (0, 0), (0, Z_PAD - Z_FEAT)))
    z_t = jnp.transpose(z_p, (1, 0, 2))                  # (T, b_pad, Z_PAD)
    x_p = jnp.pad(x.astype(bf16), ((0, b_pad - B), (0, X_PAD - X_FEAT)))
    pred_p = jnp.pad(pred.astype(bf16), ((0, b_pad - B), (0, PRED_PAD - PRED_FEAT)))

    weight_order = ('w_ih', 'w_hh', 'b_lstm', 'w1h', 'w1x', 'w1p', 'b1',
                    'w2', 'b2', 'w3', 'b3', 'w4', 'b4', 'w5', 'b5', 'w6', 'b6')
    weights = tuple(params[k] for k in weight_order)

    def full_spec(arr):
        # Weights stay resident (constant block index); single-buffer them —
        # double-buffering a constant block is pure VMEM waste.
        try:
            return pl.BlockSpec(arr.shape, lambda i: (0, 0),
                                pipeline_mode=pl.Buffered(1))
        except TypeError:   # older jax without pipeline_mode kwarg
            return pl.BlockSpec(arr.shape, lambda i: (0, 0))

    in_specs = ([pl.BlockSpec((T, tb, Z_PAD), lambda i: (0, i, 0)),
                 pl.BlockSpec((tb, X_PAD), lambda i: (i, 0)),
                 pl.BlockSpec((tb, PRED_PAD), lambda i: (i, 0))]
                + [full_spec(w) for w in weights])

    # Advisory cost estimate for XLA's scheduler (bf16 input bytes).
    flops = 2 * b_pad * (T * Z_PAD * 4 * HIDDEN
                         + T * HIDDEN * 4 * HIDDEN
                         + (HIDDEN + X_PAD + PRED_PAD) * MLP
                         + 4 * MLP * MLP
                         + MLP)
    transcendentals = b_pad * T * 5 * HIDDEN
    bytes_accessed = (sum(int(w.size) * w.dtype.itemsize for w in weights)
                      + 2 * int(z_t.size + x_p.size + pred_p.size)
                      + 4 * b_pad)

    values = pl.pallas_call(
        make_landlord_kernel(act_dtype),
        out_shape=jax.ShapeDtypeStruct((b_pad, 1), jnp.float32),
        grid=grid,
        in_specs=in_specs,
        out_specs=pl.BlockSpec((tb, 1), lambda i: (i, 0)),
        compiler_params=pltpu.CompilerParams(
            dimension_semantics=("parallel",),     # shards batch over v7x's 2 TCs
            vmem_limit_bytes=vmem_limit),
        cost_estimate=pl.CostEstimate(flops=flops,
                                      transcendentals=transcendentals,
                                      bytes_accessed=bytes_accessed),
    )(z_t, x_p, pred_p, *weights)

    values = values[:B]
    if return_value:
        return dict(values=values)
    # TODO(synk): epsilon-greedy exploration branch (np.random.rand / flags) is
    # host-side RNG in the original module; only the greedy argmax is implemented.
    action = jnp.argmax(values[:, 0])              # == torch.argmax(x, dim=0)[0]
    return dict(action=action, values=values)


if __name__ == "__main__":
    key = jax.random.PRNGKey(0)
    kp, kz, kx, kpred = jax.random.split(key, 4)
    params = init_params(kp)

    B, T = 8, 8
    z = jax.random.normal(kz, (B, T, Z_FEAT), jnp.float32)
    x = jax.random.normal(kx, (B, X_FEAT), jnp.float32)
    pred = jax.random.normal(kpred, (B, PRED_FEAT), jnp.float32)

    out = landlord_forward(z, x, pred, params)
    jax.block_until_ready(out['values'])
    jax.block_until_ready(out['action'])
    print("KERNEL_OK")
</pallas_src>

<mosaic_0001>
module attributes {stable_mosaic.version = 11 : i64} {
  func.func @landlord_kernel(%arg0: i32, %arg1: memref<8x8x256xbf16, #tpu.memory_space<vmem>>, %arg2: memref<8x384xbf16, #tpu.memory_space<vmem>>, %arg3: memref<8x128xbf16, #tpu.memory_space<vmem>>, %arg4: memref<256x512xbf16, #tpu.memory_space<vmem>>, %arg5: memref<128x512xbf16, #tpu.memory_space<vmem>>, %arg6: memref<1x512xf32, #tpu.memory_space<vmem>>, %arg7: memref<128x512xbf16, #tpu.memory_space<vmem>>, %arg8: memref<384x512xbf16, #tpu.memory_space<vmem>>, %arg9: memref<128x512xbf16, #tpu.memory_space<vmem>>, %arg10: memref<1x512xf32, #tpu.memory_space<vmem>>, %arg11: memref<512x512xbf16, #tpu.memory_space<vmem>>, %arg12: memref<1x512xf32, #tpu.memory_space<vmem>>, %arg13: memref<512x512xbf16, #tpu.memory_space<vmem>>, %arg14: memref<1x512xf32, #tpu.memory_space<vmem>>, %arg15: memref<512x512xbf16, #tpu.memory_space<vmem>>, %arg16: memref<1x512xf32, #tpu.memory_space<vmem>>, %arg17: memref<512x512xbf16, #tpu.memory_space<vmem>>, %arg18: memref<1x512xf32, #tpu.memory_space<vmem>>, %arg19: memref<1x512xf32, #tpu.memory_space<vmem>>, %arg20: memref<1x1xf32, #tpu.memory_space<vmem>>, %arg21: memref<8x1xf32, #tpu.memory_space<vmem>>) attributes {dimension_semantics = [#tpu.dimension_semantics<parallel>], iteration_bounds = array<i64: 1>, scalar_prefetch = 0 : i64, scratch_operands = 0 : i64, tpu.core_type = #tpu.core_type<tc>, window_params = [{transform_indices = @transform_0, window_bounds = array<i64: 8, 8, 256>}, {transform_indices = @transform_1, window_bounds = array<i64: 8, 384>}, {transform_indices = @transform_2, window_bounds = array<i64: 8, 128>}, {pipeline_mode = #tpu.pipeline_mode<synchronous>, transform_indices = @transform_3, window_bounds = array<i64: 256, 512>}, {pipeline_mode = #tpu.pipeline_mode<synchronous>, transform_indices = @transform_4, window_bounds = array<i64: 128, 512>}, {pipeline_mode = #tpu.pipeline_mode<synchronous>, transform_indices = @transform_5, window_bounds = array<i64: 1, 512>}, {pipeline_mode = #tpu.pipeline_mode<synchronous>, transform_indices = @transform_6, window_bounds = array<i64: 128, 512>}, {pipeline_mode = #tpu.pipeline_mode<synchronous>, transform_indices = @transform_7, window_bounds = array<i64: 384, 512>}, {pipeline_mode = #tpu.pipeline_mode<synchronous>, transform_indices = @transform_8, window_bounds = array<i64: 128, 512>}, {pipeline_mode = #tpu.pipeline_mode<synchronous>, transform_indices = @transform_9, window_bounds = array<i64: 1, 512>}, {pipeline_mode = #tpu.pipeline_mode<synchronous>, transform_indices = @transform_10, window_bounds = array<i64: 512, 512>}, {pipeline_mode = #tpu.pipeline_mode<synchronous>, transform_indices = @transform_11, window_bounds = array<i64: 1, 512>}, {pipeline_mode = #tpu.pipeline_mode<synchronous>, transform_indices = @transform_12, window_bounds = array<i64: 512, 512>}, {pipeline_mode = #tpu.pipeline_mode<synchronous>, transform_indices = @transform_13, window_bounds = array<i64: 1, 512>}, {pipeline_mode = #tpu.pipeline_mode<synchronous>, transform_indices = @transform_14, window_bounds = array<i64: 512, 512>}, {pipeline_mode = #tpu.pipeline_mode<synchronous>, transform_indices = @transform_15, window_bounds = array<i64: 1, 512>}, {pipeline_mode = #tpu.pipeline_mode<synchronous>, transform_indices = @transform_16, window_bounds = array<i64: 512, 512>}, {pipeline_mode = #tpu.pipeline_mode<synchronous>, transform_indices = @transform_17, window_bounds = array<i64: 1, 512>}, {pipeline_mode = #tpu.pipeline_mode<synchronous>, transform_indices = @transform_18, window_bounds = array<i64: 1, 512>}, {pipeline_mode = #tpu.pipeline_mode<synchronous>, transform_indices = @transform_19, window_bounds = array<i64: 1, 1>}, {transform_indices = @transform_20, window_bounds = array<i64: 8, 1>}]} {
    %c0 = arith.constant 0 : index
    %c0_0 = arith.constant 0 : index
    %c0_1 = arith.constant 0 : index
    %0 = vector.load %arg1[%c0, %c0_0, %c0_1] : memref<8x8x256xbf16, #tpu.memory_space<vmem>>, vector<8x8x256xbf16>
    %1 = vector.shape_cast %0 : vector<8x8x256xbf16> to vector<64x256xbf16>
    %c0_2 = arith.constant 0 : index
    %c0_3 = arith.constant 0 : index
    %2 = vector.load %arg4[%c0_2, %c0_3] : memref<256x512xbf16, #tpu.memory_space<vmem>>, vector<256x512xbf16>
    %cst = arith.constant dense<0.000000e+00> : vector<64x512xf32>
    %3 = tpu.matmul %1, %2, %cst {dimension_numbers = #tpu.dot_dimension_numbers<[1], [0], [0], [1], [0, 0, 1, 1], [], []>} : vector<64x256xbf16>, vector<256x512xbf16>, vector<64x512xf32> -> vector<64x512xf32>
    %c0_4 = arith.constant 0 : index
    %c0_5 = arith.constant 0 : index
    %4 = vector.load %arg6[%c0_4, %c0_5] : memref<1x512xf32, #tpu.memory_space<vmem>>, vector<1x512xf32>
    %5 = vector.broadcast %4 : vector<1x512xf32> to vector<64x512xf32>
    %6 = arith.addf %3, %5 : vector<64x512xf32>
    %7 = vector.shape_cast %6 : vector<64x512xf32> to vector<8x8x512xf32>
    %cst_6 = arith.constant 0.000000e+00 : f32
    %8 = vector.broadcast %cst_6 : f32 to vector<8x128xf32>
    %cst_7 = arith.constant 0.000000e+00 : f32
    %9 = vector.broadcast %cst_7 : f32 to vector<8x128xf32>
    %10 = vector.extract_strided_slice %7 {offsets = [0, 0, 0], sizes = [1, 8, 512], strides = [1, 1, 1]} : vector<8x8x512xf32> to vector<1x8x512xf32>
    %11 = vector.shape_cast %10 : vector<1x8x512xf32> to vector<8x512xf32>
    %12 = arith.truncf %8 : vector<8x128xf32> to vector<8x128xbf16>
    %c0_8 = arith.constant 0 : index
    %c0_9 = arith.constant 0 : index
    %13 = vector.load %arg5[%c0_8, %c0_9] : memref<128x512xbf16, #tpu.memory_space<vmem>>, vector<128x512xbf16>
    %cst_10 = arith.constant dense<0.000000e+00> : vector<8x512xf32>
    %14 = tpu.matmul %12, %13, %cst_10 {dimension_numbers = #tpu.dot_dimension_numbers<[1], [0], [0], [1], [0, 0, 1, 1], [], []>} : vector<8x128xbf16>, vector<128x512xbf16>, vector<8x512xf32> -> vector<8x512xf32>
    %15 = arith.addf %11, %14 : vector<8x512xf32>
    %16 = vector.extract_strided_slice %15 {offsets = [0, 0], sizes = [8, 384], strides = [1, 1]} : vector<8x512xf32> to vector<8x384xf32>
    %17 = arith.negf %16 : vector<8x384xf32>
    %18 = math.exp %17 : vector<8x384xf32>
    %cst_11 = arith.constant 1.000000e+00 : f32
    %19 = vector.broadcast %cst_11 : f32 to vector<8x384xf32>
    %20 = arith.addf %19, %18 : vector<8x384xf32>
    %21 = arith.divf %19, %20 : vector<8x384xf32>
    %22 = vector.extract_strided_slice %21 {offsets = [0, 0], sizes = [8, 128], strides = [1, 1]} : vector<8x384xf32> to vector<8x128xf32>
    %23 = vector.extract_strided_slice %21 {offsets = [0, 128], sizes = [8, 128], strides = [1, 1]} : vector<8x384xf32> to vector<8x128xf32>
    %24 = vector.extract_strided_slice %21 {offsets = [0, 256], sizes = [8, 128], strides = [1, 1]} : vector<8x384xf32> to vector<8x128xf32>
    %25 = vector.extract_strided_slice %15 {offsets = [0, 384], sizes = [8, 128], strides = [1, 1]} : vector<8x512xf32> to vector<8x128xf32>
    %26 = math.tanh %25 : vector<8x128xf32>
    %27 = arith.mulf %23, %9 : vector<8x128xf32>
    %28 = arith.mulf %22, %26 : vector<8x128xf32>
    %29 = arith.addf %27, %28 : vector<8x128xf32>
    %30 = math.tanh %29 : vector<8x128xf32>
    %31 = arith.mulf %24, %30 : vector<8x128xf32>
    %32 = vector.extract_strided_slice %7 {offsets = [1, 0, 0], sizes = [1, 8, 512], strides = [1, 1, 1]} : vector<8x8x512xf32> to vector<1x8x512xf32>
    %33 = vector.shape_cast %32 : vector<1x8x512xf32> to vector<8x512xf32>
    %34 = arith.truncf %31 : vector<8x128xf32> to vector<8x128xbf16>
    %c0_12 = arith.constant 0 : index
    %c0_13 = arith.constant 0 : index
    %35 = vector.load %arg5[%c0_12, %c0_13] : memref<128x512xbf16, #tpu.memory_space<vmem>>, vector<128x512xbf16>
    %cst_14 = arith.constant dense<0.000000e+00> : vector<8x512xf32>
    %36 = tpu.matmul %34, %35, %cst_14 {dimension_numbers = #tpu.dot_dimension_numbers<[1], [0], [0], [1], [0, 0, 1, 1], [], []>} : vector<8x128xbf16>, vector<128x512xbf16>, vector<8x512xf32> -> vector<8x512xf32>
    %37 = arith.addf %33, %36 : vector<8x512xf32>
    %38 = vector.extract_strided_slice %37 {offsets = [0, 0], sizes = [8, 384], strides = [1, 1]} : vector<8x512xf32> to vector<8x384xf32>
    %39 = arith.negf %38 : vector<8x384xf32>
    %40 = math.exp %39 : vector<8x384xf32>
    %cst_15 = arith.constant 1.000000e+00 : f32
    %41 = vector.broadcast %cst_15 : f32 to vector<8x384xf32>
    %42 = arith.addf %41, %40 : vector<8x384xf32>
    %43 = arith.divf %41, %42 : vector<8x384xf32>
    %44 = vector.extract_strided_slice %43 {offsets = [0, 0], sizes = [8, 128], strides = [1, 1]} : vector<8x384xf32> to vector<8x128xf32>
    %45 = vector.extract_strided_slice %43 {offsets = [0, 128], sizes = [8, 128], strides = [1, 1]} : vector<8x384xf32> to vector<8x128xf32>
    %46 = vector.extract_strided_slice %43 {offsets = [0, 256], sizes = [8, 128], strides = [1, 1]} : vector<8x384xf32> to vector<8x128xf32>
    %47 = vector.extract_strided_slice %37 {offsets = [0, 384], sizes = [8, 128], strides = [1, 1]} : vector<8x512xf32> to vector<8x128xf32>
    %48 = math.tanh %47 : vector<8x128xf32>
    %49 = arith.mulf %45, %29 : vector<8x128xf32>
    %50 = arith.mulf %44, %48 : vector<8x128xf32>
    %51 = arith.addf %49, %50 : vector<8x128xf32>
    %52 = math.tanh %51 : vector<8x128xf32>
    %53 = arith.mulf %46, %52 : vector<8x128xf32>
    %54 = vector.extract_strided_slice %7 {offsets = [2, 0, 0], sizes = [1, 8, 512], strides = [1, 1, 1]} : vector<8x8x512xf32> to vector<1x8x512xf32>
    %55 = vector.shape_cast %54 : vector<1x8x512xf32> to vector<8x512xf32>
    %56 = arith.truncf %53 : vector<8x128xf32> to vector<8x128xbf16>
    %c0_16 = arith.constant 0 : index
    %c0_17 = arith.constant 0 : index
    %57 = vector.load %arg5[%c0_16, %c0_17] : memref<128x512xbf16, #tpu.memory_space<vmem>>, vector<128x512xbf16>
    %cst_18 = arith.constant dense<0.000000e+00> : vector<8x512xf32>
    %58 = tpu.matmul %56, %57, %cst_18 {dimension_numbers = #tpu.dot_dimension_numbers<[1], [0], [0], [1], [0, 0, 1, 1], [], []>} : vector<8x128xbf16>, vector<128x512xbf16>, vector<8x512xf32> -> vector<8x512xf32>
    %59 = arith.addf %55, %58 : vector<8x512xf32>
    %60 = vector.extract_strided_slice %59 {offsets = [0, 0], sizes = [8, 384], strides = [1, 1]} : vector<8x512xf32> to vector<8x384xf32>
    %61 = arith.negf %60 : vector<8x384xf32>
    %62 = math.exp %61 : vector<8x384xf32>
    %cst_19 = arith.constant 1.000000e+00 : f32
    %63 = vector.broadcast %cst_19 : f32 to vector<8x384xf32>
    %64 = arith.addf %63, %62 : vector<8x384xf32>
    %65 = arith.divf %63, %64 : vector<8x384xf32>
    %66 = vector.extract_strided_slice %65 {offsets = [0, 0], sizes = [8, 128], strides = [1, 1]} : vector<8x384xf32> to vector<8x128xf32>
    %67 = vector.extract_strided_slice %65 {offsets = [0, 128], sizes = [8, 128], strides = [1, 1]} : vector<8x384xf32> to vector<8x128xf32>
    %68 = vector.extract_strided_slice %65 {offsets = [0, 256], sizes = [8, 128], strides = [1, 1]} : vector<8x384xf32> to vector<8x128xf32>
    %69 = vector.extract_strided_slice %59 {offsets = [0, 384], sizes = [8, 128], strides = [1, 1]} : vector<8x512xf32> to vector<8x128xf32>
    %70 = math.tanh %69 : vector<8x128xf32>
    %71 = arith.mulf %67, %51 : vector<8x128xf32>
    %72 = arith.mulf %66, %70 : vector<8x128xf32>
    %73 = arith.addf %71, %72 : vector<8x128xf32>
    %74 = math.tanh %73 : vector<8x128xf32>
    %75 = arith.mulf %68, %74 : vector<8x128xf32>
    %76 = vector.extract_strided_slice %7 {offsets = [3, 0, 0], sizes = [1, 8, 512], strides = [1, 1, 1]} : vector<8x8x512xf32> to vector<1x8x512xf32>
    %77 = vector.shape_cast %76 : vector<1x8x512xf32> to vector<8x512xf32>
    %78 = arith.truncf %75 : vector<8x128xf32> to vector<8x128xbf16>
    %c0_20 = arith.constant 0 : index
    %c0_21 = arith.constant 0 : index
    %79 = vector.load %arg5[%c0_20, %c0_21] : memref<128x512xbf16, #tpu.memory_space<vmem>>, vector<128x512xbf16>
    %cst_22 = arith.constant dense<0.000000e+00> : vector<8x512xf32>
    %80 = tpu.matmul %78, %79, %cst_22 {dimension_numbers = #tpu.dot_dimension_numbers<[1], [0], [0], [1], [0, 0, 1, 1], [], []>} : vector<8x128xbf16>, vector<128x512xbf16>, vector<8x512xf32> -> vector<8x512xf32>
    %81 = arith.addf %77, %80 : vector<8x512xf32>
    %82 = vector.extract_strided_slice %81 {offsets = [0, 0], sizes = [8, 384], strides = [1, 1]} : vector<8x512xf32> to vector<8x384xf32>
    %83 = arith.negf %82 : vector<8x384xf32>
    %84 = math.exp %83 : vector<8x384xf32>
    %cst_23 = arith.constant 1.000000e+00 : f32
    %85 = vector.broadcast %cst_23 : f32 to vector<8x384xf32>
    %86 = arith.addf %85, %84 : vector<8x384xf32>
    %87 = arith.divf %85, %86 : vector<8x384xf32>
    %88 = vector.extract_strided_slice %87 {offsets = [0, 0], sizes = [8, 128], strides = [1, 1]} : vector<8x384xf32> to vector<8x128xf32>
    %89 = vector.extract_strided_slice %87 {offsets = [0, 128], sizes = [8, 128], strides = [1, 1]} : vector<8x384xf32> to vector<8x128xf32>
    %90 = vector.extract_strided_slice %87 {offsets = [0, 256], sizes = [8, 128], strides = [1, 1]} : vector<8x384xf32> to vector<8x128xf32>
    %91 = vector.extract_strided_slice %81 {offsets = [0, 384], sizes = [8, 128], strides = [1, 1]} : vector<8x512xf32> to vector<8x128xf32>
    %92 = math.tanh %91 : vector<8x128xf32>
    %93 = arith.mulf %89, %73 : vector<8x128xf32>
    %94 = arith.mulf %88, %92 : vector<8x128xf32>
    %95 = arith.addf %93, %94 : vector<8x128xf32>
    %96 = math.tanh %95 : vector<8x128xf32>
    %97 = arith.mulf %90, %96 : vector<8x128xf32>
    %98 = vector.extract_strided_slice %7 {offsets = [4, 0, 0], sizes = [1, 8, 512], strides = [1, 1, 1]} : vector<8x8x512xf32> to vector<1x8x512xf32>
    %99 = vector.shape_cast %98 : vector<1x8x512xf32> to vector<8x512xf32>
    %100 = arith.truncf %97 : vector<8x128xf32> to vector<8x128xbf16>
    %c0_24 = arith.constant 0 : index
    %c0_25 = arith.constant 0 : index
    %101 = vector.load %arg5[%c0_24, %c0_25] : memref<128x512xbf16, #tpu.memory_space<vmem>>, vector<128x512xbf16>
    %cst_26 = arith.constant dense<0.000000e+00> : vector<8x512xf32>
    %102 = tpu.matmul %100, %101, %cst_26 {dimension_numbers = #tpu.dot_dimension_numbers<[1], [0], [0], [1], [0, 0, 1, 1], [], []>} : vector<8x128xbf16>, vector<128x512xbf16>, vector<8x512xf32> -> vector<8x512xf32>
    %103 = arith.addf %99, %102 : vector<8x512xf32>
    %104 = vector.extract_strided_slice %103 {offsets = [0, 0], sizes = [8, 384], strides = [1, 1]} : vector<8x512xf32> to vector<8x384xf32>
    %105 = arith.negf %104 : vector<8x384xf32>
    %106 = math.exp %105 : vector<8x384xf32>
    %cst_27 = arith.constant 1.000000e+00 : f32
    %107 = vector.broadcast %cst_27 : f32 to vector<8x384xf32>
    %108 = arith.addf %107, %106 : vector<8x384xf32>
    %109 = arith.divf %107, %108 : vector<8x384xf32>
    %110 = vector.extract_strided_slice %109 {offsets = [0, 0], sizes = [8, 128], strides = [1, 1]} : vector<8x384xf32> to vector<8x128xf32>
    %111 = vector.extract_strided_slice %109 {offsets = [0, 128], sizes = [8, 128], strides = [1, 1]} : vector<8x384xf32> to vector<8x128xf32>
    %112 = vector.extract_strided_slice %109 {offsets = [0, 256], sizes = [8, 128], strides = [1, 1]} : vector<8x384xf32> to vector<8x128xf32>
    %113 = vector.extract_strided_slice %103 {offsets = [0, 384], sizes = [8, 128], strides = [1, 1]} : vector<8x512xf32> to vector<8x128xf32>
    %114 = math.tanh %113 : vector<8x128xf32>
    %115 = arith.mulf %111, %95 : vector<8x128xf32>
    %116 = arith.mulf %110, %114 : vector<8x128xf32>
    %117 = arith.addf %115, %116 : vector<8x128xf32>
    %118 = math.tanh %117 : vector<8x128xf32>
    %119 = arith.mulf %112, %118 : vector<8x128xf32>
    %120 = vector.extract_strided_slice %7 {offsets = [5, 0, 0], sizes = [1, 8, 512], strides = [1, 1, 1]} : vector<8x8x512xf32> to vector<1x8x512xf32>
    %121 = vector.shape_cast %120 : vector<1x8x512xf32> to vector<8x512xf32>
    %122 = arith.truncf %119 : vector<8x128xf32> to vector<8x128xbf16>
    %c0_28 = arith.constant 0 : index
    %c0_29 = arith.constant 0 : index
    %123 = vector.load %arg5[%c0_28, %c0_29] : memref<128x512xbf16, #tpu.memory_space<vmem>>, vector<128x512xbf16>
    %cst_30 = arith.constant dense<0.000000e+00> : vector<8x512xf32>
    %124 = tpu.matmul %122, %123, %cst_30 {dimension_numbers = #tpu.dot_dimension_numbers<[1], [0], [0], [1], [0, 0, 1, 1], [], []>} : vector<8x128xbf16>, vector<128x512xbf16>, vector<8x512xf32> -> vector<8x512xf32>
    %125 = arith.addf %121, %124 : vector<8x512xf32>
    %126 = vector.extract_strided_slice %125 {offsets = [0, 0], sizes = [8, 384], strides = [1, 1]} : vector<8x512xf32> to vector<8x384xf32>
    %127 = arith.negf %126 : vector<8x384xf32>
    %128 = math.exp %127 : vector<8x384xf32>
    %cst_31 = arith.constant 1.000000e+00 : f32
    %129 = vector.broadcast %cst_31 : f32 to vector<8x384xf32>
    %130 = arith.addf %129, %128 : vector<8x384xf32>
    %131 = arith.divf %129, %130 : vector<8x384xf32>
    %132 = vector.extract_strided_slice %131 {offsets = [0, 0], sizes = [8, 128], strides = [1, 1]} : vector<8x384xf32> to vector<8x128xf32>
    %133 = vector.extract_strided_slice %131 {offsets = [0, 128], sizes = [8, 128], strides = [1, 1]} : vector<8x384xf32> to vector<8x128xf32>
    %134 = vector.extract_strided_slice %131 {offsets = [0, 256], sizes = [8, 128], strides = [1, 1]} : vector<8x384xf32> to vector<8x128xf32>
    %135 = vector.extract_strided_slice %125 {offsets = [0, 384], sizes = [8, 128], strides = [1, 1]} : vector<8x512xf32> to vector<8x128xf32>
    %136 = math.tanh %135 : vector<8x128xf32>
    %137 = arith.mulf %133, %117 : vector<8x128xf32>
    %138 = arith.mulf %132, %136 : vector<8x128xf32>
    %139 = arith.addf %137, %138 : vector<8x128xf32>
    %140 = math.tanh %139 : vector<8x128xf32>
    %141 = arith.mulf %134, %140 : vector<8x128xf32>
    %142 = vector.extract_strided_slice %7 {offsets = [6, 0, 0], sizes = [1, 8, 512], strides = [1, 1, 1]} : vector<8x8x512xf32> to vector<1x8x512xf32>
    %143 = vector.shape_cast %142 : vector<1x8x512xf32> to vector<8x512xf32>
    %144 = arith.truncf %141 : vector<8x128xf32> to vector<8x128xbf16>
    %c0_32 = arith.constant 0 : index
    %c0_33 = arith.constant 0 : index
    %145 = vector.load %arg5[%c0_32, %c0_33] : memref<128x512xbf16, #tpu.memory_space<vmem>>, vector<128x512xbf16>
    %cst_34 = arith.constant dense<0.000000e+00> : vector<8x512xf32>
    %146 = tpu.matmul %144, %145, %cst_34 {dimension_numbers = #tpu.dot_dimension_numbers<[1], [0], [0], [1], [0, 0, 1, 1], [], []>} : vector<8x128xbf16>, vector<128x512xbf16>, vector<8x512xf32> -> vector<8x512xf32>
    %147 = arith.addf %143, %146 : vector<8x512xf32>
    %148 = vector.extract_strided_slice %147 {offsets = [0, 0], sizes = [8, 384], strides = [1, 1]} : vector<8x512xf32> to vector<8x384xf32>
    %149 = arith.negf %148 : vector<8x384xf32>
    %150 = math.exp %149 : vector<8x384xf32>
    %cst_35 = arith.constant 1.000000e+00 : f32
    %151 = vector.broadcast %cst_35 : f32 to vector<8x384xf32>
    %152 = arith.addf %151, %150 : vector<8x384xf32>
    %153 = arith.divf %151, %152 : vector<8x384xf32>
    %154 = vector.extract_strided_slice %153 {offsets = [0, 0], sizes = [8, 128], strides = [1, 1]} : vector<8x384xf32> to vector<8x128xf32>
    %155 = vector.extract_strided_slice %153 {offsets = [0, 128], sizes = [8, 128], strides = [1, 1]} : vector<8x384xf32> to vector<8x128xf32>
    %156 = vector.extract_strided_slice %153 {offsets = [0, 256], sizes = [8, 128], strides = [1, 1]} : vector<8x384xf32> to vector<8x128xf32>
    %157 = vector.extract_strided_slice %147 {offsets = [0, 384], sizes = [8, 128], strides = [1, 1]} : vector<8x512xf32> to vector<8x128xf32>
    %158 = math.tanh %157 : vector<8x128xf32>
    %159 = arith.mulf %155, %139 : vector<8x128xf32>
    %160 = arith.mulf %154, %158 : vector<8x128xf32>
    %161 = arith.addf %159, %160 : vector<8x128xf32>
    %162 = math.tanh %161 : vector<8x128xf32>
    %163 = arith.mulf %156, %162 : vector<8x128xf32>
    %164 = vector.extract_strided_slice %7 {offsets = [7, 0, 0], sizes = [1, 8, 512], strides = [1, 1, 1]} : vector<8x8x512xf32> to vector<1x8x512xf32>
    %165 = vector.shape_cast %164 : vector<1x8x512xf32> to vector<8x512xf32>
    %166 = arith.truncf %163 : vector<8x128xf32> to vector<8x128xbf16>
    %c0_36 = arith.constant 0 : index
    %c0_37 = arith.constant 0 : index
    %167 = vector.load %arg5[%c0_36, %c0_37] : memref<128x512xbf16, #tpu.memory_space<vmem>>, vector<128x512xbf16>
    %cst_38 = arith.constant dense<0.000000e+00> : vector<8x512xf32>
    %168 = tpu.matmul %166, %167, %cst_38 {dimension_numbers = #tpu.dot_dimension_numbers<[1], [0], [0], [1], [0, 0, 1, 1], [], []>} : vector<8x128xbf16>, vector<128x512xbf16>, vector<8x512xf32> -> vector<8x512xf32>
    %169 = arith.addf %165, %168 : vector<8x512xf32>
    %170 = vector.extract_strided_slice %169 {offsets = [0, 0], sizes = [8, 384], strides = [1, 1]} : vector<8x512xf32> to vector<8x384xf32>
    %171 = arith.negf %170 : vector<8x384xf32>
    %172 = math.exp %171 : vector<8x384xf32>
    %cst_39 = arith.constant 1.000000e+00 : f32
    %173 = vector.broadcast %cst_39 : f32 to vector<8x384xf32>
    %174 = arith.addf %173, %172 : vector<8x384xf32>
    %175 = arith.divf %173, %174 : vector<8x384xf32>
    %176 = vector.extract_strided_slice %175 {offsets = [0, 0], sizes = [8, 128], strides = [1, 1]} : vector<8x384xf32> to vector<8x128xf32>
    %177 = vector.extract_strided_slice %175 {offsets = [0, 128], sizes = [8, 128], strides = [1, 1]} : vector<8x384xf32> to vector<8x128xf32>
    %178 = vector.extract_strided_slice %175 {offsets = [0, 256], sizes = [8, 128], strides = [1, 1]} : vector<8x384xf32> to vector<8x128xf32>
    %179 = vector.extract_strided_slice %169 {offsets = [0, 384], sizes = [8, 128], strides = [1, 1]} : vector<8x512xf32> to vector<8x128xf32>
    %180 = math.tanh %179 : vector<8x128xf32>
    %181 = arith.mulf %177, %161 : vector<8x128xf32>
    %182 = arith.mulf %176, %180 : vector<8x128xf32>
    %183 = arith.addf %181, %182 : vector<8x128xf32>
    %184 = math.tanh %183 : vector<8x128xf32>
    %185 = arith.mulf %178, %184 : vector<8x128xf32>
    %186 = arith.truncf %185 : vector<8x128xf32> to vector<8x128xbf16>
    %c0_40 = arith.constant 0 : index
    %c0_41 = arith.constant 0 : index
    %187 = vector.load %arg7[%c0_40, %c0_41] : memref<128x512xbf16, #tpu.memory_space<vmem>>, vector<128x512xbf16>
    %cst_42 = arith.constant dense<0.000000e+00> : vector<8x512xf32>
    %188 = tpu.matmul %186, %187, %cst_42 {dimension_numbers = #tpu.dot_dimension_numbers<[1], [0], [0], [1], [0, 0, 1, 1], [], []>} : vector<8x128xbf16>, vector<128x512xbf16>, vector<8x512xf32> -> vector<8x512xf32>
    %c0_43 = arith.constant 0 : index
    %c0_44 = arith.constant 0 : index
    %189 = vector.load %arg2[%c0_43, %c0_44] : memref<8x384xbf16, #tpu.memory_space<vmem>>, vector<8x384xbf16>
    %c0_45 = arith.constant 0 : index
    %c0_46 = arith.constant 0 : index
    %190 = vector.load %arg8[%c0_45, %c0_46] : memref<384x512xbf16, #tpu.memory_space<vmem>>, vector<384x512xbf16>
    %cst_47 = arith.constant dense<0.000000e+00> : vector<8x512xf32>
    %191 = tpu.matmul %189, %190, %cst_47 {dimension_numbers = #tpu.dot_dimension_numbers<[1], [0], [0], [1], [0, 0, 1, 1], [], []>} : vector<8x384xbf16>, vector<384x512xbf16>, vector<8x512xf32> -> vector<8x512xf32>
    %192 = arith.addf %188, %191 : vector<8x512xf32>
    %c0_48 = arith.constant 0 : index
    %c0_49 = arith.constant 0 : index
    %193 = vector.load %arg3[%c0_48, %c0_49] : memref<8x128xbf16, #tpu.memory_space<vmem>>, vector<8x128xbf16>
    %c0_50 = arith.constant 0 : index
    %c0_51 = arith.constant 0 : index
    %194 = vector.load %arg9[%c0_50, %c0_51] : memref<128x512xbf16, #tpu.memory_space<vmem>>, vector<128x512xbf16>
    %cst_52 = arith.constant dense<0.000000e+00> : vector<8x512xf32>
    %195 = tpu.matmul %193, %194, %cst_52 {dimension_numbers = #tpu.dot_dimension_numbers<[1], [0], [0], [1], [0, 0, 1, 1], [], []>} : vector<8x128xbf16>, vector<128x512xbf16>, vector<8x512xf32> -> vector<8x512xf32>
    %196 = arith.addf %192, %195 : vector<8x512xf32>
    %c0_53 = arith.constant 0 : index
    %c0_54 = arith.constant 0 : index
    %197 = vector.load %arg10[%c0_53, %c0_54] : memref<1x512xf32, #tpu.memory_space<vmem>>, vector<1x512xf32>
    %198 = vector.broadcast %197 : vector<1x512xf32> to vector<8x512xf32>
    %199 = arith.addf %196, %198 : vector<8x512xf32>
    %cst_55 = arith.constant 0.000000e+00 : f32
    %200 = vector.broadcast %cst_55 : f32 to vector<8x512xf32>
    %201 = arith.maximumf %199, %200 : vector<8x512xf32>
    %202 = arith.truncf %201 : vector<8x512xf32> to vector<8x512xbf16>
    %c0_56 = arith.constant 0 : index
    %c0_57 = arith.constant 0 : index
    %203 = vector.load %arg11[%c0_56, %c0_57] : memref<512x512xbf16, #tpu.memory_space<vmem>>, vector<512x512xbf16>
    %cst_58 = arith.constant dense<0.000000e+00> : vector<8x512xf32>
    %204 = tpu.matmul %202, %203, %cst_58 {dimension_numbers = #tpu.dot_dimension_numbers<[1], [0], [0], [1], [0, 0, 1, 1], [], []>} : vector<8x512xbf16>, vector<512x512xbf16>, vector<8x512xf32> -> vector<8x512xf32>
    %c0_59 = arith.constant 0 : index
    %c0_60 = arith.constant 0 : index
    %205 = vector.load %arg12[%c0_59, %c0_60] : memref<1x512xf32, #tpu.memory_space<vmem>>, vector<1x512xf32>
    %206 = vector.broadcast %205 : vector<1x512xf32> to vector<8x512xf32>
    %207 = arith.addf %204, %206 : vector<8x512xf32>
    %cst_61 = arith.constant 0.000000e+00 : f32
    %208 = vector.broadcast %cst_61 : f32 to vector<8x512xf32>
    %209 = arith.maximumf %207, %208 : vector<8x512xf32>
    %210 = arith.truncf %209 : vector<8x512xf32> to vector<8x512xbf16>
    %c0_62 = arith.constant 0 : index
    %c0_63 = arith.constant 0 : index
    %211 = vector.load %arg13[%c0_62, %c0_63] : memref<512x512xbf16, #tpu.memory_space<vmem>>, vector<512x512xbf16>
    %cst_64 = arith.constant dense<0.000000e+00> : vector<8x512xf32>
    %212 = tpu.matmul %210, %211, %cst_64 {dimension_numbers = #tpu.dot_dimension_numbers<[1], [0], [0], [1], [0, 0, 1, 1], [], []>} : vector<8x512xbf16>, vector<512x512xbf16>, vector<8x512xf32> -> vector<8x512xf32>
    %c0_65 = arith.constant 0 : index
    %c0_66 = arith.constant 0 : index
    %213 = vector.load %arg14[%c0_65, %c0_66] : memref<1x512xf32, #tpu.memory_space<vmem>>, vector<1x512xf32>
    %214 = vector.broadcast %213 : vector<1x512xf32> to vector<8x512xf32>
    %215 = arith.addf %212, %214 : vector<8x512xf32>
    %cst_67 = arith.constant 0.000000e+00 : f32
    %216 = vector.broadcast %cst_67 : f32 to vector<8x512xf32>
    %217 = arith.maximumf %215, %216 : vector<8x512xf32>
    %218 = arith.truncf %217 : vector<8x512xf32> to vector<8x512xbf16>
    %c0_68 = arith.constant 0 : index
    %c0_69 = arith.constant 0 : index
    %219 = vector.load %arg15[%c0_68, %c0_69] : memref<512x512xbf16, #tpu.memory_space<vmem>>, vector<512x512xbf16>
    %cst_70 = arith.constant dense<0.000000e+00> : vector<8x512xf32>
    %220 = tpu.matmul %218, %219, %cst_70 {dimension_numbers = #tpu.dot_dimension_numbers<[1], [0], [0], [1], [0, 0, 1, 1], [], []>} : vector<8x512xbf16>, vector<512x512xbf16>, vector<8x512xf32> -> vector<8x512xf32>
    %c0_71 = arith.constant 0 : index
    %c0_72 = arith.constant 0 : index
    %221 = vector.load %arg16[%c0_71, %c0_72] : memref<1x512xf32, #tpu.memory_space<vmem>>, vector<1x512xf32>
    %222 = vector.broadcast %221 : vector<1x512xf32> to vector<8x512xf32>
    %223 = arith.addf %220, %222 : vector<8x512xf32>
    %cst_73 = arith.constant 0.000000e+00 : f32
    %224 = vector.broadcast %cst_73 : f32 to vector<8x512xf32>
    %225 = arith.maximumf %223, %224 : vector<8x512xf32>
    %226 = arith.truncf %225 : vector<8x512xf32> to vector<8x512xbf16>
    %c0_74 = arith.constant 0 : index
    %c0_75 = arith.constant 0 : index
    %227 = vector.load %arg17[%c0_74, %c0_75] : memref<512x512xbf16, #tpu.memory_space<vmem>>, vector<512x512xbf16>
    %cst_76 = arith.constant dense<0.000000e+00> : vector<8x512xf32>
    %228 = tpu.matmul %226, %227, %cst_76 {dimension_numbers = #tpu.dot_dimension_numbers<[1], [0], [0], [1], [0, 0, 1, 1], [], []>} : vector<8x512xbf16>, vector<512x512xbf16>, vector<8x512xf32> -> vector<8x512xf32>
    %c0_77 = arith.constant 0 : index
    %c0_78 = arith.constant 0 : index
    %229 = vector.load %arg18[%c0_77, %c0_78] : memref<1x512xf32, #tpu.memory_space<vmem>>, vector<1x512xf32>
    %230 = vector.broadcast %229 : vector<1x512xf32> to vector<8x512xf32>
    %231 = arith.addf %228, %230 : vector<8x512xf32>
    %cst_79 = arith.constant 0.000000e+00 : f32
    %232 = vector.broadcast %cst_79 : f32 to vector<8x512xf32>
    %233 = arith.maximumf %231, %232 : vector<8x512xf32>
    %c0_80 = arith.constant 0 : index
    %c0_81 = arith.constant 0 : index
    %234 = vector.load %arg19[%c0_80, %c0_81] : memref<1x512xf32, #tpu.memory_space<vmem>>, vector<1x512xf32>
    %235 = vector.broadcast %234 : vector<1x512xf32> to vector<8x512xf32>
    %236 = arith.mulf %233, %235 : vector<8x512xf32>
    %cst_82 = arith.constant dense<0.000000e+00> : vector<8xf32>
    %237 = vector.multi_reduction <add>, %236, %cst_82 [1] : vector<8x512xf32> to vector<8xf32>
    %238 = vector.shape_cast %237 : vector<8xf32> to vector<8x1xf32>
    %c0_83 = arith.constant 0 : index
    %c0_84 = arith.constant 0 : index
    %239 = vector.load %arg20[%c0_83, %c0_84] : memref<1x1xf32, #tpu.memory_space<vmem>>, vector<1x1xf32>
    %240 = vector.broadcast %239 : vector<1x1xf32> to vector<8x1xf32>
    %241 = arith.addf %238, %240 : vector<8x1xf32>
    %c0_85 = arith.constant 0 : index
    %c0_86 = arith.constant 0 : index
    %242 = vector.load %arg21[%c0_85, %c0_86] : memref<8x1xf32, #tpu.memory_space<vmem>>, vector<8x1xf32>
    tpu.vector_store %arg21[%c0_85, %c0_86], %241 {strides = array<i32>} : memref<8x1xf32, #tpu.memory_space<vmem>>, vector<8x1xf32>,
    return
  }
  func.func @transform_0(%arg0: i32) -> (i32, i32, i32) {
    %c0_i32 = arith.constant 0 : i32
    %c0_i32_0 = arith.constant 0 : i32
    %c0_i32_1 = arith.constant 0 : i32
    return %c0_i32, %arg0, %c0_i32_0 : i32, i32, i32
  }
  func.func @transform_1(%arg0: i32) -> (i32, i32) {
    %c0_i32 = arith.constant 0 : i32
    %c0_i32_0 = arith.constant 0 : i32
    return %arg0, %c0_i32 : i32, i32
  }
  func.func @transform_2(%arg0: i32) -> (i32, i32) {
    %c0_i32 = arith.constant 0 : i32
    %c0_i32_0 = arith.constant 0 : i32
    return %arg0, %c0_i32 : i32, i32
  }
  func.func @transform_3(%arg0: i32) -> (i32, i32) {
    %c0_i32 = arith.constant 0 : i32
    %c0_i32_0 = arith.constant 0 : i32
    %c0_i32_1 = arith.constant 0 : i32
    return %c0_i32, %c0_i32_0 : i32, i32
  }
  func.func @transform_4(%arg0: i32) -> (i32, i32) {
    %c0_i32 = arith.constant 0 : i32
    %c0_i32_0 = arith.constant 0 : i32
    %c0_i32_1 = arith.constant 0 : i32
    return %c0_i32, %c0_i32_0 : i32, i32
  }
  func.func @transform_5(%arg0: i32) -> (i32, i32) {
    %c0_i32 = arith.constant 0 : i32
    %c0_i32_0 = arith.constant 0 : i32
    %c0_i32_1 = arith.constant 0 : i32
    return %c0_i32, %c0_i32_0 : i32, i32
  }
  func.func @transform_6(%arg0: i32) -> (i32, i32) {
    %c0_i32 = arith.constant 0 : i32
    %c0_i32_0 = arith.constant 0 : i32
    %c0_i32_1 = arith.constant 0 : i32
    return %c0_i32, %c0_i32_0 : i32, i32
  }
  func.func @transform_7(%arg0: i32) -> (i32, i32) {
    %c0_i32 = arith.constant 0 : i32
    %c0_i32_0 = arith.constant 0 : i32
    %c0_i32_1 = arith.constant 0 : i32
    return %c0_i32, %c0_i32_0 : i32, i32
  }
  func.func @transform_8(%arg0: i32) -> (i32, i32) {
    %c0_i32 = arith.constant 0 : i32
    %c0_i32_0 = arith.constant 0 : i32
    %c0_i32_1 = arith.constant 0 : i32
    return %c0_i32, %c0_i32_0 : i32, i32
  }
  func.func @transform_9(%arg0: i32) -> (i32, i32) {
    %c0_i32 = arith.constant 0 : i32
    %c0_i32_0 = arith.constant 0 : i32
    %c0_i32_1 = arith.constant 0 : i32
    return %c0_i32, %c0_i32_0 : i32, i32
  }
  func.func @transform_10(%arg0: i32) -> (i32, i32) {
    %c0_i32 = arith.constant 0 : i32
    %c0_i32_0 = arith.constant 0 : i32
    %c0_i32_1 = arith.constant 0 : i32
    return %c0_i32, %c0_i32_0 : i32, i32
  }
  func.func @transform_11(%arg0: i32) -> (i32, i32) {
    %c0_i32 = arith.constant 0 : i32
    %c0_i32_0 = arith.constant 0 : i32
    %c0_i32_1 = arith.constant 0 : i32
    return %c0_i32, %c0_i32_0 : i32, i32
  }
  func.func @transform_12(%arg0: i32) -> (i32, i32) {
    %c0_i32 = arith.constant 0 : i32
    %c0_i32_0 = arith.constant 0 : i32
    %c0_i32_1 = arith.constant 0 : i32
    return %c0_i32, %c0_i32_0 : i32, i32
  }
  func.func @transform_13(%arg0: i32) -> (i32, i32) {
    %c0_i32 = arith.constant 0 : i32
    %c0_i32_0 = arith.constant 0 : i32
    %c0_i32_1 = arith.constant 0 : i32
    return %c0_i32, %c0_i32_0 : i32, i32
  }
  func.func @transform_14(%arg0: i32) -> (i32, i32) {
    %c0_i32 = arith.constant 0 : i32
    %c0_i32_0 = arith.constant 0 : i32
    %c0_i32_1 = arith.constant 0 : i32
    return %c0_i32, %c0_i32_0 : i32, i32
  }
  func.func @transform_15(%arg0: i32) -> (i32, i32) {
    %c0_i32 = arith.constant 0 : i32
    %c0_i32_0 = arith.constant 0 : i32
    %c0_i32_1 = arith.constant 0 : i32
    return %c0_i32, %c0_i32_0 : i32, i32
  }
  func.func @transform_16(%arg0: i32) -> (i32, i32) {
    %c0_i32 = arith.constant 0 : i32
    %c0_i32_0 = arith.constant 0 : i32
    %c0_i32_1 = arith.constant 0 : i32
    return %c0_i32, %c0_i32_0 : i32, i32
  }
  func.func @transform_17(%arg0: i32) -> (i32, i32) {
    %c0_i32 = arith.constant 0 : i32
    %c0_i32_0 = arith.constant 0 : i32
    %c0_i32_1 = arith.constant 0 : i32
    return %c0_i32, %c0_i32_0 : i32, i32
  }
  func.func @transform_18(%arg0: i32) -> (i32, i32) {
    %c0_i32 = arith.constant 0 : i32
    %c0_i32_0 = arith.constant 0 : i32
    %c0_i32_1 = arith.constant 0 : i32
    return %c0_i32, %c0_i32_0 : i32, i32
  }
  func.func @transform_19(%arg0: i32) -> (i32, i32) {
    %c0_i32 = arith.constant 0 : i32
    %c0_i32_0 = arith.constant 0 : i32
    %c0_i32_1 = arith.constant 0 : i32
    return %c0_i32, %c0_i32_0 : i32, i32
  }
  func.func @transform_20(%arg0: i32) -> (i32, i32) {
    %c0_i32 = arith.constant 0 : i32
    %c0_i32_0 = arith.constant 0 : i32
    return %arg0, %c0_i32 : i32, i32
  }
}

</mosaic_0001>

<bundles_post_ra>
// kernel: tpu_custom_call.1
= control target key start
LH: loop header
LB: loop body
LE: loop exit
PB: predicated region body
PF: predicated region fallthrough
CT: control target
= control target key end

     0   :  { %s10954_s0 = inlined_call_operand.hbm [shape: bf16[8,8,256], index: 0, kind: input, shape index: {}]   ;;  %s10955_s1 = inlined_call_operand.hbm [shape: bf16[8,384], index: 1, kind: input, shape index: {}]   ;;  %s10956_s2 = inlined_call_operand.hbm [shape: bf16[8,128], index: 2, kind: input, shape index: {}]   ;;  %s10957_s3 = inlined_call_operand.hbm [shape: bf16[256,512], index: 3, kind: input, shape index: {}]   ;;  %s10958_s4 = inlined_call_operand.hbm [shape: bf16[128,512], index: 4, kind: input, shape index: {}]   ;;  %s10959_s5 = inlined_call_operand.hbm [shape: f32[1,512], index: 5, kind: input, shape index: {}]   ;;  %s10960_s6 = inlined_call_operand.hbm [shape: bf16[128,512], index: 6, kind: input, shape index: {}]   ;;  %s10961_s7 = inlined_call_operand.hbm [shape: bf16[384,512], index: 7, kind: input, shape index: {}]   ;;  %s10962_s8 = inlined_call_operand.hbm [shape: bf16[128,512], index: 8, kind: input, shape index: {}]   ;;  %s10963_s9 = inlined_call_operand.hbm [shape: f32[1,512], index: 9, kind: input, shape index: {}]   ;;  %s10964_s10 = inlined_call_operand.hbm [shape: bf16[512,512], index: 10, kind: input, shape index: {}]   ;;  %s10965_s11 = inlined_call_operand.hbm [shape: f32[1,512], index: 11, kind: input, shape index: {}]   ;;  %s10966_s12 = inlined_call_operand.hbm [shape: bf16[512,512], index: 12, kind: input, shape index: {}]   ;;  %s10967_s13 = inlined_call_operand.hbm [shape: f32[1,512], index: 13, kind: input, shape index: {}]   ;;  %s10968_s14 = inlined_call_operand.hbm [shape: bf16[512,512], index: 14, kind: input, shape index: {}]   ;;  %s10969_s15 = inlined_call_operand.hbm [shape: f32[1,512], index: 15, kind: input, shape index: {}]   ;;  %s10970_s16 = inlined_call_operand.hbm [shape: bf16[512,512], index: 16, kind: input, shape index: {}]   ;;  %s10971_s17 = inlined_call_operand.hbm [shape: f32[1,512], index: 17, kind: input, shape index: {}]   ;;  %s10972_s18 = inlined_call_operand.hbm [shape: f32[1,512], index: 18, kind: input, shape index: {}]   ;;  %s10973_s19 = inlined_call_operand.<no memory space> [shape: f32[1,1], index: 19, kind: input, shape index: {}]   ;;  %s10974_s20 = inlined_call_operand.hbm [shape: f32[8,1], index: 20, kind: output, shape index: {}]  }
   0x1   :  { %10991 = sst [smem:[#allocation63_spill]] %s10954_s0  ;;  %v25_v0 = vstv %s10973_s19 }
   0x2   :  { %10992 = sst [smem:[#allocation64_spill]] %s10955_s1  ;;  %26 = vst [vmem:[#allocation2] sm:$0x1] %v25_v0 }
   0x3   :  { %10993 = sst [smem:[#allocation65_spill]] %s10956_s2 }
   0x4   :  { %10994 = sst [smem:[#allocation66_spill]] %s10957_s3 }
   0x5   :  { %10995 = sst [smem:[#allocation67_spill]] %s10958_s4 }
   0x6   :  { %10996 = sst [smem:[#allocation68_spill]] %s10974_s20 }
   0x7   :  { %27 = vsyncpa [#allocation4], 0 }
   0x8   :  { %28 = vsyncpa [#allocation7], 0 }
   0x9   :  { %29 = vsyncpa [#allocation10], 0 }
   0xa   :  { %30 = vsyncpa [#allocation13], 0 }
   0xb   :  { %31 = vsyncpa [#allocation16], 0 }
   0xc   :  { %32 = vsyncpa [#allocation19], 0 }
   0xd   :  { %33 = vsyncpa [#allocation22], 0 }
   0xe   :  { %34 = vsyncpa [#allocation25], 0 }
   0xf   :  { %35 = vsyncpa [#allocation28], 0 }
  0x10   :  { %36 = vsyncpa [#allocation31], 0 }
  0x11   :  { %37 = vsyncpa [#allocation5], 0  ;;  %s9903_s23 = smov [#allocation6]   ;;  %s9904_s2 = smov [#allocation9]  }
  0x12   :  { %s56_s24 = sshll.u32 %s9903_s23, 4  ;;  %s75_s25 = sshll.u32 %s9904_s2, 4  ;;  %s57_s24 = int_to_ptr.vmem [resolvable:$true] %s56_s24  ;;  %s10036_s25 = int_to_ptr.vmem [resolvable:$true] %s75_s25 }
  0x13   :  { %s10997_s26 = sld [smem:[#allocation64_spill]] }
  0x19   :  { %s9441_s27 = scalar_lea.hbm %s10997_s26, 192 }
  0x1a   :  { %p9442_p0 = scmp.ne.s32.totalorder %s10997_s26, %s9441_s27  ;;  %p9445_p1 = scmp.lt.u32.totalorder %s9441_s27, %s10997_s26 }
  0x1c   :  { %p9447_p2 = pnand %p9445_p1, %p9442_p0 }
  0x1e   :  { %9450 = shalt.err (!%p9447_p2)
}
  0x1f   :  { %s9451_s0 = scalar_lea.vmem %s57_s24, 192  ;;  %p9456_p4 = scmp.lt.s32.totalorder %s57_s24, %s57_s24 }
  0x20   :  { %p9452_p3 = scmp.ne.s32.totalorder %s57_s24, %s9451_s0  ;;  %p9457_p5 = scmp.lt.s32.totalorder %s9451_s0, %s9451_s0 }
  0x22   :  { %p9458_p6 = por %p9457_p5, %p9456_p4 }
  0x24   :  { %p9459_p7 = pnand %p9458_p6, %p9452_p3 }
  0x26   :  { %9462 = shalt.err (!%p9459_p7)
}
  0x27   :  { %59 = dma.hbm_to_vmem [thread:$0]  %s10997_s26, 192, %s57_s24, [#allocation7]  }
  0x28   :  { %s10998_s2 = sld [smem:[#allocation66_spill]] }
  0x2e   :  { %s9463_s19 = scalar_lea.hbm %s10998_s2, 8192 }
  0x2f   :  { %p9464_p8 = scmp.ne.s32.totalorder %s10998_s2, %s9463_s19  ;;  %p9467_p9 = scmp.lt.u32.totalorder %s9463_s19, %s10998_s2 }
  0x31   :  { %p9469_p10 = pnand %p9467_p9, %p9464_p8 }
  0x33   :  { %9472 = shalt.err (!%p9469_p10)
}
  0x34   :  { %s9473_s29 = scalar_lea.vmem %s10036_s25, 8192  ;;  %p9478_p12 = scmp.lt.s32.totalorder %s10036_s25, %s10036_s25 }
  0x35   :  { %p9474_p11 = scmp.ne.s32.totalorder %s10036_s25, %s9473_s29  ;;  %p9479_p13 = scmp.lt.s32.totalorder %s9473_s29, %s9473_s29 }
  0x37   :  { %p9480_p0 = por %p9479_p13, %p9478_p12 }
  0x39   :  { %p9481_p1 = pnand %p9480_p0, %p9474_p11 }
  0x3b   :  { %9484 = shalt.err (!%p9481_p1)
}
  0x3c   :  { %s9905_s24 = smov 256   ;;  %s9906_s26 = smov 16  }
  0x3d   :  { %81 = dma.hbm_to_vmem [thread:$0]  %s10998_s2, 8192, %s10036_s25, [#allocation10], %s9905_s24, %s9905_s24, %s9906_s26  }
  0x3e   :  { %s9907_s21 = smov [#allocation12]   ;;  %s9908_s22 = smov [#allocation15]  }
  0x3f   :  { %s100_s1 = sshll.u32 %s9907_s21, 4  ;;  %s121_s23 = sshll.u32 %s9908_s22, 4  ;;  %s101_s1 = int_to_ptr.vmem [resolvable:$true] %s100_s1  ;;  %s10070_s23 = int_to_ptr.vmem [resolvable:$true] %s121_s23 }
  0x40   :  { %s9485_s28 = scalar_lea.hbm %s10959_s5, 64 }
  0x41   :  { %p9486_p2 = scmp.ne.s32.totalorder %s10959_s5, %s9485_s28  ;;  %p9489_p3 = scmp.lt.u32.totalorder %s9485_s28, %s10959_s5 }
  0x43   :  { %p9491_p4 = pnand %p9489_p3, %p9486_p2 }
  0x45   :  { %9494 = shalt.err (!%p9491_p4)
}
  0x46   :  { %s9495_s25 = scalar_lea.vmem %s101_s1, 64  ;;  %p9500_p6 = scmp.lt.s32.totalorder %s101_s1, %s101_s1 }
  0x47   :  { %p9496_p5 = scmp.ne.s32.totalorder %s101_s1, %s9495_s25  ;;  %p9501_p7 = scmp.lt.s32.totalorder %s9495_s25, %s9495_s25 }
  0x49   :  { %p9502_p8 = por %p9501_p7, %p9500_p6 }
  0x4b   :  { %p9503_p9 = pnand %p9502_p8, %p9496_p5 }
  0x4d   :  { %9506 = shalt.err (!%p9503_p9)
}
  0x4e   :  { %103 = dma.hbm_to_vmem [thread:$0]  %s10959_s5, 64, %s101_s1, [#allocation13]  }
  0x4f   :  { %s9507_s22 = scalar_lea.hbm %s10961_s7, 12288 }
  0x50   :  { %p9508_p10 = scmp.ne.s32.totalorder %s10961_s7, %s9507_s22  ;;  %p9511_p11 = scmp.lt.u32.totalorder %s9507_s22, %s10961_s7 }
  0x52   :  { %p9513_p12 = pnand %p9511_p11, %p9508_p10 }
  0x54   :  { %9516 = shalt.err (!%p9513_p12)
}
  0x55   :  { %s9517_s27 = scalar_lea.vmem %s10070_s23, 12288  ;;  %p9522_p0 = scmp.lt.s32.totalorder %s10070_s23, %s10070_s23 }
  0x56   :  { %p9518_p13 = scmp.ne.s32.totalorder %s10070_s23, %s9517_s27  ;;  %p9523_p1 = scmp.lt.s32.totalorder %s9517_s27, %s9517_s27 }
  0x58   :  { %p9524_p2 = por %p9523_p1, %p9522_p0 }
  0x5a   :  { %p9525_p3 = pnand %p9524_p2, %p9518_p13 }
  0x5c   :  { %9528 = shalt.err (!%p9525_p3)
}
  0x5d   :  { %127 = dma.hbm_to_vmem [thread:$0]  %s10961_s7, 12288, %s10070_s23, [#allocation16], %s9905_s24, %s9905_s24, %s9906_s26  }
  0x5e   :  { %s9909_s4 = smov [#allocation18]   ;;  %s9910_s25 = smov [#allocation21]  }
  0x5f   :  { %s146_s29 = sshll.u32 %s9909_s4, 4  ;;  %s168_s2 = sshll.u32 %s9910_s25, 4  ;;  %s147_s29 = int_to_ptr.vmem [resolvable:$true] %s146_s29  ;;  %s169_s2 = int_to_ptr.vmem [resolvable:$true] %s168_s2 }
  0x60   :  { %s9529_s21 = scalar_lea.hbm %s10963_s9, 64 }
  0x61   :  { %p9530_p4 = scmp.ne.s32.totalorder %s10963_s9, %s9529_s21  ;;  %p9533_p5 = scmp.lt.u32.totalorder %s9529_s21, %s10963_s9 }
  0x63   :  { %p9535_p6 = pnand %p9533_p5, %p9530_p4 }
  0x65   :  { %9538 = shalt.err (!%p9535_p6)
}
  0x66   :  { %s9539_s7 = scalar_lea.vmem %s147_s29, 64  ;;  %p9544_p8 = scmp.lt.s32.totalorder %s147_s29, %s147_s29 }
  0x67   :  { %p9540_p7 = scmp.ne.s32.totalorder %s147_s29, %s9539_s7  ;;  %p9545_p9 = scmp.lt.s32.totalorder %s9539_s7, %s9539_s7 }
  0x69   :  { %p9546_p10 = por %p9545_p9, %p9544_p8 }
  0x6b   :  { %p9547_p11 = pnand %p9546_p10, %p9540_p7 }
  0x6d   :  { %9550 = shalt.err (!%p9547_p11)
}
  0x6e   :  { %149 = dma.hbm_to_vmem [thread:$0]  %s10963_s9, 64, %s147_s29, [#allocation19]  }
  0x6f   :  { %s9551_s1 = scalar_lea.hbm %s10965_s11, 64 }
  0x70   :  { %p9552_p12 = scmp.ne.s32.totalorder %s10965_s11, %s9551_s1  ;;  %p9555_p13 = scmp.lt.u32.totalorder %s9551_s1, %s10965_s11 }
  0x72   :  { %p9557_p0 = pnand %p9555_p13, %p9552_p12 }
  0x74   :  { %9560 = shalt.err (!%p9557_p0)
}
  0x75   :  { %s9561_s21 = scalar_lea.vmem %s169_s2, 64  ;;  %p9566_p2 = scmp.lt.s32.totalorder %s169_s2, %s169_s2 }
  0x76   :  { %p9562_p1 = scmp.ne.s32.totalorder %s169_s2, %s9561_s21  ;;  %p9567_p3 = scmp.lt.s32.totalorder %s9561_s21, %s9561_s21 }
  0x78   :  { %p9568_p4 = por %p9567_p3, %p9566_p2 }
  0x7a   :  { %p9569_p5 = pnand %p9568_p4, %p9562_p1 }
  0x7c   :  { %9572 = shalt.err (!%p9569_p5)
}
  0x7d   :  { %171 = dma.hbm_to_vmem [thread:$0]  %s10965_s11, 64, %s169_s2, [#allocation22]  }
  0x7e   :  { %s9911_s22 = smov [#allocation24]   ;;  %s9912_s20 = smov [#allocation27]  }
  0x7f   :  { %s190_s19 = sshll.u32 %s9911_s22, 4  ;;  %s212_s3 = sshll.u32 %s9912_s20, 4  ;;  %s191_s19 = int_to_ptr.vmem [resolvable:$true] %s190_s19  ;;  %s213_s3 = int_to_ptr.vmem [resolvable:$true] %s212_s3 }
  0x80   :  { %s9573_s28 = scalar_lea.hbm %s10967_s13, 64 }
  0x81   :  { %p9574_p6 = scmp.ne.s32.totalorder %s10967_s13, %s9573_s28  ;;  %p9577_p7 = scmp.lt.u32.totalorder %s9573_s28, %s10967_s13 }
  0x83   :  { %p9579_p8 = pnand %p9577_p7, %p9574_p6 }
  0x85   :  { %9582 = shalt.err (!%p9579_p8)
}
  0x86   :  { %s9583_s11 = scalar_lea.vmem %s191_s19, 64  ;;  %p9588_p10 = scmp.lt.s32.totalorder %s191_s19, %s191_s19 }
  0x87   :  { %p9584_p9 = scmp.ne.s32.totalorder %s191_s19, %s9583_s11  ;;  %p9589_p11 = scmp.lt.s32.totalorder %s9583_s11, %s9583_s11 }
  0x89   :  { %p9590_p12 = por %p9589_p11, %p9588_p10 }
  0x8b   :  { %p9591_p13 = pnand %p9590_p12, %p9584_p9 }
  0x8d   :  { %9594 = shalt.err (!%p9591_p13)
}
  0x8e   :  { %193 = dma.hbm_to_vmem [thread:$0]  %s10967_s13, 64, %s191_s19, [#allocation25]  }
  0x8f   :  { %s9595_s21 = scalar_lea.hbm %s10969_s15, 64 }
  0x90   :  { %p9596_p0 = scmp.ne.s32.totalorder %s10969_s15, %s9595_s21  ;;  %p9599_p1 = scmp.lt.u32.totalorder %s9595_s21, %s10969_s15 }
  0x92   :  { %p9601_p2 = pnand %p9599_p1, %p9596_p0 }
  0x94   :  { %9604 = shalt.err (!%p9601_p2)
}
  0x95   :  { %s9605_s7 = scalar_lea.vmem %s213_s3, 64  ;;  %p9610_p4 = scmp.lt.s32.totalorder %s213_s3, %s213_s3 }
  0x96   :  { %p9606_p3 = scmp.ne.s32.totalorder %s213_s3, %s9605_s7  ;;  %p9611_p5 = scmp.lt.s32.totalorder %s9605_s7, %s9605_s7 }
  0x98   :  { %p9612_p6 = por %p9611_p5, %p9610_p4 }
  0x9a   :  { %p9613_p7 = pnand %p9612_p6, %p9606_p3 }
  0x9c   :  { %9616 = shalt.err (!%p9613_p7)
}
  0x9d   :  { %215 = dma.hbm_to_vmem [thread:$0]  %s10969_s15, 64, %s213_s3, [#allocation28]  }
  0x9e   :  { %s9913_s23 = smov [#allocation30]   ;;  %s9914_s27 = smov [#allocation3]  }
  0x9f   :  { %s234_s28 = sshll.u32 %s9913_s23, 4  ;;  %s43_s5 = sshll.u32 %s9914_s27, 4  ;;  %s235_s28 = int_to_ptr.vmem [resolvable:$true] %s234_s28  ;;  %s10152_s5 = int_to_ptr.vmem [resolvable:$true] %s43_s5 }
  0xa0   :  { %s9617_s11 = scalar_lea.hbm %s10971_s17, 64 }
  0xa1   :  { %p9618_p8 = scmp.ne.s32.totalorder %s10971_s17, %s9617_s11  ;;  %p9621_p9 = scmp.lt.u32.totalorder %s9617_s11, %s10971_s17 }
  0xa3   :  { %p9623_p10 = pnand %p9621_p9, %p9618_p8 }
  0xa5   :  { %9626 = shalt.err (!%p9623_p10)
}
  0xa6   :  { %s9627_s15 = scalar_lea.vmem %s235_s28, 64  ;;  %p9632_p12 = scmp.lt.s32.totalorder %s235_s28, %s235_s28 }
  0xa7   :  { %p9628_p11 = scmp.ne.s32.totalorder %s235_s28, %s9627_s15  ;;  %p9633_p13 = scmp.lt.s32.totalorder %s9627_s15, %s9627_s15 }
  0xa9   :  { %p9634_p0 = por %p9633_p13, %p9632_p12 }
  0xab   :  { %p9635_p1 = pnand %p9634_p0, %p9628_p11 }
  0xad   :  { %9638 = shalt.err (!%p9635_p1)
}
  0xae   :  { %237 = dma.hbm_to_vmem [thread:$0]  %s10971_s17, 64, %s235_s28, [#allocation31]  }
  0xaf   :  { %s10999_s22 = sld [smem:[#allocation63_spill]] }
  0xb5   :  { %s9639_s20 = scalar_lea.hbm %s10999_s22, 1024 }
  0xb6   :  { %p9640_p2 = scmp.ne.s32.totalorder %s10999_s22, %s9639_s20  ;;  %p9643_p3 = scmp.lt.u32.totalorder %s9639_s20, %s10999_s22 }
  0xb8   :  { %p9645_p4 = pnand %p9643_p3, %p9640_p2 }
  0xba   :  { %9648 = shalt.err (!%p9645_p4)
}
  0xbb   :  { %s9649_s27 = scalar_lea.vmem %s10152_s5, 1024  ;;  %p9654_p6 = scmp.lt.s32.totalorder %s10152_s5, %s10152_s5 }
  0xbc   :  { %p9650_p5 = scmp.ne.s32.totalorder %s10152_s5, %s9649_s27  ;;  %p9655_p7 = scmp.lt.s32.totalorder %s9649_s27, %s9649_s27 }
  0xbe   :  { %p9656_p8 = por %p9655_p7, %p9654_p6 }
  0xc0   :  { %p9657_p9 = pnand %p9656_p8, %p9650_p5 }
  0xc2   :  { %9660 = shalt.err (!%p9657_p9)
}
  0xc3   :  { %s9915_s17 = smov 128   ;;  %s9916_s28 = smov 8  }
  0xc4   :  { %49 = dma.hbm_to_vmem [thread:$0]  %s10999_s22, 1024, %s10152_s5, [#allocation4], %s9915_s17, %s9915_s17, %s9916_s28  }
  0xc5   :  { %s9917_s11 = smov [#allocation8]   ;;  %s9918_s25 = smov [#allocation11]  }
  0xc6   :  { %s66_s2 = sshll.u32 %s9917_s11, 4  ;;  %s87_s30 = sshll.u32 %s9918_s25, 4  ;;  %s67_s2 = int_to_ptr.vmem [resolvable:$true] %s66_s2  ;;  %s10183_s30 = int_to_ptr.vmem [resolvable:$true] %s87_s30 }
  0xc7   :  { %s11000_s3 = sld [smem:[#allocation65_spill]] }
  0xcd   :  { %s9661_s21 = scalar_lea.hbm %s11000_s3, 64 }
  0xce   :  { %p9662_p10 = scmp.ne.s32.totalorder %s11000_s3, %s9661_s21  ;;  %p9665_p11 = scmp.lt.u32.totalorder %s9661_s21, %s11000_s3 }
  0xd0   :  { %p9667_p12 = pnand %p9665_p11, %p9662_p10 }
  0xd2   :  { %9670 = shalt.err (!%p9667_p12)
}
  0xd3   :  { %s9671_s5 = scalar_lea.vmem %s67_s2, 64  ;;  %p9676_p0 = scmp.lt.s32.totalorder %s67_s2, %s67_s2 }
  0xd4   :  { %p9672_p13 = scmp.ne.s32.totalorder %s67_s2, %s9671_s5  ;;  %p9677_p1 = scmp.lt.s32.totalorder %s9671_s5, %s9671_s5 }
  0xd6   :  { %p9678_p2 = por %p9677_p1, %p9676_p0 }
  0xd8   :  { %p9679_p3 = pnand %p9678_p2, %p9672_p13 }
  0xda   :  { %9682 = shalt.err (!%p9679_p3)
}
  0xdb   :  { %69 = dma.hbm_to_vmem [thread:$0]  %s11000_s3, 64, %s67_s2, [#allocation7]  }
  0xdc   :  { %s11001_s27 = sld [smem:[#allocation67_spill]] }
  0xe2   :  { %s9683_s17 = scalar_lea.hbm %s11001_s27, 4096 }
  0xe3   :  { %p9684_p4 = scmp.ne.s32.totalorder %s11001_s27, %s9683_s17  ;;  %p9687_p5 = scmp.lt.u32.totalorder %s9683_s17, %s11001_s27 }
  0xe5   :  { %p9689_p6 = pnand %p9687_p5, %p9684_p4 }
  0xe7   :  { %9692 = shalt.err (!%p9689_p6)
}
  0xe8   :  { %s9693_s25 = scalar_lea.vmem %s10183_s30, 4096  ;;  %p9698_p8 = scmp.lt.s32.totalorder %s10183_s30, %s10183_s30 }
  0xe9   :  { %p9694_p7 = scmp.ne.s32.totalorder %s10183_s30, %s9693_s25  ;;  %p9699_p9 = scmp.lt.s32.totalorder %s9693_s25, %s9693_s25 }
  0xeb   :  { %p9700_p10 = por %p9699_p9, %p9698_p8 }
  0xed   :  { %p9701_p11 = pnand %p9700_p10, %p9694_p7 }
  0xef   :  { %9704 = shalt.err (!%p9701_p11)
}
  0xf0   :  { %93 = dma.hbm_to_vmem [thread:$0]  %s11001_s27, 4096, %s10183_s30, [#allocation10], %s9905_s24, %s9905_s24, %s9906_s26  }
  0xf1   :  { %s9919_s15 = smov [#allocation14]   ;;  %s9920_s21 = smov [#allocation17]  }
  0xf2   :  { %s109_s3 = sshll.u32 %s9919_s15, 4  ;;  %s133_s9 = sshll.u32 %s9920_s21, 4  ;;  %s110_s3 = int_to_ptr.vmem [resolvable:$true] %s109_s3  ;;  %s10217_s9 = int_to_ptr.vmem [resolvable:$true] %s133_s9 }
  0xf3   :  { %s9705_s7 = scalar_lea.hbm %s10960_s6, 4096 }
  0xf4   :  { %p9706_p12 = scmp.ne.s32.totalorder %s10960_s6, %s9705_s7  ;;  %p9709_p13 = scmp.lt.u32.totalorder %s9705_s7, %s10960_s6 }
  0xf6   :  { %p9711_p0 = pnand %p9709_p13, %p9706_p12 }
  0xf8   :  { %9714 = shalt.err (!%p9711_p0)
}
  0xf9   :  { %s9715_s30 = scalar_lea.vmem %s110_s3, 4096  ;;  %p9720_p2 = scmp.lt.s32.totalorder %s110_s3, %s110_s3 }
  0xfa   :  { %p9716_p1 = scmp.ne.s32.totalorder %s110_s3, %s9715_s30  ;;  %p9721_p3 = scmp.lt.s32.totalorder %s9715_s30, %s9715_s30 }
  0xfc   :  { %p9722_p4 = por %p9721_p3, %p9720_p2 }
  0xfe   :  { %p9723_p5 = pnand %p9722_p4, %p9716_p1 }
 0x100   :  { %9726 = shalt.err (!%p9723_p5)
}
 0x101   :  { %115 = dma.hbm_to_vmem [thread:$0]  %s10960_s6, 4096, %s110_s3, [#allocation13], %s9905_s24, %s9905_s24, %s9906_s26  }
 0x102   :  { %s9727_s1 = scalar_lea.hbm %s10962_s8, 4096 }
 0x103   :  { %p9728_p6 = scmp.ne.s32.totalorder %s10962_s8, %s9727_s1  ;;  %p9731_p7 = scmp.lt.u32.totalorder %s9727_s1, %s10962_s8 }
 0x105   :  { %p9733_p8 = pnand %p9731_p7, %p9728_p6 }
 0x107   :  { %9736 = shalt.err (!%p9733_p8)
}
 0x108   :  { %s9737_s0 = scalar_lea.vmem %s10217_s9, 4096  ;;  %p9742_p10 = scmp.lt.s32.totalorder %s10217_s9, %s10217_s9 }
 0x109   :  { %p9738_p9 = scmp.ne.s32.totalorder %s10217_s9, %s9737_s0  ;;  %p9743_p11 = scmp.lt.s32.totalorder %s9737_s0, %s9737_s0 }
 0x10b   :  { %p9744_p12 = por %p9743_p11, %p9742_p10 }
 0x10d   :  { %p9745_p13 = pnand %p9744_p12, %p9738_p9 }
 0x10f   :  { %9748 = shalt.err (!%p9745_p13)
}
 0x110   :  { %139 = dma.hbm_to_vmem [thread:$0]  %s10962_s8, 4096, %s10217_s9, [#allocation16], %s9905_s24, %s9905_s24, %s9906_s26  }
 0x111   :  { %s9921_s3 = smov [#allocation20]   ;;  %s9922_s29 = smov [#allocation23]  }
 0x112   :  { %s155_s21 = sshll.u32 %s9921_s3, 4  ;;  %s177_s20 = sshll.u32 %s9922_s29, 4  ;;  %s156_s21 = int_to_ptr.vmem [resolvable:$true] %s155_s21  ;;  %s10254_s20 = int_to_ptr.vmem [resolvable:$true] %s177_s20 }
 0x113   :  { %s9749_s22 = scalar_lea.hbm %s10964_s10, 16384 }
 0x114   :  { %p9750_p0 = scmp.ne.s32.totalorder %s10964_s10, %s9749_s22  ;;  %p9753_p1 = scmp.lt.u32.totalorder %s9749_s22, %s10964_s10 }
 0x116   :  { %p9755_p2 = pnand %p9753_p1, %p9750_p0 }
 0x118   :  { %9758 = shalt.err (!%p9755_p2)
}
 0x119   :  { %s9759_s8 = scalar_lea.vmem %s156_s21, 16384  ;;  %p9764_p4 = scmp.lt.s32.totalorder %s156_s21, %s156_s21 }
 0x11a   :  { %p9760_p3 = scmp.ne.s32.totalorder %s156_s21, %s9759_s8  ;;  %p9765_p5 = scmp.lt.s32.totalorder %s9759_s8, %s9759_s8 }
 0x11c   :  { %p9766_p6 = por %p9765_p5, %p9764_p4 }
 0x11e   :  { %p9767_p7 = pnand %p9766_p6, %p9760_p3 }
 0x120   :  { %9770 = shalt.err (!%p9767_p7)
}
 0x121   :  { %161 = dma.hbm_to_vmem [thread:$0]  %s10964_s10, 16384, %s156_s21, [#allocation19], %s9905_s24, %s9905_s24, %s9906_s26  }
 0x122   :  { %s9771_s1 = scalar_lea.hbm %s10966_s12, 16384 }
 0x123   :  { %p9772_p8 = scmp.ne.s32.totalorder %s10966_s12, %s9771_s1  ;;  %p9775_p9 = scmp.lt.u32.totalorder %s9771_s1, %s10966_s12 }
 0x125   :  { %p9777_p10 = pnand %p9775_p9, %p9772_p8 }
 0x127   :  { %9780 = shalt.err (!%p9777_p10)
}
 0x128   :  { %s9781_s0 = scalar_lea.vmem %s10254_s20, 16384  ;;  %p9786_p12 = scmp.lt.s32.totalorder %s10254_s20, %s10254_s20 }
 0x129   :  { %p9782_p11 = scmp.ne.s32.totalorder %s10254_s20, %s9781_s0  ;;  %p9787_p13 = scmp.lt.s32.totalorder %s9781_s0, %s9781_s0 }
 0x12b   :  { %p9788_p0 = por %p9787_p13, %p9786_p12 }
 0x12d   :  { %p9789_p1 = pnand %p9788_p0, %p9782_p11 }
 0x12f   :  { %9792 = shalt.err (!%p9789_p1)
}
 0x130   :  { %183 = dma.hbm_to_vmem [thread:$0]  %s10966_s12, 16384, %s10254_s20, [#allocation22], %s9905_s24, %s9905_s24, %s9906_s26  }
 0x131   :  { %s9923_s15 = smov [#allocation26]   ;;  %s9924_s21 = smov [#allocation29]  }
 0x132   :  { %s199_s3 = sshll.u32 %s9923_s15, 4  ;;  %s221_s29 = sshll.u32 %s9924_s21, 4  ;;  %s200_s3 = int_to_ptr.vmem [resolvable:$true] %s199_s3  ;;  %s10291_s29 = int_to_ptr.vmem [resolvable:$true] %s221_s29 }
 0x133   :  { %s9793_s22 = scalar_lea.hbm %s10968_s14, 16384 }
 0x134   :  { %p9794_p2 = scmp.ne.s32.totalorder %s10968_s14, %s9793_s22  ;;  %p9797_p3 = scmp.lt.u32.totalorder %s9793_s22, %s10968_s14 }
 0x136   :  { %p9799_p4 = pnand %p9797_p3, %p9794_p2 }
 0x138   :  { %9802 = shalt.err (!%p9799_p4)
}
 0x139   :  { %s9803_s12 = scalar_lea.vmem %s200_s3, 16384  ;;  %p9808_p6 = scmp.lt.s32.totalorder %s200_s3, %s200_s3 }
 0x13a   :  { %p9804_p5 = scmp.ne.s32.totalorder %s200_s3, %s9803_s12  ;;  %p9809_p7 = scmp.lt.s32.totalorder %s9803_s12, %s9803_s12 }
 0x13c   :  { %p9810_p8 = por %p9809_p7, %p9808_p6 }
 0x13e   :  { %p9811_p9 = pnand %p9810_p8, %p9804_p5 }
 0x140   :  { %9814 = shalt.err (!%p9811_p9)
}
 0x141   :  { %205 = dma.hbm_to_vmem [thread:$0]  %s10968_s14, 16384, %s200_s3, [#allocation25], %s9905_s24, %s9905_s24, %s9906_s26  }
 0x142   :  { %s9815_s17 = scalar_lea.hbm %s10970_s16, 16384 }
 0x143   :  { %p9816_p10 = scmp.ne.s32.totalorder %s10970_s16, %s9815_s17  ;;  %p9819_p11 = scmp.lt.u32.totalorder %s9815_s17, %s10970_s16 }
 0x145   :  { %p9821_p12 = pnand %p9819_p11, %p9816_p10 }
 0x147   :  { %9824 = shalt.err (!%p9821_p12)
}
 0x148   :  { %s9825_s25 = scalar_lea.vmem %s10291_s29, 16384  ;;  %p9830_p0 = scmp.lt.s32.totalorder %s10291_s29, %s10291_s29 }
 0x149   :  { %p9826_p13 = scmp.ne.s32.totalorder %s10291_s29, %s9825_s25  ;;  %p9831_p1 = scmp.lt.s32.totalorder %s9825_s25, %s9825_s25 }
 0x14b   :  { %p9832_p2 = por %p9831_p1, %p9830_p0 }
 0x14d   :  { %p9833_p3 = pnand %p9832_p2, %p9826_p13 }
 0x14f   :  { %9836 = shalt.err (!%p9833_p3)
}
 0x150   :  { %227 = dma.hbm_to_vmem [thread:$0]  %s10970_s16, 16384, %s10291_s29, [#allocation28], %s9905_s24, %s9905_s24, %s9906_s26  }
 0x151   :  { %s9925_s0 = smov [#allocation32]   ;;  %s9837_s3 = scalar_lea.hbm %s10972_s18, 64 }
 0x152   :  { %s244_s10 = sshll.u32 %s9925_s0, 4  ;;  %p9838_p4 = scmp.ne.s32.totalorder %s10972_s18, %s9837_s3  ;;  %s245_s10 = int_to_ptr.vmem [resolvable:$true] %s244_s10 }
 0x153   :  { %p9841_p5 = scmp.lt.u32.totalorder %s9837_s3, %s10972_s18 }
 0x155   :  { %p9843_p6 = pnand %p9841_p5, %p9838_p4 }
 0x157   :  { %9846 = shalt.err (!%p9843_p6)
}
 0x158   :  { %s9847_s13 = scalar_lea.vmem %s245_s10, 64  ;;  %p9852_p8 = scmp.lt.s32.totalorder %s245_s10, %s245_s10 }
 0x159   :  { %p9848_p7 = scmp.ne.s32.totalorder %s245_s10, %s9847_s13  ;;  %p9853_p9 = scmp.lt.s32.totalorder %s9847_s13, %s9847_s13 }
 0x15b   :  { %p9854_p10 = por %p9853_p9, %p9852_p8 }
 0x15d   :  { %p9855_p11 = pnand %p9854_p10, %p9848_p7 }
 0x15f   :  { %9858 = shalt.err (!%p9855_p11)
}
 0x160   :  { %247 = dma.hbm_to_vmem [thread:$0]  %s10972_s18, 64, %s245_s10, [#allocation31]  }
 0x161   :  { %9881 = dma.done.wait [#allocation4], 1024  }
 0x162   :  { %9882 = vsyncadd [#allocation4], 4294966272 }
 0x163   :  { %9883 = dma.done.wait [#allocation7], 256  }
 0x164   :  { %9884 = vsyncadd [#allocation7], 4294967040 }
 0x165   :  { %9885 = dma.done.wait [#allocation10], 12288  }
 0x166   :  { %9886 = vsyncadd [#allocation10], 4294955008 }
 0x167   :  { %9887 = dma.done.wait [#allocation13], 4160  }
 0x168   :  { %9888 = vsyncadd [#allocation13], 4294963136 }
 0x169   :  { %9889 = dma.done.wait [#allocation16], 16384  }
 0x16a   :  { %9890 = vsyncadd [#allocation16], 4294950912 }
 0x16b   :  { %9891 = dma.done.wait [#allocation19], 16448  }
 0x16c   :  { %9892 = vsyncadd [#allocation19], 4294950848 }
 0x16d   :  { %9893 = dma.done.wait [#allocation22], 16448  }
 0x16e   :  { %9894 = vsyncadd [#allocation22], 4294950848 }
 0x16f   :  { %9895 = dma.done.wait [#allocation25], 16448  }
 0x170   :  { %9896 = vsyncadd [#allocation25], 4294950848 }
 0x171   :  { %9897 = dma.done.wait [#allocation28], 16448  }
 0x172   :  { %9898 = vsyncadd [#allocation28], 4294950848 }
 0x173   :  { %9899 = dma.done.wait [#allocation31], 128  }
 0x174   :  { %9900 = vsyncadd [#allocation31], 4294967168  ;;  %v8114_v1 = vld [vmem:[#allocation9 + $0x4] ss:$16 sps:$4 sm:$0xff]   ;;  %v8116_v2 = vld [vmem:[#allocation9 + $0xc] ss:$16 sps:$4 sm:$0xff]  }
 0x175   :  { %762 = vmatprep.subr.bf16.mxu0 %v8114_v1  ;;  %v8118_v3 = vld [vmem:[#allocation9] ss:$16 sps:$4 sm:$0xff]   ;;  %v8119_v4 = vld [vmem:[#allocation9 + $0x8] ss:$16 sps:$4 sm:$0xff]   ;;  %835 = vmatprep.subr.bf16.mxu1 %v8116_v2  ;;  %v8120_v5 = vld [vmem:[#allocation9 + $0x24] ss:$16 sps:$4 sm:$0xff]  }
 0x176   :  { %763 = vmatpush1.bf16.msra.mxu0 %v8118_v3  ;;  %836 = vmatpush1.bf16.msra.mxu1 %v8119_v4  ;;  %v8122_v6 = vld [vmem:[#allocation9 + $0x2c] ss:$16 sps:$4 sm:$0xff]   ;;  %v8124_v7 = vld [vmem:[#allocation9 + $0x20] ss:$16 sps:$4 sm:$0xff]   ;;  %v8125_v8 = vld [vmem:[#allocation9 + $0x28] ss:$16 sps:$4 sm:$0xff]  }
 0x177   :  { %764 = vmatprep.subr.bf16.mxu0 %v8120_v5  ;;  %837 = vmatprep.subr.bf16.mxu1 %v8122_v6  ;;  %v8126_v9 = vld [vmem:[#allocation9 + $0x44] ss:$16 sps:$4 sm:$0xff]   ;;  %v8128_v10 = vld [vmem:[#allocation9 + $0x4c] ss:$16 sps:$4 sm:$0xff]   ;;  %v8130_v11 = vld [vmem:[#allocation9 + $0x40] ss:$16 sps:$4 sm:$0xff]  }
 0x178   :  { %v8131_v12 = vld [vmem:[#allocation9 + $0x48] ss:$16 sps:$4 sm:$0xff]   ;;  %v8132_v13 = vld [vmem:[#allocation9 + $0x64] ss:$16 sps:$4 sm:$0xff]   ;;  %v8134_v14 = vld [vmem:[#allocation9 + $0x6c] ss:$16 sps:$4 sm:$0xff]  }
 0x179   :  { %v8136_v15 = vld [vmem:[#allocation9 + $0x60] ss:$16 sps:$4 sm:$0xff]   ;;  %v8137_v16 = vld [vmem:[#allocation9 + $0x68] ss:$16 sps:$4 sm:$0xff]   ;;  %v8138_v17 = vld [vmem:[#allocation9 + $0x84] ss:$16 sps:$4 sm:$0xff]  }
 0x17a   :  { %765 = vmatpush1.bf16.msra.mxu0 %v8124_v7  ;;  %838 = vmatpush1.bf16.msra.mxu1 %v8125_v8  ;;  %v8140_v18 = vld [vmem:[#allocation9 + $0x8c] ss:$16 sps:$4 sm:$0xff]   ;;  %v8142_v19 = vld [vmem:[#allocation9 + $0x80] ss:$16 sps:$4 sm:$0xff]   ;;  %v8143_v20 = vld [vmem:[#allocation9 + $0x88] ss:$16 sps:$4 sm:$0xff]  }
 0x17b   :  { %766 = vmatprep.subr.bf16.mxu0 %v8126_v9  ;;  %839 = vmatprep.subr.bf16.mxu1 %v8128_v10  ;;  %v8144_v21 = vld [vmem:[#allocation9 + $0xa4] ss:$16 sps:$4 sm:$0xff]   ;;  %v8146_v22 = vld [vmem:[#allocation9 + $0xac] ss:$16 sps:$4 sm:$0xff]   ;;  %v8148_v23 = vld [vmem:[#allocation9 + $0xa0] ss:$16 sps:$4 sm:$0xff]  }
 0x17c   :  { %v8149_v24 = vld [vmem:[#allocation9 + $0xa8] ss:$16 sps:$4 sm:$0xff]   ;;  %v8150_v25 = vld [vmem:[#allocation9 + $0xc4] ss:$16 sps:$4 sm:$0xff]   ;;  %v8152_v26 = vld [vmem:[#allocation9 + $0xcc] ss:$16 sps:$4 sm:$0xff]  }
 0x17d   :  { %v8154_v27 = vld [vmem:[#allocation9 + $0xc0] ss:$16 sps:$4 sm:$0xff]   ;;  %v8155_v28 = vld [vmem:[#allocation9 + $0xc8] ss:$16 sps:$4 sm:$0xff]   ;;  %v8156_v29 = vld [vmem:[#allocation9 + $0xe4] ss:$16 sps:$4 sm:$0xff]  }
 0x17e   :  { %767 = vmatpush1.bf16.msra.mxu0 %v8130_v11  ;;  %840 = vmatpush1.bf16.msra.mxu1 %v8131_v12  ;;  %v8158_v30 = vld [vmem:[#allocation9 + $0xec] ss:$16 sps:$4 sm:$0xff]   ;;  %v8160_v31 = vld [vmem:[#allocation9 + $0xe0] ss:$16 sps:$4 sm:$0xff]   ;;  %v8161_v32 = vld [vmem:[#allocation9 + $0xe8] ss:$16 sps:$4 sm:$0xff]  }
 0x17f   :  { %768 = vmatprep.subr.bf16.mxu0 %v8132_v13  ;;  %841 = vmatprep.subr.bf16.mxu1 %v8134_v14  ;;  %v8162_v33 = vld [vmem:[#allocation9 + $0x104] ss:$16 sps:$4 sm:$0xff]   ;;  %v8164_v34 = vld [vmem:[#allocation9 + $0x10c] ss:$16 sps:$4 sm:$0xff]   ;;  %v8166_v35 = vld [vmem:[#allocation9 + $0x100] ss:$16 sps:$4 sm:$0xff]  }
 0x180   :  { %v8167_v36 = vld [vmem:[#allocation9 + $0x108] ss:$16 sps:$4 sm:$0xff]   ;;  %v8168_v37 = vld [vmem:[#allocation9 + $0x124] ss:$16 sps:$4 sm:$0xff]   ;;  %v8170_v38 = vld [vmem:[#allocation9 + $0x12c] ss:$16 sps:$4 sm:$0xff]  }
 0x181   :  { %v8172_v39 = vld [vmem:[#allocation9 + $0x120] ss:$16 sps:$4 sm:$0xff]   ;;  %v8173_v40 = vld [vmem:[#allocation9 + $0x128] ss:$16 sps:$4 sm:$0xff]   ;;  %v8174_v41 = vld [vmem:[#allocation9 + $0x144] ss:$16 sps:$4 sm:$0xff]  }
 0x182   :  { %769 = vmatpush1.bf16.msra.mxu0 %v8136_v15  ;;  %842 = vmatpush1.bf16.msra.mxu1 %v8137_v16  ;;  %v8176_v42 = vld [vmem:[#allocation9 + $0x14c] ss:$16 sps:$4 sm:$0xff]   ;;  %v8178_v43 = vld [vmem:[#allocation9 + $0x140] ss:$16 sps:$4 sm:$0xff]   ;;  %v8179_v44 = vld [vmem:[#allocation9 + $0x148] ss:$16 sps:$4 sm:$0xff]  }
 0x183   :  { %770 = vmatprep.subr.bf16.mxu0 %v8138_v17  ;;  %843 = vmatprep.subr.bf16.mxu1 %v8140_v18  ;;  %v8180_v45 = vld [vmem:[#allocation9 + $0x164] ss:$16 sps:$4 sm:$0xff]   ;;  %v8182_v46 = vld [vmem:[#allocation9 + $0x16c] ss:$16 sps:$4 sm:$0xff]   ;;  %v8184_v47 = vld [vmem:[#allocation9 + $0x160] ss:$16 sps:$4 sm:$0xff]  }
 0x184   :  { %v8185_v48 = vld [vmem:[#allocation9 + $0x168] ss:$16 sps:$4 sm:$0xff]   ;;  %v8212_v49 = vld [vmem:[#allocation3 + $0x4] ss:$8 sps:$4 sm:$0xff]   ;;  %v8190_v52 = vld [vmem:[#allocation9 + $0x180] ss:$16 sps:$4 sm:$0xff]  }
 0x185   :  { %v8186_v50 = vld [vmem:[#allocation9 + $0x184] ss:$16 sps:$4 sm:$0xff]   ;;  %v8188_v51 = vld [vmem:[#allocation9 + $0x18c] ss:$16 sps:$4 sm:$0xff]   ;;  %794 = vmatprep.mubr.bf16.mxu0 %v8212_v49  ;;  %867 = vmatprep.mubr.bf16.mxu1 %v8212_v49  ;;  %v8191_v53 = vld [vmem:[#allocation9 + $0x188] ss:$16 sps:$4 sm:$0xff]  }
 0x186   :  { %771 = vmatpush1.bf16.msra.mxu0 %v8142_v19  ;;  %844 = vmatpush1.bf16.msra.mxu1 %v8143_v20  ;;  %v8192_v54 = vld [vmem:[#allocation9 + $0x1a4] ss:$16 sps:$4 sm:$0xff]   ;;  %v8194_v55 = vld [vmem:[#allocation9 + $0x1ac] ss:$16 sps:$4 sm:$0xff]   ;;  %v8196_v56 = vld [vmem:[#allocation9 + $0x1a0] ss:$16 sps:$4 sm:$0xff]  }
 0x187   :  { %772 = vmatprep.subr.bf16.mxu0 %v8144_v21  ;;  %845 = vmatprep.subr.bf16.mxu1 %v8146_v22  ;;  %v8197_v57 = vld [vmem:[#allocation9 + $0x1a8] ss:$16 sps:$4 sm:$0xff]   ;;  %v8198_v58 = vld [vmem:[#allocation9 + $0x1c4] ss:$16 sps:$4 sm:$0xff]   ;;  %v8200_v59 = vld [vmem:[#allocation9 + $0x1cc] ss:$16 sps:$4 sm:$0xff]  }
 0x188   :  { %v8202_v60 = vld [vmem:[#allocation9 + $0x1c0] ss:$16 sps:$4 sm:$0xff]   ;;  %v8203_v61 = vld [vmem:[#allocation9 + $0x1c8] ss:$16 sps:$4 sm:$0xff]   ;;  %v8204_v62 = vld [vmem:[#allocation9 + $0x1e4] ss:$16 sps:$4 sm:$0xff]  }
 0x189   :  { %v8206_v63 = vld [vmem:[#allocation9 + $0x1ec] ss:$16 sps:$4 sm:$0xff]   ;;  %v8208_v0 = vld [vmem:[#allocation9 + $0x1e0] ss:$16 sps:$4 sm:$0xff]   ;;  %v8209_v1 = vld [vmem:[#allocation9 + $0x1e8] ss:$16 sps:$4 sm:$0xff]  }
 0x18a   :  { %773 = vmatpush1.bf16.msra.mxu0 %v8148_v23  ;;  %846 = vmatpush1.bf16.msra.mxu1 %v8149_v24  ;;  %v10340_v2 = vld [vmem:[#allocation11 + $0x4] ss:$16 sps:$4 sm:$0xff]   ;;  %v10342_v3 = vld [vmem:[#allocation11 + $0xc] ss:$16 sps:$4 sm:$0xff]   ;;  %v8210_v4 = vld [vmem:[#allocation3] ss:$8 sps:$4 sm:$0xff]  }
 0x18b   :  { %774 = vmatprep.subr.bf16.mxu0 %v8150_v25  ;;  %847 = vmatprep.subr.bf16.mxu1 %v8152_v26  ;;  %v10344_v5 = vld [vmem:[#allocation11] ss:$16 sps:$4 sm:$0xff]   ;;  %v10346_v6 = vld [vmem:[#allocation11 + $0x8] ss:$16 sps:$4 sm:$0xff]   ;;  %v10348_v7 = vld [vmem:[#allocation11 + $0x24] ss:$16 sps:$4 sm:$0xff]  }
 0x18c   :  { %v10352_v8 = vld [vmem:[#allocation11 + $0x2c] ss:$16 sps:$4 sm:$0xff]   ;;  %v10356_v10 = vld [vmem:[#allocation11 + $0x20] ss:$16 sps:$4 sm:$0xff]   ;;  %v10358_v11 = vld [vmem:[#allocation11 + $0x28] ss:$16 sps:$4 sm:$0xff]  }
 0x18d   :  { %v8225_v9 = vld [vmem:[#allocation3 + $0x14] ss:$8 sps:$4 sm:$0xff]   ;;  %v8227_v12 = vld [vmem:[#allocation3 + $0x10] ss:$8 sps:$4 sm:$0xff]   ;;  %v8240_v19 = vld [vmem:[#allocation3 + $0x24] ss:$8 sps:$4 sm:$0xff]  }
 0x18e   :  { %775 = vmatpush1.bf16.msra.mxu0 %v8154_v27  ;;  %848 = vmatpush1.bf16.msra.mxu1 %v8155_v28  ;;  %v10362_v13 = vld [vmem:[#allocation11 + $0x44] ss:$16 sps:$4 sm:$0xff]   ;;  %v10364_v14 = vld [vmem:[#allocation11 + $0x4c] ss:$16 sps:$4 sm:$0xff]   ;;  %v10366_v15 = vld [vmem:[#allocation11 + $0x40] ss:$16 sps:$4 sm:$0xff]  }
 0x18f   :  { %776 = vmatprep.subr.bf16.mxu0 %v8156_v29  ;;  %849 = vmatprep.subr.bf16.mxu1 %v8158_v30  ;;  %v10368_v16 = vld [vmem:[#allocation11 + $0x48] ss:$16 sps:$4 sm:$0xff]   ;;  %v10370_v17 = vld [vmem:[#allocation11 + $0x64] ss:$16 sps:$4 sm:$0xff]   ;;  %v10372_v18 = vld [vmem:[#allocation11 + $0x6c] ss:$16 sps:$4 sm:$0xff]  }
 0x190   :  { %v10378_v20 = vld [vmem:[#allocation11 + $0x60] ss:$16 sps:$4 sm:$0xff]   ;;  %v10380_v21 = vld [vmem:[#allocation11 + $0x68] ss:$16 sps:$4 sm:$0xff]   ;;  %v10382_v22 = vld [vmem:[#allocation11 + $0x84] ss:$16 sps:$4 sm:$0xff]  }
 0x191   :  { %v10384_v23 = vld [vmem:[#allocation11 + $0x8c] ss:$16 sps:$4 sm:$0xff]   ;;  %v8242_v24 = vld [vmem:[#allocation3 + $0x20] ss:$8 sps:$4 sm:$0xff]   ;;  %v10394_v27 = vld [vmem:[#allocation11 + $0xa4] ss:$16 sps:$4 sm:$0xff]  }
 0x192   :  { %777 = vmatpush1.bf16.msra.mxu0 %v8160_v31  ;;  %850 = vmatpush1.bf16.msra.mxu1 %v8161_v32  ;;  %v10390_v25 = vld [vmem:[#allocation11 + $0x80] ss:$16 sps:$4 sm:$0xff]   ;;  %v10392_v26 = vld [vmem:[#allocation11 + $0x88] ss:$16 sps:$4 sm:$0xff]   ;;  %v10396_v28 = vld [vmem:[#allocation11 + $0xac] ss:$16 sps:$4 sm:$0xff]  }
 0x193   :  { %778 = vmatprep.subr.bf16.mxu0 %v8162_v33  ;;  %851 = vmatprep.subr.bf16.mxu1 %v8164_v34  ;;  %v8255_v29 = vld [vmem:[#allocation3 + $0x34] ss:$8 sps:$4 sm:$0xff]   ;;  %v8253_v30 = vld [vmem:[#allocation11 + $0xa0] ss:$16 sps:$4 sm:$0xff]   ;;  %v8254_v31 = vld [vmem:[#allocation11 + $0xa8] ss:$16 sps:$4 sm:$0xff]  }
 0x194   :  { %v8258_v32 = vld [vmem:[#allocation11 + $0xc4] ss:$16 sps:$4 sm:$0xff]   ;;  %v8260_v33 = vld [vmem:[#allocation11 + $0xcc] ss:$16 sps:$4 sm:$0xff]   ;;  %v8257_v34 = vld [vmem:[#allocation3 + $0x30] ss:$8 sps:$4 sm:$0xff]  }
 0x195   :  { %s9927_s18 = smov [#allocation33]   ;;  %vm7211_vm0 = vcmask 7168  }
 0x196   :  { %779 = vmatpush1.bf16.msra.mxu0 %v8166_v35  ;;  %852 = vmatpush1.bf16.msra.mxu1 %v8167_v36  ;;  %v8262_v35 = vld [vmem:[#allocation11 + $0xc0] ss:$16 sps:$4 sm:$0xff]   ;;  %v8263_v36 = vld [vmem:[#allocation11 + $0xc8] ss:$16 sps:$4 sm:$0xff]   ;;  %s7219_s26 = sshll.u32 %s9927_s18, 4  ;;  %s7220_s26 = int_to_ptr.vmem [resolvable:$true] %s7219_s26 }
 0x197   :  { %780 = vmatprep.subr.bf16.mxu0 %v8168_v37  ;;  %853 = vmatprep.subr.bf16.mxu1 %v8170_v38  ;;  %v8264_v37 = vld [vmem:[#allocation11 + $0xe4] ss:$16 sps:$4 sm:$0xff]   ;;  %v8266_v38 = vld [vmem:[#allocation11 + $0xec] ss:$16 sps:$4 sm:$0xff]   ;;  %s9859_s29 = scalar_lea.vmem %s7220_s26, 128  ;;  %p9864_p13 = scmp.lt.s32.totalorder %s7220_s26, %s7220_s26 }
 0x198   :  { %p9860_p12 = scmp.ne.s32.totalorder %s7220_s26, %s9859_s29  ;;  %p9865_p0 = scmp.lt.s32.totalorder %s9859_s29, %s9859_s29 }
 0x19a   :  { %781 = vmatpush1.bf16.msra.mxu0 %v8172_v39  ;;  %854 = vmatpush1.bf16.msra.mxu1 %v8173_v40  ;;  %v8268_v39 = vld [vmem:[#allocation11 + $0xe0] ss:$16 sps:$4 sm:$0xff]   ;;  %v8269_v40 = vld [vmem:[#allocation11 + $0xe8] ss:$16 sps:$4 sm:$0xff]   ;;  %p9866_p1 = por %p9865_p0, %p9864_p13 }
 0x19b   :  { %782 = vmatprep.subr.bf16.mxu0 %v8174_v41  ;;  %855 = vmatprep.subr.bf16.mxu1 %v8176_v42  ;;  %v10981_v41 = vmov 0   ;;  %v382_v42 = vlaneseq }
 0x19c   :  { %p9867_p2 = pnand %p9866_p1, %p9860_p12 }
 0x19e   :  { %783 = vmatpush1.bf16.msra.mxu0 %v8178_v43  ;;  %856 = vmatpush1.bf16.msra.mxu1 %v8179_v44  ;;  %v383_v43 = vshrl.u32 %v382_v42, 7 }
 0x19f   :  { %784 = vmatprep.subr.bf16.mxu0 %v8180_v45  ;;  %857 = vmatprep.subr.bf16.mxu1 %v8182_v46  ;;  %v380_v45 = vld [vmem:[#allocation12] sm:$0xf] }
 0x1a0   :  { %v10436_v44 = vsub.s32 2, %v383_v43  ;;  %v10438_v46 = vsub.s32 3, %v383_v43 }
 0x1a2   :  { %785 = vmatpush1.bf16.msra.mxu0 %v8184_v47  ;;  %858 = vmatpush1.bf16.msra.mxu1 %v8185_v48  ;;  %11002 = vst [vmem:[#allocation45_spill] sm:$0xff] %v10436_v44  ;;  %11003 = vst [vmem:[#allocation46_spill] sm:$0xff] %v10438_v46  ;;  %v10440_v47 = vsub.s32 0, %v383_v43  ;;  %v10442_v48 = vsub.s32 1, %v383_v43  ;;  %v10445_v49 = vrot.slane %v380_v45, %v10436_v44 }
 0x1a3   :  { %786 = vmatprep.subr.bf16.mxu0 %v8186_v50  ;;  %859 = vmatprep.subr.bf16.mxu1 %v8188_v51 }
 0x1a4   :  { %11004 = vst [vmem:[#allocation47_spill] sm:$0xff] %v10440_v47  ;;  %11005 = vst [vmem:[#allocation48_spill] sm:$0xff] %v10442_v48 }
 0x1a6   :  { %787 = vmatpush1.bf16.msra.mxu0 %v8190_v52  ;;  %860 = vmatpush1.bf16.msra.mxu1 %v8191_v53  ;;  %v10452_v52 = vrot.slane %v380_v45, %v10438_v46  ;;  %v385_v53 = vrot.slane %v380_v45, %v10440_v47  ;;  %v10628_v46 = vld [vmem:[#allocation11 + $0xc] ss:$16 sps:$4 sm:$0xff]  }
 0x1a7   :  { %788 = vmatprep.subr.bf16.mxu0 %v8192_v54  ;;  %861 = vmatprep.subr.bf16.mxu1 %v8194_v55 }
 0x1aa   :  { %789 = vmatpush1.bf16.msra.mxu0 %v8196_v56  ;;  %862 = vmatpush1.bf16.msra.mxu1 %v8197_v57  ;;  %v389_v56 = vrot.slane %v380_v45, %v10442_v48 }
 0x1ab   :  { %790 = vmatprep.subr.bf16.mxu0 %v8198_v58  ;;  %863 = vmatprep.subr.bf16.mxu1 %v8200_v59 }
 0x1ae   :  { %791 = vmatpush1.bf16.msra.mxu0 %v8202_v60  ;;  %864 = vmatpush1.bf16.msra.mxu1 %v8203_v61 }
 0x1af   :  { %792 = vmatprep.subr.bf16.mxu0 %v8204_v62  ;;  %865 = vmatprep.subr.bf16.mxu1 %v8206_v63 }
 0x1b2   :  { %793 = vmatpush1.bf16.msra.mxu0 %v8208_v0  ;;  %866 = vmatpush1.bf16.msra.mxu1 %v8209_v1 }
 0x1b3   :  { %1100 = vmatprep.subr.bf16.mxu0 %v10340_v2  ;;  %1141 = vmatprep.subr.bf16.mxu1 %v10342_v3 }
 0x1b5   :  { %795 = vmatmul.mubr.bf16.vlgmr.msra.gmra.mrb[0].mxu0 %v8210_v4  ;;  %868 = vmatmul.mubr.bf16.vlgmr.msra.gmra.mrb[0].mxu1 %v8210_v4 }
 0x1b6   :  { %1101 = vmatpush1.bf16.msra.mxu0 %v10344_v5  ;;  %1142 = vmatpush1.bf16.msra.mxu1 %v10346_v6 }
 0x1b7   :  { %1102 = vmatprep.subr.bf16.mxu0 %v10348_v7  ;;  %1143 = vmatprep.subr.bf16.mxu1 %v10352_v8 }
 0x1b8   :  { %804 = vmatprep.mubr.bf16.mxu0 %v8225_v9  ;;  %877 = vmatprep.mubr.bf16.mxu1 %v8225_v9 }
 0x1ba   :  { %1103 = vmatpush1.bf16.msra.mxu0 %v10356_v10  ;;  %1144 = vmatpush1.bf16.msra.mxu1 %v10358_v11 }
 0x1bb   :  { %1104 = vmatprep.subr.bf16.mxu0 %v10362_v13  ;;  %1145 = vmatprep.subr.bf16.mxu1 %v10364_v14 }
 0x1bd   :  { %805 = vmatmul.mubr.bf16.gmra.mrb[4].mxu0 %v8227_v12  ;;  %878 = vmatmul.mubr.bf16.gmra.mrb[4].mxu1 %v8227_v12 }
 0x1be   :  { %1105 = vmatpush1.bf16.msra.mxu0 %v10366_v15  ;;  %1146 = vmatpush1.bf16.msra.mxu1 %v10368_v16 }
 0x1bf   :  { %1106 = vmatprep.subr.bf16.mxu0 %v10370_v17  ;;  %1147 = vmatprep.subr.bf16.mxu1 %v10372_v18 }
 0x1c0   :  { %814 = vmatprep.mubr.bf16.mxu0 %v8240_v19  ;;  %887 = vmatprep.mubr.bf16.mxu1 %v8240_v19 }
 0x1c2   :  { %1107 = vmatpush1.bf16.msra.mxu0 %v10378_v20  ;;  %1148 = vmatpush1.bf16.msra.mxu1 %v10380_v21 }
 0x1c3   :  { %1108 = vmatprep.subr.bf16.mxu0 %v10382_v22  ;;  %1149 = vmatprep.subr.bf16.mxu1 %v10384_v23 }
 0x1c5   :  { %815 = vmatmul.mubr.bf16.gmra.mrb[8].mxu0 %v8242_v24  ;;  %888 = vmatmul.mubr.bf16.gmra.mrb[8].mxu1 %v8242_v24 }
 0x1c6   :  { %1109 = vmatpush1.bf16.msra.mxu0 %v10390_v25  ;;  %1150 = vmatpush1.bf16.msra.mxu1 %v10392_v26 }
 0x1c7   :  { %1110 = vmatprep.subr.bf16.mxu0 %v10394_v27  ;;  %1151 = vmatprep.subr.bf16.mxu1 %v10396_v28 }
 0x1c8   :  { %824 = vmatprep.mubr.bf16.mxu0 %v8255_v29  ;;  %897 = vmatprep.mubr.bf16.mxu1 %v8255_v29 }
 0x1ca   :  { %1111 = vmatpush1.bf16.msra.mxu0 %v8253_v30  ;;  %1152 = vmatpush1.bf16.msra.mxu1 %v8254_v31 }
 0x1cb   :  { %1112 = vmatprep.subr.bf16.mxu0 %v8258_v32  ;;  %1153 = vmatprep.subr.bf16.mxu1 %v8260_v33 }
 0x1cd   :  { %825 = vmatmul.mubr.bf16.gmra.mrb[12].mxu0 %v8257_v34  ;;  %898 = vmatmul.mubr.bf16.gmra.mrb[12].mxu1 %v8257_v34 }
 0x1ce   :  { %1113 = vmatpush1.bf16.msra.mxu0 %v8262_v35  ;;  %1154 = vmatpush1.bf16.msra.mxu1 %v8263_v36 }
 0x1cf   :  { %1114 = vmatprep.subr.bf16.mxu0 %v8264_v37  ;;  %1155 = vmatprep.subr.bf16.mxu1 %v8266_v38 }
 0x1d0   :  { %1132 = vmatprep.mubr.bf16.mxu0 %v10981_v41  ;;  %1173 = vmatprep.mubr.bf16.mxu1 %v10981_v41 }
 0x1d2   :  { %1115 = vmatpush1.bf16.msra.mxu0 %v8268_v39  ;;  %1156 = vmatpush1.bf16.msra.mxu1 %v8269_v40 }
 0x1d3   :  { %1211 = vmatprep.subr.bf16.mxu0 %v10340_v2  ;;  %1252 = vmatprep.subr.bf16.mxu1 %v10342_v3 }
 0x1d5   :  { %1133 = vmatmul.mubr.bf16.vlgmr.msra.gmra.mrb[16].mxu0 %v10981_v41  ;;  %1174 = vmatmul.mubr.bf16.vlgmr.msra.gmra.mrb[16].mxu1 %v10981_v41 }
 0x1d6   :  { %1212 = vmatpush1.bf16.msra.mxu0 %v10344_v5  ;;  %1253 = vmatpush1.bf16.msra.mxu1 %v10346_v6 }
 0x1d7   :  { %1213 = vmatprep.subr.bf16.mxu0 %v10348_v7  ;;  %1254 = vmatprep.subr.bf16.mxu1 %v10352_v8 }
 0x1d8   :  { %1243 = vmatprep.mubr.bf16.mxu0 %v10981_v41  ;;  %1284 = vmatprep.mubr.bf16.mxu1 %v10981_v41 }
 0x1da   :  { %1214 = vmatpush1.bf16.msra.mxu0 %v10356_v10  ;;  %1255 = vmatpush1.bf16.msra.mxu1 %v10358_v11 }
 0x1db   :  { %1215 = vmatprep.subr.bf16.mxu0 %v10362_v13  ;;  %1256 = vmatprep.subr.bf16.mxu1 %v10364_v14 }
 0x1de   :  { %1216 = vmatpush1.bf16.msra.mxu0 %v10366_v15  ;;  %1257 = vmatpush1.bf16.msra.mxu1 %v10368_v16 }
 0x1df   :  { %1217 = vmatprep.subr.bf16.mxu0 %v10370_v17  ;;  %1258 = vmatprep.subr.bf16.mxu1 %v10372_v18 }
 0x1e2   :  { %1218 = vmatpush1.bf16.msra.mxu0 %v10378_v20  ;;  %1259 = vmatpush1.bf16.msra.mxu1 %v10380_v21 }
 0x1e3   :  { %1219 = vmatprep.subr.bf16.mxu0 %v10382_v22  ;;  %1260 = vmatprep.subr.bf16.mxu1 %v10384_v23 }
 0x1e6   :  { %1220 = vmatpush1.bf16.msra.mxu0 %v10390_v25  ;;  %1261 = vmatpush1.bf16.msra.mxu1 %v10392_v26 }
 0x1e7   :  { %1221 = vmatprep.subr.bf16.mxu0 %v10394_v27  ;;  %1262 = vmatprep.subr.bf16.mxu1 %v10396_v28 }
 0x1ea   :  { %1222 = vmatpush1.bf16.msra.mxu0 %v8253_v30  ;;  %1263 = vmatpush1.bf16.msra.mxu1 %v8254_v31 }
 0x1eb   :  { %1223 = vmatprep.subr.bf16.mxu0 %v8258_v32  ;;  %1264 = vmatprep.subr.bf16.mxu1 %v8260_v33 }
 0x1ee   :  { %1224 = vmatpush1.bf16.msra.mxu0 %v8262_v35  ;;  %1265 = vmatpush1.bf16.msra.mxu1 %v8263_v36 }
 0x1ef   :  { %1225 = vmatprep.subr.bf16.mxu0 %v8264_v37  ;;  %1266 = vmatprep.subr.bf16.mxu1 %v8266_v38 }
 0x1f2   :  { %1226 = vmatpush1.bf16.msra.mxu0 %v8268_v39  ;;  %1267 = vmatpush1.bf16.msra.mxu1 %v8269_v40 }
 0x1f3   :  { %1322 = vmatprep.subr.bf16.mxu0 %v10340_v2  ;;  %1363 = vmatprep.subr.bf16.mxu1 %v10342_v3 }
 0x288   :  { %v10447_v50 = vpop.f32.mrb[0].mxu0  ;;  %v10449_v51 = vpop.f32.mrb[0].mxu1 }
 0x289   :  { %v798_v54 = vpop.f32.mrb[1].mxu0  ;;  %v871_v55 = vpop.f32.mrb[1].mxu1 }
 0x28a   :  { %v800_v57 = vpop.f32.mrb[2].mxu0  ;;  %v873_v58 = vpop.f32.mrb[2].mxu1 }
 0x28b   :  { %v10456_v59 = vadd.f32 %v800_v57, %v385_v53  ;;  %v802_v60 = vpop.f32.mrb[3].mxu0  ;;  %v10459_v61 = vadd.f32 %v873_v58, %v10445_v49  ;;  %v875_v62 = vpop.f32.mrb[3].mxu1 }
 0x28c   :  { %v10461_v63 = vadd.f32 %v802_v60, %v389_v56  ;;  %v10464_v0 = vadd.f32 %v875_v62, %v10452_v52 }
 0x290   :  { %v806_v1 = vpop.f32.mrb[4].mxu0  ;;  %v879_v2 = vpop.f32.mrb[4].mxu1 }
 0x291   :  { %v10466_v3 = vadd.f32 %v806_v1, %v385_v53  ;;  %v808_v4 = vpop.f32.mrb[5].mxu0  ;;  %v10469_v5 = vadd.f32 %v879_v2, %v10445_v49  ;;  %v881_v6 = vpop.f32.mrb[5].mxu1  ;;  %v797_v2 = vadd.f32 %v10447_v50, %v385_v53 }
 0x292   :  { %v10471_v7 = vadd.f32 %v808_v4, %v389_v56  ;;  %v810_v8 = vpop.f32.mrb[6].mxu0  ;;  %v10474_v9 = vadd.f32 %v881_v6, %v10452_v52  ;;  %v883_v10 = vpop.f32.mrb[6].mxu1  ;;  %v870_v4 = vadd.f32 %v10449_v51, %v10445_v49  ;;  %v799_v6 = vadd.f32 %v798_v54, %v389_v56 }
 0x293   :  { %v10476_v11 = vadd.f32 %v810_v8, %v385_v53  ;;  %v812_v12 = vpop.f32.mrb[7].mxu0  ;;  %v10479_v13 = vadd.f32 %v883_v10, %v10445_v49  ;;  %v885_v14 = vpop.f32.mrb[7].mxu1  ;;  %v872_v8 = vadd.f32 %v871_v55, %v10452_v52 }
 0x294   :  { %v10481_v15 = vadd.f32 %v812_v12, %v389_v56  ;;  %v10484_v16 = vadd.f32 %v885_v14, %v10452_v52 }
 0x298   :  { %v816_v17 = vpop.f32.mrb[8].mxu0  ;;  %v889_v18 = vpop.f32.mrb[8].mxu1 }
 0x299   :  { %v10486_v19 = vadd.f32 %v816_v17, %v385_v53  ;;  %v818_v20 = vpop.f32.mrb[9].mxu0  ;;  %v10489_v21 = vadd.f32 %v889_v18, %v10445_v49  ;;  %v891_v22 = vpop.f32.mrb[9].mxu1 }
 0x29a   :  { %v10491_v23 = vadd.f32 %v818_v20, %v389_v56  ;;  %v820_v24 = vpop.f32.mrb[10].mxu0  ;;  %v10494_v25 = vadd.f32 %v891_v22, %v10452_v52  ;;  %v893_v26 = vpop.f32.mrb[10].mxu1 }
 0x29b   :  { %v10496_v27 = vadd.f32 %v820_v24, %v385_v53  ;;  %v822_v28 = vpop.f32.mrb[11].mxu0  ;;  %v10499_v29 = vadd.f32 %v893_v26, %v10445_v49  ;;  %v895_v30 = vpop.f32.mrb[11].mxu1 }
 0x29c   :  { %11006 = vst [vmem:[#allocation49_spill] sm:$0xff] %v10491_v23  ;;  %11007 = vst [vmem:[#allocation50_spill] sm:$0xff] %v10494_v25  ;;  %v10501_v31 = vadd.f32 %v822_v28, %v389_v56  ;;  %v10504_v32 = vadd.f32 %v895_v30, %v10452_v52 }
 0x29d   :  { %11008 = vst [vmem:[#allocation51_spill] sm:$0xff] %v10496_v27  ;;  %11009 = vst [vmem:[#allocation52_spill] sm:$0xff] %v10499_v29 }
 0x29e   :  { %11010 = vst [vmem:[#allocation53_spill] sm:$0xff] %v10501_v31  ;;  %11011 = vst [vmem:[#allocation54_spill] sm:$0xff] %v10504_v32 }
 0x2a0   :  { %v826_v33 = vpop.f32.mrb[12].mxu0  ;;  %v899_v34 = vpop.f32.mrb[12].mxu1 }
 0x2a1   :  { %v10506_v35 = vadd.f32 %v826_v33, %v385_v53  ;;  %v828_v36 = vpop.f32.mrb[13].mxu0  ;;  %v10509_v37 = vadd.f32 %v899_v34, %v10445_v49  ;;  %v901_v38 = vpop.f32.mrb[13].mxu1 }
 0x2a2   :  { %v10511_v39 = vadd.f32 %v828_v36, %v389_v56  ;;  %v830_v40 = vpop.f32.mrb[14].mxu0  ;;  %v10514_v42 = vadd.f32 %v901_v38, %v10452_v52  ;;  %v903_v43 = vpop.f32.mrb[14].mxu1 }
 0x2a3   :  { %11012 = vst [vmem:[#allocation55_spill] sm:$0xff] %v10506_v35  ;;  %11013 = vst [vmem:[#allocation56_spill] sm:$0xff] %v10509_v37  ;;  %v10516_v45 = vadd.f32 %v830_v40, %v385_v53  ;;  %v832_v57 = vpop.f32.mrb[15].mxu0  ;;  %v10519_v58 = vadd.f32 %v903_v43, %v10445_v49  ;;  %v905_v60 = vpop.f32.mrb[15].mxu1 }
 0x2a4   :  { %11014 = vst [vmem:[#allocation57_spill] sm:$0xff] %v10511_v39  ;;  %11015 = vst [vmem:[#allocation58_spill] sm:$0xff] %v10514_v42  ;;  %v10521_v62 = vadd.f32 %v832_v57, %v389_v56  ;;  %v10524_v1 = vadd.f32 %v905_v60, %v10452_v52 }
 0x2a5   :  { %11016 = vst [vmem:[#allocation59_spill] sm:$0xff] %v10516_v45  ;;  %11017 = vst [vmem:[#allocation60_spill] sm:$0xff] %v10519_v58 }
 0x2a6   :  { %11018 = vst [vmem:[#allocation61_spill] sm:$0xff] %v10521_v62  ;;  %11019 = vst [vmem:[#allocation62_spill] sm:$0xff] %v10524_v1 }
 0x2a8   :  { %v1134_v10 = vpop.f32.mrb[16].mxu0  ;;  %v1175_v12 = vpop.f32.mrb[16].mxu1 }
 0x2a9   :  { %v1182_v14 = vadd.f32 %v1134_v10, %v797_v2  ;;  %v1184_v17 = vadd.f32 %v1175_v12, %v870_v4  ;;  %v1136_v18 = vpop.f32.mrb[17].mxu0  ;;  %v1177_v20 = vpop.f32.mrb[17].mxu1  ;;  %v10533_v10 = vld [vmem:[#allocation11] ss:$16 sps:$4 sm:$0xff]   ;;  %v10536_v12 = vld [vmem:[#allocation11 + $0x8] ss:$16 sps:$4 sm:$0xff]  }
 0x2aa   :  { %v1183_v22 = vadd.f32 %v1136_v18, %v799_v6  ;;  %v1185_v24 = vadd.f32 %v1177_v20, %v872_v8  ;;  %v1138_v26 = vpop.f32.mrb[18].mxu0  ;;  %v1179_v28 = vpop.f32.mrb[18].mxu1  ;;  %v10547_v18 = vld [vmem:[#allocation11 + $0x20] ss:$16 sps:$4 sm:$0xff]   ;;  %v10550_v20 = vld [vmem:[#allocation11 + $0x28] ss:$16 sps:$4 sm:$0xff]  }
 0x2ab   :  { %v7341_v30 = vmul.f32 -1.442695, %v1182_v14  ;;  %v1139_v33 = vpop.f32.mrb[19].mxu0  ;;  %v1180_v34 = vpop.f32.mrb[19].mxu1  ;;  %v7343_v49 = vmul.f32 -1.442695, %v1184_v17 }
 0x2ac   :  { %v7342_v50 = vmul.f32 -1.442695, %v1183_v22  ;;  %v10539_v14 = vld [vmem:[#allocation11 + $0x24] ss:$16 sps:$4 sm:$0xff]   ;;  %v10542_v17 = vld [vmem:[#allocation11 + $0x2c] ss:$16 sps:$4 sm:$0xff]  }
 0x2ad   :  { %9281 = vpow2.f32 %v7341_v30  ;;  %v10553_v22 = vld [vmem:[#allocation11 + $0x44] ss:$16 sps:$4 sm:$0xff]   ;;  %v10559_v26 = vld [vmem:[#allocation11 + $0x40] ss:$16 sps:$4 sm:$0xff]   ;;  %v10562_v28 = vld [vmem:[#allocation11 + $0x48] ss:$16 sps:$4 sm:$0xff]  }
 0x2ae   :  { %9283 = vpow2.f32 %v7342_v50  ;;  %v10565_v30 = vld [vmem:[#allocation11 + $0x64] ss:$16 sps:$4 sm:$0xff]   ;;  %v10568_v33 = vld [vmem:[#allocation11 + $0x6c] ss:$16 sps:$4 sm:$0xff]   ;;  %v10571_v34 = vld [vmem:[#allocation11 + $0x60] ss:$16 sps:$4 sm:$0xff]  }
 0x2af   :  { %9285 = vtanh.f32 %v1185_v24  ;;  %v10556_v24 = vld [vmem:[#allocation11 + $0x4c] ss:$16 sps:$4 sm:$0xff]   ;;  %v10574_v50 = vld [vmem:[#allocation11 + $0x68] ss:$16 sps:$4 sm:$0xff]  }
 0x2b0   :  { %9287 = vpow2.f32 %v7343_v49  ;;  %v10577_v49 = vld [vmem:[#allocation11 + $0x84] ss:$16 sps:$4 sm:$0xff]  }
 0x2b7   :  { %v9282_v51 = vpop.eup %9281 }
 0x2b8   :  { %v1195_v53 = vadd.f32 1.0, %v9282_v51  ;;  %v9284_v52 = vpop.eup %9283  ;;  %v10580_v51 = vld [vmem:[#allocation11 + $0x8c] ss:$16 sps:$4 sm:$0xff]  }
 0x2b9   :  { %v1196_v54 = vadd.f32 1.0, %v9284_v52  ;;  %v9286_v55 = vpop.eup %9285  ;;  %v10586_v52 = vld [vmem:[#allocation11 + $0x88] ss:$16 sps:$4 sm:$0xff]  }
 0x2ba   :  { %9289 = vrcp.f32 %v1195_v53  ;;  %v9288_v56 = vpop.eup %9287  ;;  %v10583_v53 = vld [vmem:[#allocation11 + $0x80] ss:$16 sps:$4 sm:$0xff]  }
 0x2bb   :  { %9291 = vrcp.f32 %v1196_v54  ;;  %v1197_v43 = vadd.f32 1.0, %v9288_v56  ;;  %v10589_v54 = vld [vmem:[#allocation11 + $0xa4] ss:$16 sps:$4 sm:$0xff]   ;;  %v10595_v56 = vld [vmem:[#allocation11 + $0xa0] ss:$16 sps:$4 sm:$0xff]  }
 0x2bd   :  { %9293 = vrcp.f32 %v1197_v43  ;;  %v10607_v43 = vld [vmem:[#allocation11 + $0xc0] ss:$16 sps:$4 sm:$0xff]  }
 0x2c4   :  { %v9290_v36 = vpop.eup %9289 }
 0x2c5   :  { %v1206_v38 = vmul.f32 %v9290_v36, %v9286_v55  ;;  %v9292_v40 = vpop.eup %9291  ;;  %v10592_v55 = vld [vmem:[#allocation11 + $0xac] ss:$16 sps:$4 sm:$0xff]   ;;  %v10598_v36 = vld [vmem:[#allocation11 + $0xa8] ss:$16 sps:$4 sm:$0xff]  }
 0x2c6   :  { %v1205_v57 = vmul.f32 0.0, %v9292_v40  ;;  %v10604_v40 = vld [vmem:[#allocation11 + $0xcc] ss:$16 sps:$4 sm:$0xff]  }
 0x2c7   :  { %v9294_v2 = vpop.eup %9293 }
 0x2c8   :  { %v10530_v60 = vadd.f32 %v1206_v38, %v1205_v57  ;;  %v10601_v38 = vld [vmem:[#allocation11 + $0xc4] ss:$16 sps:$4 sm:$0xff]   ;;  %v10610_v57 = vld [vmem:[#allocation11 + $0xc8] ss:$16 sps:$4 sm:$0xff]  }
 0x2ca   :  { %9295 = vtanh.f32 %v10530_v60 }
 0x2d4   :  { %v9296_v4 = vpop.eup %9295 }
 0x2d5   :  { %v1209_v6 = vmul.f32 %v9296_v4, %v9294_v2  ;;  %v10613_v2 = vld [vmem:[#allocation11 + $0xe4] ss:$16 sps:$4 sm:$0xff]   ;;  %v10616_v4 = vld [vmem:[#allocation11 + $0xec] ss:$16 sps:$4 sm:$0xff]  }
 0x2d7   :  { %v1210_v8 = vpack.c.bf16 %v1209_v6, %v1209_v6  ;;  %v10619_v6 = vld [vmem:[#allocation11 + $0xe0] ss:$16 sps:$4 sm:$0xff]  }
 0x2d9   :  { %1244 = vmatmul.mubr.bf16.vlgmr.msra.gmra.mrb[20].mxu0 %v1210_v8  ;;  %1285 = vmatmul.mubr.bf16.vlgmr.msra.gmra.mrb[20].mxu1 %v1210_v8  ;;  %v10622_v8 = vld [vmem:[#allocation11 + $0xe8] ss:$16 sps:$4 sm:$0xff]  }
 0x2da   :  { %1323 = vmatpush1.bf16.msra.mxu0 %v10533_v10  ;;  %1364 = vmatpush1.bf16.msra.mxu1 %v10536_v12 }
 0x2db   :  { %1324 = vmatprep.subr.bf16.mxu0 %v10539_v14  ;;  %1365 = vmatprep.subr.bf16.mxu1 %v10542_v17 }
 0x2dc   :  { %1354 = vmatprep.mubr.bf16.mxu0 %v10981_v41  ;;  %1395 = vmatprep.mubr.bf16.mxu1 %v10981_v41  ;;  %v10625_v41 = vld [vmem:[#allocation11 + $0x4] ss:$16 sps:$4 sm:$0xff]  }
 0x2de   :  { %1325 = vmatpush1.bf16.msra.mxu0 %v10547_v18  ;;  %1366 = vmatpush1.bf16.msra.mxu1 %v10550_v20 }
 0x2df   :  { %1326 = vmatprep.subr.bf16.mxu0 %v10553_v22  ;;  %1367 = vmatprep.subr.bf16.mxu1 %v10556_v24 }
 0x2e2   :  { %1327 = vmatpush1.bf16.msra.mxu0 %v10559_v26  ;;  %1368 = vmatpush1.bf16.msra.mxu1 %v10562_v28 }
 0x2e3   :  { %1328 = vmatprep.subr.bf16.mxu0 %v10565_v30  ;;  %1369 = vmatprep.subr.bf16.mxu1 %v10568_v33 }
 0x2e6   :  { %1329 = vmatpush1.bf16.msra.mxu0 %v10571_v34  ;;  %1370 = vmatpush1.bf16.msra.mxu1 %v10574_v50 }
 0x2e7   :  { %1330 = vmatprep.subr.bf16.mxu0 %v10577_v49  ;;  %1371 = vmatprep.subr.bf16.mxu1 %v10580_v51 }
 0x2ea   :  { %1331 = vmatpush1.bf16.msra.mxu0 %v10583_v53  ;;  %1372 = vmatpush1.bf16.msra.mxu1 %v10586_v52 }
 0x2eb   :  { %1332 = vmatprep.subr.bf16.mxu0 %v10589_v54  ;;  %1373 = vmatprep.subr.bf16.mxu1 %v10592_v55 }
 0x2ee   :  { %1333 = vmatpush1.bf16.msra.mxu0 %v10595_v56  ;;  %1374 = vmatpush1.bf16.msra.mxu1 %v10598_v36 }
 0x2ef   :  { %1334 = vmatprep.subr.bf16.mxu0 %v10601_v38  ;;  %1375 = vmatprep.subr.bf16.mxu1 %v10604_v40 }
 0x2f2   :  { %1335 = vmatpush1.bf16.msra.mxu0 %v10607_v43  ;;  %1376 = vmatpush1.bf16.msra.mxu1 %v10610_v57 }
 0x2f3   :  { %1336 = vmatprep.subr.bf16.mxu0 %v10613_v2  ;;  %1377 = vmatprep.subr.bf16.mxu1 %v10616_v4 }
 0x2f6   :  { %1337 = vmatpush1.bf16.msra.mxu0 %v10619_v6  ;;  %1378 = vmatpush1.bf16.msra.mxu1 %v10622_v8 }
 0x2f7   :  { %1433 = vmatprep.subr.bf16.mxu0 %v10625_v41  ;;  %1474 = vmatprep.subr.bf16.mxu1 %v10628_v46 }
 0x3ac   :  { %v1245_v48 = vpop.f32.mrb[20].mxu0  ;;  %v1286_v44 = vpop.f32.mrb[20].mxu1 }
 0x3ad   :  { %v1293_v47 = vadd.f32 %v1245_v48, %v10456_v59  ;;  %v1295_v1 = vadd.f32 %v1286_v44, %v10459_v61  ;;  %v1247_v62 = vpop.f32.mrb[21].mxu0  ;;  %v1288_v58 = vpop.f32.mrb[21].mxu1 }
 0x3ae   :  { %v1294_v45 = vadd.f32 %v1247_v62, %v10461_v63  ;;  %v1296_v42 = vadd.f32 %v1288_v58, %v10464_v0  ;;  %v1249_v39 = vpop.f32.mrb[22].mxu0  ;;  %v1290_v37 = vpop.f32.mrb[22].mxu1 }
 0x3af   :  { %v7344_v35 = vmul.f32 -1.442695, %v1293_v47  ;;  %v1250_v32 = vpop.f32.mrb[23].mxu0  ;;  %v1291_v31 = vpop.f32.mrb[23].mxu1  ;;  %v7346_v27 = vmul.f32 -1.442695, %v1295_v1 }
 0x3b0   :  { %v7345_v29 = vmul.f32 -1.442695, %v1294_v45 }
 0x3b1   :  { %9297 = vpow2.f32 %v7344_v35 }
 0x3b2   :  { %9299 = vpow2.f32 %v7345_v29 }
 0x3b3   :  { %9301 = vtanh.f32 %v1296_v42 }
 0x3b4   :  { %9303 = vpow2.f32 %v7346_v27 }
 0x3bb   :  { %v9298_v25 = vpop.eup %9297 }
 0x3bc   :  { %v1306_v23 = vadd.f32 1.0, %v9298_v25  ;;  %v9300_v48 = vpop.eup %9299 }
 0x3bd   :  { %v1307_v44 = vadd.f32 1.0, %v9300_v48  ;;  %v9302_v59 = vpop.eup %9301 }
 0x3be   :  { %9305 = vrcp.f32 %v1306_v23  ;;  %v9304_v61 = vpop.eup %9303  ;;  %v11020_v23 = vmov 0  }
 0x3bf   :  { %9307 = vrcp.f32 %v1307_v44  ;;  %v1308_v47 = vadd.f32 1.0, %v9304_v61 }
 0x3c1   :  { %9309 = vrcp.f32 %v1308_v47 }
 0x3c8   :  { %v9306_v63 = vpop.eup %9305 }
 0x3c9   :  { %v1317_v0 = vmul.f32 %v9306_v63, %v9302_v59  ;;  %v9308_v37 = vpop.eup %9307 }
 0x3ca   :  { %v1316_v31 = vmul.f32 %v9308_v37, %v10530_v60 }
 0x3cb   :  { %v9310_v25 = vpop.eup %9309 }
 0x3cc   :  { %v10636_v32 = vadd.f32 %v1317_v0, %v1316_v31 }
 0x3ce   :  { %9311 = vtanh.f32 %v10636_v32 }
 0x3d8   :  { %v9312_v29 = vpop.eup %9311 }
 0x3d9   :  { %v1320_v35 = vmul.f32 %v9312_v29, %v9310_v25 }
 0x3db   :  { %v1321_v27 = vpack.c.bf16 %v1320_v35, %v1320_v35 }
 0x3dd   :  { %1355 = vmatmul.mubr.bf16.vlgmr.msra.gmra.mrb[24].mxu0 %v1321_v27  ;;  %1396 = vmatmul.mubr.bf16.vlgmr.msra.gmra.mrb[24].mxu1 %v1321_v27 }
 0x3de   :  { %1434 = vmatpush1.bf16.msra.mxu0 %v10533_v10  ;;  %1475 = vmatpush1.bf16.msra.mxu1 %v10536_v12 }
 0x3df   :  { %1435 = vmatprep.subr.bf16.mxu0 %v10539_v14  ;;  %1476 = vmatprep.subr.bf16.mxu1 %v10542_v17 }
 0x3e0   :  { %1465 = vmatprep.mubr.bf16.mxu0 %v11020_v23  ;;  %1506 = vmatprep.mubr.bf16.mxu1 %v11020_v23 }
 0x3e2   :  { %1436 = vmatpush1.bf16.msra.mxu0 %v10547_v18  ;;  %1477 = vmatpush1.bf16.msra.mxu1 %v10550_v20 }
 0x3e3   :  { %1437 = vmatprep.subr.bf16.mxu0 %v10553_v22  ;;  %1478 = vmatprep.subr.bf16.mxu1 %v10556_v24 }
 0x3e6   :  { %1438 = vmatpush1.bf16.msra.mxu0 %v10559_v26  ;;  %1479 = vmatpush1.bf16.msra.mxu1 %v10562_v28 }
 0x3e7   :  { %1439 = vmatprep.subr.bf16.mxu0 %v10565_v30  ;;  %1480 = vmatprep.subr.bf16.mxu1 %v10568_v33 }
 0x3ea   :  { %1440 = vmatpush1.bf16.msra.mxu0 %v10571_v34  ;;  %1481 = vmatpush1.bf16.msra.mxu1 %v10574_v50 }
 0x3eb   :  { %1441 = vmatprep.subr.bf16.mxu0 %v10577_v49  ;;  %1482 = vmatprep.subr.bf16.mxu1 %v10580_v51 }
 0x3ee   :  { %1442 = vmatpush1.bf16.msra.mxu0 %v10583_v53  ;;  %1483 = vmatpush1.bf16.msra.mxu1 %v10586_v52 }
 0x3ef   :  { %1443 = vmatprep.subr.bf16.mxu0 %v10589_v54  ;;  %1484 = vmatprep.subr.bf16.mxu1 %v10592_v55 }
 0x3f2   :  { %1444 = vmatpush1.bf16.msra.mxu0 %v10595_v56  ;;  %1485 = vmatpush1.bf16.msra.mxu1 %v10598_v36 }
 0x3f3   :  { %1445 = vmatprep.subr.bf16.mxu0 %v10601_v38  ;;  %1486 = vmatprep.subr.bf16.mxu1 %v10604_v40 }
 0x3f6   :  { %1446 = vmatpush1.bf16.msra.mxu0 %v10607_v43  ;;  %1487 = vmatpush1.bf16.msra.mxu1 %v10610_v57 }
 0x3f7   :  { %1447 = vmatprep.subr.bf16.mxu0 %v10613_v2  ;;  %1488 = vmatprep.subr.bf16.mxu1 %v10616_v4 }
 0x3fa   :  { %1448 = vmatpush1.bf16.msra.mxu0 %v10619_v6  ;;  %1489 = vmatpush1.bf16.msra.mxu1 %v10622_v8 }
 0x3fb   :  { %1544 = vmatprep.subr.bf16.mxu0 %v10625_v41  ;;  %1585 = vmatprep.subr.bf16.mxu1 %v10628_v46 }
 0x4b0   :  { %v1356_v39 = vpop.f32.mrb[24].mxu0  ;;  %v1397_v42 = vpop.f32.mrb[24].mxu1 }
 0x4b1   :  { %v1404_v45 = vadd.f32 %v1356_v39, %v10466_v3  ;;  %v1406_v58 = vadd.f32 %v1397_v42, %v10469_v5  ;;  %v1358_v62 = vpop.f32.mrb[25].mxu0  ;;  %v1399_v1 = vpop.f32.mrb[25].mxu1 }
 0x4b2   :  { %v1405_v60 = vadd.f32 %v1358_v62, %v10471_v7  ;;  %v1407_v48 = vadd.f32 %v1399_v1, %v10474_v9  ;;  %v1360_v44 = vpop.f32.mrb[26].mxu0  ;;  %v1401_v59 = vpop.f32.mrb[26].mxu1 }
 0x4b3   :  { %v7347_v61 = vmul.f32 -1.442695, %v1404_v45  ;;  %v1361_v63 = vpop.f32.mrb[27].mxu0  ;;  %v1402_v0 = vpop.f32.mrb[27].mxu1  ;;  %v7349_v47 = vmul.f32 -1.442695, %v1406_v58 }
 0x4b4   :  { %v7348_v37 = vmul.f32 -1.442695, %v1405_v60 }
 0x4b5   :  { %9313 = vpow2.f32 %v7347_v61 }
 0x4b6   :  { %9315 = vpow2.f32 %v7348_v37 }
 0x4b7   :  { %9317 = vtanh.f32 %v1407_v48 }
 0x4b8   :  { %9319 = vpow2.f32 %v7349_v47 }
 0x4bf   :  { %v9314_v31 = vpop.eup %9313 }
 0x4c0   :  { %v1417_v25 = vadd.f32 1.0, %v9314_v31  ;;  %v9316_v3 = vpop.eup %9315 }
 0x4c1   :  { %v1418_v5 = vadd.f32 1.0, %v9316_v3  ;;  %v9318_v7 = vpop.eup %9317 }
 0x4c2   :  { %9321 = vrcp.f32 %v1417_v25  ;;  %v9320_v29 = vpop.eup %9319 }
 0x4c3   :  { %9323 = vrcp.f32 %v1418_v5  ;;  %v1419_v39 = vadd.f32 1.0, %v9320_v29 }
 0x4c5   :  { %9325 = vrcp.f32 %v1419_v39 }
 0x4cc   :  { %v9322_v9 = vpop.eup %9321 }
 0x4cd   :  { %v1428_v35 = vmul.f32 %v9322_v9, %v9318_v7  ;;  %v9324_v27 = vpop.eup %9323 }
 0x4ce   :  { %v1427_v42 = vmul.f32 %v9324_v27, %v10636_v32 }
 0x4cf   :  { %v9326_v58 = vpop.eup %9325 }
 0x4d0   :  { %v10678_v45 = vadd.f32 %v1428_v35, %v1427_v42 }
 0x4d2   :  { %9327 = vtanh.f32 %v10678_v45 }
 0x4dc   :  { %v9328_v62 = vpop.eup %9327 }
 0x4dd   :  { %v1431_v1 = vmul.f32 %v9328_v62, %v9326_v58 }
 0x4df   :  { %v1432_v60 = vpack.c.bf16 %v1431_v1, %v1431_v1 }
 0x4e1   :  { %1466 = vmatmul.mubr.bf16.vlgmr.msra.gmra.mrb[28].mxu0 %v1432_v60  ;;  %1507 = vmatmul.mubr.bf16.vlgmr.msra.gmra.mrb[28].mxu1 %v1432_v60 }
 0x4e2   :  { %1545 = vmatpush1.bf16.msra.mxu0 %v10533_v10  ;;  %1586 = vmatpush1.bf16.msra.mxu1 %v10536_v12 }
 0x4e3   :  { %1546 = vmatprep.subr.bf16.mxu0 %v10539_v14  ;;  %1587 = vmatprep.subr.bf16.mxu1 %v10542_v17 }
 0x4e4   :  { %1576 = vmatprep.mubr.bf16.mxu0 %v11020_v23  ;;  %1617 = vmatprep.mubr.bf16.mxu1 %v11020_v23 }
 0x4e6   :  { %1547 = vmatpush1.bf16.msra.mxu0 %v10547_v18  ;;  %1588 = vmatpush1.bf16.msra.mxu1 %v10550_v20 }
 0x4e7   :  { %1548 = vmatprep.subr.bf16.mxu0 %v10553_v22  ;;  %1589 = vmatprep.subr.bf16.mxu1 %v10556_v24 }
 0x4ea   :  { %1549 = vmatpush1.bf16.msra.mxu0 %v10559_v26  ;;  %1590 = vmatpush1.bf16.msra.mxu1 %v10562_v28 }
 0x4eb   :  { %1550 = vmatprep.subr.bf16.mxu0 %v10565_v30  ;;  %1591 = vmatprep.subr.bf16.mxu1 %v10568_v33 }
 0x4ee   :  { %1551 = vmatpush1.bf16.msra.mxu0 %v10571_v34  ;;  %1592 = vmatpush1.bf16.msra.mxu1 %v10574_v50 }
 0x4ef   :  { %1552 = vmatprep.subr.bf16.mxu0 %v10577_v49  ;;  %1593 = vmatprep.subr.bf16.mxu1 %v10580_v51 }
 0x4f2   :  { %1553 = vmatpush1.bf16.msra.mxu0 %v10583_v53  ;;  %1594 = vmatpush1.bf16.msra.mxu1 %v10586_v52 }
 0x4f3   :  { %1554 = vmatprep.subr.bf16.mxu0 %v10589_v54  ;;  %1595 = vmatprep.subr.bf16.mxu1 %v10592_v55 }
 0x4f6   :  { %1555 = vmatpush1.bf16.msra.mxu0 %v10595_v56  ;;  %1596 = vmatpush1.bf16.msra.mxu1 %v10598_v36 }
 0x4f7   :  { %1556 = vmatprep.subr.bf16.mxu0 %v10601_v38  ;;  %1597 = vmatprep.subr.bf16.mxu1 %v10604_v40 }
 0x4fa   :  { %1557 = vmatpush1.bf16.msra.mxu0 %v10607_v43  ;;  %1598 = vmatpush1.bf16.msra.mxu1 %v10610_v57 }
 0x4fb   :  { %1558 = vmatprep.subr.bf16.mxu0 %v10613_v2  ;;  %1599 = vmatprep.subr.bf16.mxu1 %v10616_v4 }
 0x4fe   :  { %1559 = vmatpush1.bf16.msra.mxu0 %v10619_v6  ;;  %1600 = vmatpush1.bf16.msra.mxu1 %v10622_v8 }
 0x4ff   :  { %1655 = vmatprep.subr.bf16.mxu0 %v10625_v41  ;;  %1696 = vmatprep.subr.bf16.mxu1 %v10628_v46 }
 0x5b4   :  { %v1467_v32 = vpop.f32.mrb[28].mxu0  ;;  %v1508_v48 = vpop.f32.mrb[28].mxu1 }
 0x5b5   :  { %v1515_v44 = vadd.f32 %v1467_v32, %v10476_v11  ;;  %v1517_v59 = vadd.f32 %v1508_v48, %v10479_v13  ;;  %v1469_v61 = vpop.f32.mrb[29].mxu0  ;;  %v1510_v63 = vpop.f32.mrb[29].mxu1 }
 0x5b6   :  { %v1516_v0 = vadd.f32 %v1469_v61, %v10481_v15  ;;  %v1518_v37 = vadd.f32 %v1510_v63, %v10484_v16  ;;  %v1471_v47 = vpop.f32.mrb[30].mxu0  ;;  %v1512_v31 = vpop.f32.mrb[30].mxu1 }
 0x5b7   :  { %v7350_v25 = vmul.f32 -1.442695, %v1515_v44  ;;  %v1472_v3 = vpop.f32.mrb[31].mxu0  ;;  %v1513_v5 = vpop.f32.mrb[31].mxu1  ;;  %v7352_v29 = vmul.f32 -1.442695, %v1517_v59 }
 0x5b8   :  { %v7351_v7 = vmul.f32 -1.442695, %v1516_v0  ;;  %v11021_v47 = vld [vmem:[#allocation49_spill] sm:$0xff] }
 0x5b9   :  { %9329 = vpow2.f32 %v7350_v25  ;;  %v11022_v25 = vld [vmem:[#allocation50_spill] sm:$0xff] }
 0x5ba   :  { %9331 = vpow2.f32 %v7351_v7 }
 0x5bb   :  { %9333 = vtanh.f32 %v1518_v37 }
 0x5bc   :  { %9335 = vpow2.f32 %v7352_v29 }
 0x5c3   :  { %v9330_v9 = vpop.eup %9329 }
 0x5c4   :  { %v1528_v35 = vadd.f32 1.0, %v9330_v9  ;;  %v9332_v11 = vpop.eup %9331 }
 0x5c5   :  { %v1529_v13 = vadd.f32 1.0, %v9332_v11  ;;  %v9334_v15 = vpop.eup %9333 }
 0x5c6   :  { %9337 = vrcp.f32 %v1528_v35  ;;  %v9336_v27 = vpop.eup %9335 }
 0x5c7   :  { %9339 = vrcp.f32 %v1529_v13  ;;  %v1530_v58 = vadd.f32 1.0, %v9336_v27 }
 0x5c9   :  { %9341 = vrcp.f32 %v1530_v58 }
 0x5d0   :  { %v9338_v16 = vpop.eup %9337 }
 0x5d1   :  { %v1539_v39 = vmul.f32 %v9338_v16, %v9334_v15  ;;  %v9340_v42 = vpop.eup %9339 }
 0x5d2   :  { %v1538_v62 = vmul.f32 %v9340_v42, %v10678_v45 }
 0x5d3   :  { %v9342_v60 = vpop.eup %9341 }
 0x5d4   :  { %v10720_v1 = vadd.f32 %v1539_v39, %v1538_v62 }
 0x5d6   :  { %9343 = vtanh.f32 %v10720_v1 }
 0x5e0   :  { %v9344_v32 = vpop.eup %9343 }
 0x5e1   :  { %v1542_v48 = vmul.f32 %v9344_v32, %v9342_v60 }
 0x5e3   :  { %v1543_v44 = vpack.c.bf16 %v1542_v48, %v1542_v48 }
 0x5e5   :  { %1577 = vmatmul.mubr.bf16.vlgmr.msra.gmra.mrb[32].mxu0 %v1543_v44  ;;  %1618 = vmatmul.mubr.bf16.vlgmr.msra.gmra.mrb[32].mxu1 %v1543_v44 }
 0x5e6   :  { %1656 = vmatpush1.bf16.msra.mxu0 %v10533_v10  ;;  %1697 = vmatpush1.bf16.msra.mxu1 %v10536_v12 }
 0x5e7   :  { %1657 = vmatprep.subr.bf16.mxu0 %v10539_v14  ;;  %1698 = vmatprep.subr.bf16.mxu1 %v10542_v17 }
 0x5e8   :  { %1687 = vmatprep.mubr.bf16.mxu0 %v11020_v23  ;;  %1728 = vmatprep.mubr.bf16.mxu1 %v11020_v23 }
 0x5ea   :  { %1658 = vmatpush1.bf16.msra.mxu0 %v10547_v18  ;;  %1699 = vmatpush1.bf16.msra.mxu1 %v10550_v20 }
 0x5eb   :  { %1659 = vmatprep.subr.bf16.mxu0 %v10553_v22  ;;  %1700 = vmatprep.subr.bf16.mxu1 %v10556_v24 }
 0x5ee   :  { %1660 = vmatpush1.bf16.msra.mxu0 %v10559_v26  ;;  %1701 = vmatpush1.bf16.msra.mxu1 %v10562_v28 }
 0x5ef   :  { %1661 = vmatprep.subr.bf16.mxu0 %v10565_v30  ;;  %1702 = vmatprep.subr.bf16.mxu1 %v10568_v33 }
 0x5f2   :  { %1662 = vmatpush1.bf16.msra.mxu0 %v10571_v34  ;;  %1703 = vmatpush1.bf16.msra.mxu1 %v10574_v50 }
 0x5f3   :  { %1663 = vmatprep.subr.bf16.mxu0 %v10577_v49  ;;  %1704 = vmatprep.subr.bf16.mxu1 %v10580_v51 }
 0x5f6   :  { %1664 = vmatpush1.bf16.msra.mxu0 %v10583_v53  ;;  %1705 = vmatpush1.bf16.msra.mxu1 %v10586_v52 }
 0x5f7   :  { %1665 = vmatprep.subr.bf16.mxu0 %v10589_v54  ;;  %1706 = vmatprep.subr.bf16.mxu1 %v10592_v55 }
 0x5fa   :  { %1666 = vmatpush1.bf16.msra.mxu0 %v10595_v56  ;;  %1707 = vmatpush1.bf16.msra.mxu1 %v10598_v36 }
 0x5fb   :  { %1667 = vmatprep.subr.bf16.mxu0 %v10601_v38  ;;  %1708 = vmatprep.subr.bf16.mxu1 %v10604_v40 }
 0x5fe   :  { %1668 = vmatpush1.bf16.msra.mxu0 %v10607_v43  ;;  %1709 = vmatpush1.bf16.msra.mxu1 %v10610_v57 }
 0x5ff   :  { %1669 = vmatprep.subr.bf16.mxu0 %v10613_v2  ;;  %1710 = vmatprep.subr.bf16.mxu1 %v10616_v4 }
 0x602   :  { %1670 = vmatpush1.bf16.msra.mxu0 %v10619_v6  ;;  %1711 = vmatpush1.bf16.msra.mxu1 %v10622_v8 }
 0x603   :  { %1766 = vmatprep.subr.bf16.mxu0 %v10625_v41  ;;  %1807 = vmatprep.subr.bf16.mxu1 %v10628_v46 }
 0x6b8   :  { %v1578_v45 = vpop.f32.mrb[32].mxu0  ;;  %v1619_v59 = vpop.f32.mrb[32].mxu1 }
 0x6b9   :  { %v1626_v61 = vadd.f32 %v1578_v45, %v10486_v19  ;;  %v1628_v63 = vadd.f32 %v1619_v59, %v10489_v21  ;;  %v1580_v0 = vpop.f32.mrb[33].mxu0  ;;  %v1621_v37 = vpop.f32.mrb[33].mxu1 }
 0x6ba   :  { %v1627_v31 = vadd.f32 %v1580_v0, %v11021_v47  ;;  %v1629_v3 = vadd.f32 %v1621_v37, %v11022_v25  ;;  %v1582_v5 = vpop.f32.mrb[34].mxu0  ;;  %v1623_v7 = vpop.f32.mrb[34].mxu1  ;;  %v11023_v0 = vld [vmem:[#allocation51_spill] sm:$0xff]  ;;  %v11024_v47 = vld [vmem:[#allocation52_spill] sm:$0xff] }
 0x6bb   :  { %v7353_v29 = vmul.f32 -1.442695, %v1626_v61  ;;  %v1583_v9 = vpop.f32.mrb[35].mxu0  ;;  %v1624_v35 = vpop.f32.mrb[35].mxu1  ;;  %v7355_v13 = vmul.f32 -1.442695, %v1628_v63 }
 0x6bc   :  { %v7354_v11 = vmul.f32 -1.442695, %v1627_v31  ;;  %v11025_v5 = vld [vmem:[#allocation53_spill] sm:$0xff] }
 0x6bd   :  { %9345 = vpow2.f32 %v7353_v29  ;;  %v11026_v29 = vld [vmem:[#allocation54_spill] sm:$0xff] }
 0x6be   :  { %9347 = vpow2.f32 %v7354_v11 }
 0x6bf   :  { %9349 = vtanh.f32 %v1629_v3 }
 0x6c0   :  { %9351 = vpow2.f32 %v7355_v13 }
 0x6c7   :  { %v9346_v15 = vpop.eup %9345 }
 0x6c8   :  { %v1639_v27 = vadd.f32 1.0, %v9346_v15  ;;  %v9348_v19 = vpop.eup %9347 }
 0x6c9   :  { %v1640_v21 = vadd.f32 1.0, %v9348_v19  ;;  %v9350_v16 = vpop.eup %9349 }
 0x6ca   :  { %9353 = vrcp.f32 %v1639_v27  ;;  %v9352_v39 = vpop.eup %9351 }
 0x6cb   :  { %9355 = vrcp.f32 %v1640_v21  ;;  %v1641_v60 = vadd.f32 1.0, %v9352_v39 }
 0x6cd   :  { %9357 = vrcp.f32 %v1641_v60 }
 0x6d4   :  { %v9354_v42 = vpop.eup %9353 }
 0x6d5   :  { %v1650_v58 = vmul.f32 %v9354_v42, %v9350_v16  ;;  %v9356_v62 = vpop.eup %9355 }
 0x6d6   :  { %v1649_v32 = vmul.f32 %v9356_v62, %v10720_v1 }
 0x6d7   :  { %v9358_v44 = vpop.eup %9357 }
 0x6d8   :  { %v10762_v48 = vadd.f32 %v1650_v58, %v1649_v32 }
 0x6da   :  { %9359 = vtanh.f32 %v10762_v48 }
 0x6e4   :  { %v9360_v45 = vpop.eup %9359 }
 0x6e5   :  { %v1653_v59 = vmul.f32 %v9360_v45, %v9358_v44 }
 0x6e7   :  { %v1654_v61 = vpack.c.bf16 %v1653_v59, %v1653_v59 }
 0x6e9   :  { %1688 = vmatmul.mubr.bf16.vlgmr.msra.gmra.mrb[36].mxu0 %v1654_v61  ;;  %1729 = vmatmul.mubr.bf16.vlgmr.msra.gmra.mrb[36].mxu1 %v1654_v61 }
 0x6ea   :  { %1767 = vmatpush1.bf16.msra.mxu0 %v10533_v10  ;;  %1808 = vmatpush1.bf16.msra.mxu1 %v10536_v12 }
 0x6eb   :  { %1768 = vmatprep.subr.bf16.mxu0 %v10539_v14  ;;  %1809 = vmatprep.subr.bf16.mxu1 %v10542_v17 }
 0x6ec   :  { %1798 = vmatprep.mubr.bf16.mxu0 %v11020_v23  ;;  %1839 = vmatprep.mubr.bf16.mxu1 %v11020_v23 }
 0x6ee   :  { %1769 = vmatpush1.bf16.msra.mxu0 %v10547_v18  ;;  %1810 = vmatpush1.bf16.msra.mxu1 %v10550_v20 }
 0x6ef   :  { %1770 = vmatprep.subr.bf16.mxu0 %v10553_v22  ;;  %1811 = vmatprep.subr.bf16.mxu1 %v10556_v24 }
 0x6f2   :  { %1771 = vmatpush1.bf16.msra.mxu0 %v10559_v26  ;;  %1812 = vmatpush1.bf16.msra.mxu1 %v10562_v28 }
 0x6f3   :  { %1772 = vmatprep.subr.bf16.mxu0 %v10565_v30  ;;  %1813 = vmatprep.subr.bf16.mxu1 %v10568_v33 }
 0x6f6   :  { %1773 = vmatpush1.bf16.msra.mxu0 %v10571_v34  ;;  %1814 = vmatpush1.bf16.msra.mxu1 %v10574_v50 }
 0x6f7   :  { %1774 = vmatprep.subr.bf16.mxu0 %v10577_v49  ;;  %1815 = vmatprep.subr.bf16.mxu1 %v10580_v51 }
 0x6fa   :  { %1775 = vmatpush1.bf16.msra.mxu0 %v10583_v53  ;;  %1816 = vmatpush1.bf16.msra.mxu1 %v10586_v52 }
 0x6fb   :  { %1776 = vmatprep.subr.bf16.mxu0 %v10589_v54  ;;  %1817 = vmatprep.subr.bf16.mxu1 %v10592_v55 }
 0x6fe   :  { %1777 = vmatpush1.bf16.msra.mxu0 %v10595_v56  ;;  %1818 = vmatpush1.bf16.msra.mxu1 %v10598_v36 }
 0x6ff   :  { %1778 = vmatprep.subr.bf16.mxu0 %v10601_v38  ;;  %1819 = vmatprep.subr.bf16.mxu1 %v10604_v40 }
 0x702   :  { %1779 = vmatpush1.bf16.msra.mxu0 %v10607_v43  ;;  %1820 = vmatpush1.bf16.msra.mxu1 %v10610_v57 }
 0x703   :  { %1780 = vmatprep.subr.bf16.mxu0 %v10613_v2  ;;  %1821 = vmatprep.subr.bf16.mxu1 %v10616_v4 }
 0x706   :  { %1781 = vmatpush1.bf16.msra.mxu0 %v10619_v6  ;;  %1822 = vmatpush1.bf16.msra.mxu1 %v10622_v8 }
 0x707   :  { %1877 = vmatprep.subr.bf16.mxu0 %v10625_v41  ;;  %1918 = vmatprep.subr.bf16.mxu1 %v10628_v46 }
 0x7bc   :  { %v1689_v1 = vpop.f32.mrb[36].mxu0  ;;  %v1730_v63 = vpop.f32.mrb[36].mxu1 }
 0x7bd   :  { %v1737_v37 = vadd.f32 %v1689_v1, %v11023_v0  ;;  %v1739_v31 = vadd.f32 %v1730_v63, %v11024_v47  ;;  %v1691_v25 = vpop.f32.mrb[37].mxu0  ;;  %v1732_v3 = vpop.f32.mrb[37].mxu1 }
 0x7be   :  { %v1738_v7 = vadd.f32 %v1691_v25, %v11025_v5  ;;  %v1740_v9 = vadd.f32 %v1732_v3, %v11026_v29  ;;  %v1693_v35 = vpop.f32.mrb[38].mxu0  ;;  %v1734_v11 = vpop.f32.mrb[38].mxu1  ;;  %v10847_v5 = vld [vmem:[#allocation6] sm:$0xff] }
 0x7bf   :  { %v7356_v13 = vmul.f32 -1.442695, %v1737_v37  ;;  %v1694_v15 = vpop.f32.mrb[39].mxu0  ;;  %v1735_v27 = vpop.f32.mrb[39].mxu1  ;;  %v7358_v46 = vmul.f32 -1.442695, %v1739_v31 }
 0x7c0   :  { %v7357_v41 = vmul.f32 -1.442695, %v1738_v7  ;;  %v8270_v7 = vld [vmem:[#allocation15] ss:$16 sps:$4 sm:$0xff]   ;;  %v8278_v35 = vld [vmem:[#allocation15 + $0x24] ss:$16 sps:$4 sm:$0xff]  }
 0x7c1   :  { %9361 = vpow2.f32 %v7356_v13  ;;  %v8273_v29 = vld [vmem:[#allocation15 + $0x200] ss:$16 sps:$4 sm:$0xff]   ;;  %v8281_v11 = vld [vmem:[#allocation15 + $0x224] ss:$16 sps:$4 sm:$0xff]   ;;  %v10851_v13 = vcombine.high %v10847_v5, %v10847_v5 }
 0x7c2   :  { %9363 = vpow2.f32 %v7357_v41  ;;  %v8276_v15 = vld [vmem:[#allocation15 + $0x20] ss:$16 sps:$4 sm:$0xff]   ;;  %v8284_v41 = vld [vmem:[#allocation15 + $0x44] ss:$16 sps:$4 sm:$0xff]  }
 0x7c3   :  { %9365 = vtanh.f32 %v1740_v9  ;;  %v8279_v27 = vld [vmem:[#allocation15 + $0x220] ss:$16 sps:$4 sm:$0xff]  }
 0x7c4   :  { %9367 = vpow2.f32 %v7358_v46  ;;  %v8287_v46 = vld [vmem:[#allocation15 + $0x244] ss:$16 sps:$4 sm:$0xff]  }
 0x7cb   :  { %v9362_v19 = vpop.eup %9361 }
 0x7cc   :  { %v1750_v21 = vadd.f32 1.0, %v9362_v19  ;;  %v9364_v16 = vpop.eup %9363  ;;  %v8282_v19 = vld [vmem:[#allocation15 + $0x40] ss:$16 sps:$4 sm:$0xff]  }
 0x7cd   :  { %v1751_v39 = vadd.f32 1.0, %v9364_v16  ;;  %v9366_v42 = vpop.eup %9365  ;;  %v8290_v16 = vld [vmem:[#allocation15 + $0x64] ss:$16 sps:$4 sm:$0xff]  }
 0x7ce   :  { %9369 = vrcp.f32 %v1750_v21  ;;  %v9368_v58 = vpop.eup %9367  ;;  %v8285_v21 = vld [vmem:[#allocation15 + $0x240] ss:$16 sps:$4 sm:$0xff]  }
 0x7cf   :  { %9371 = vrcp.f32 %v1751_v39  ;;  %v1752_v44 = vadd.f32 1.0, %v9368_v58  ;;  %v8293_v39 = vld [vmem:[#allocation15 + $0x264] ss:$16 sps:$4 sm:$0xff]   ;;  %v8291_v58 = vld [vmem:[#allocation15 + $0x260] ss:$16 sps:$4 sm:$0xff]  }
 0x7d1   :  { %9373 = vrcp.f32 %v1752_v44  ;;  %v8297_v44 = vld [vmem:[#allocation15 + $0x280] ss:$16 sps:$4 sm:$0xff]  }
 0x7d8   :  { %v9370_v62 = vpop.eup %9369 }
 0x7d9   :  { %v1761_v60 = vmul.f32 %v9370_v62, %v9366_v42  ;;  %v9372_v32 = vpop.eup %9371  ;;  %v8288_v42 = vld [vmem:[#allocation15 + $0x60] ss:$16 sps:$4 sm:$0xff]   ;;  %v8296_v62 = vld [vmem:[#allocation15 + $0x84] ss:$16 sps:$4 sm:$0xff]  }
 0x7da   :  { %v1760_v45 = vmul.f32 %v9372_v32, %v10762_v48  ;;  %v8294_v32 = vld [vmem:[#allocation15 + $0x80] ss:$16 sps:$4 sm:$0xff]  }
 0x7db   :  { %v9374_v61 = vpop.eup %9373 }
 0x7dc   :  { %v10804_v59 = vadd.f32 %v1761_v60, %v1760_v45  ;;  %v8299_v60 = vld [vmem:[#allocation15 + $0x284] ss:$16 sps:$4 sm:$0xff]  }
 0x7dd   :  { %v8302_v45 = vld [vmem:[#allocation15 + $0xa4] ss:$16 sps:$4 sm:$0xff]  }
 0x7de   :  { %9375 = vtanh.f32 %v10804_v59 }
 0x7e8   :  { %v9376_v1 = vpop.eup %9375 }
 0x7e9   :  { %v1764_v63 = vmul.f32 %v9376_v1, %v9374_v61  ;;  %v8300_v61 = vld [vmem:[#allocation15 + $0xa0] ss:$16 sps:$4 sm:$0xff]  }
 0x7ea   :  { %v8303_v1 = vld [vmem:[#allocation15 + $0x2a0] ss:$16 sps:$4 sm:$0xff]  }
 0x7eb   :  { %v1765_v0 = vpack.c.bf16 %v1764_v63, %v1764_v63  ;;  %v8308_v63 = vld [vmem:[#allocation15 + $0xc4] ss:$16 sps:$4 sm:$0xff]  }
 0x7ed   :  { %1799 = vmatmul.mubr.bf16.vlgmr.msra.gmra.mrb[40].mxu0 %v1765_v0  ;;  %1840 = vmatmul.mubr.bf16.vlgmr.msra.gmra.mrb[40].mxu1 %v1765_v0  ;;  %v8311_v0 = vld [vmem:[#allocation15 + $0x2c4] ss:$16 sps:$4 sm:$0xff]  }
 0x7ee   :  { %1878 = vmatpush1.bf16.msra.mxu0 %v10533_v10  ;;  %1919 = vmatpush1.bf16.msra.mxu1 %v10536_v12  ;;  %v8272_v10 = vld [vmem:[#allocation15 + $0x4] ss:$16 sps:$4 sm:$0xff]  }
 0x7ef   :  { %1879 = vmatprep.subr.bf16.mxu0 %v10539_v14  ;;  %1920 = vmatprep.subr.bf16.mxu1 %v10542_v17  ;;  %v8275_v12 = vld [vmem:[#allocation15 + $0x204] ss:$16 sps:$4 sm:$0xff]  }
 0x7f0   :  { %1909 = vmatprep.mubr.bf16.mxu0 %v11020_v23  ;;  %1950 = vmatprep.mubr.bf16.mxu1 %v11020_v23 }
 0x7f2   :  { %1880 = vmatpush1.bf16.msra.mxu0 %v10547_v18  ;;  %1921 = vmatpush1.bf16.msra.mxu1 %v10550_v20  ;;  %v11027_v18 = vld [vmem:[#allocation55_spill] sm:$0xff] }
 0x7f3   :  { %1881 = vmatprep.subr.bf16.mxu0 %v10553_v22  ;;  %1922 = vmatprep.subr.bf16.mxu1 %v10556_v24  ;;  %v11028_v22 = vld [vmem:[#allocation56_spill] sm:$0xff] }
 0x7f6   :  { %1882 = vmatpush1.bf16.msra.mxu0 %v10559_v26  ;;  %1923 = vmatpush1.bf16.msra.mxu1 %v10562_v28 }
 0x7f7   :  { %1883 = vmatprep.subr.bf16.mxu0 %v10565_v30  ;;  %1924 = vmatprep.subr.bf16.mxu1 %v10568_v33  ;;  %v11029_v30 = vld [vmem:[#allocation57_spill] sm:$0xff] }
 0x7fa   :  { %1884 = vmatpush1.bf16.msra.mxu0 %v10571_v34  ;;  %1925 = vmatpush1.bf16.msra.mxu1 %v10574_v50  ;;  %v11030_v34 = vld [vmem:[#allocation58_spill] sm:$0xff] }
 0x7fb   :  { %1885 = vmatprep.subr.bf16.mxu0 %v10577_v49  ;;  %1926 = vmatprep.subr.bf16.mxu1 %v10580_v51 }
 0x7fe   :  { %1886 = vmatpush1.bf16.msra.mxu0 %v10583_v53  ;;  %1927 = vmatpush1.bf16.msra.mxu1 %v10586_v52 }
 0x7ff   :  { %1887 = vmatprep.subr.bf16.mxu0 %v10589_v54  ;;  %1928 = vmatprep.subr.bf16.mxu1 %v10592_v55 }
 0x802   :  { %1888 = vmatpush1.bf16.msra.mxu0 %v10595_v56  ;;  %1929 = vmatpush1.bf16.msra.mxu1 %v10598_v36 }
 0x803   :  { %1889 = vmatprep.subr.bf16.mxu0 %v10601_v38  ;;  %1930 = vmatprep.subr.bf16.mxu1 %v10604_v40 }
 0x806   :  { %1890 = vmatpush1.bf16.msra.mxu0 %v10607_v43  ;;  %1931 = vmatpush1.bf16.msra.mxu1 %v10610_v57 }
 0x807   :  { %1891 = vmatprep.subr.bf16.mxu0 %v10613_v2  ;;  %1932 = vmatprep.subr.bf16.mxu1 %v10616_v4 }
 0x80a   :  { %1892 = vmatpush1.bf16.msra.mxu0 %v10619_v6  ;;  %1933 = vmatpush1.bf16.msra.mxu1 %v10622_v8 }
 0x80b   :  { %2609 = vmatprep.subr.bf16.mxu0 %v8272_v10  ;;  %2650 = vmatprep.subr.bf16.mxu1 %v8275_v12  ;;  %v8306_v10 = vld [vmem:[#allocation15 + $0xc0] ss:$16 sps:$4 sm:$0xff]  }
 0x80c   :  { %v8309_v12 = vld [vmem:[#allocation15 + $0x2c0] ss:$16 sps:$4 sm:$0xff]  }
 0x8c0   :  { %v1800_v14 = vpop.f32.mrb[40].mxu0  ;;  %v1841_v17 = vpop.f32.mrb[40].mxu1 }
 0x8c1   :  { %v1848_v20 = vadd.f32 %v1800_v14, %v11027_v18  ;;  %v1850_v24 = vadd.f32 %v1841_v17, %v11028_v22  ;;  %v1802_v26 = vpop.f32.mrb[41].mxu0  ;;  %v1843_v28 = vpop.f32.mrb[41].mxu1  ;;  %v8314_v14 = vld [vmem:[#allocation15 + $0xe4] ss:$16 sps:$4 sm:$0xff]   ;;  %v8312_v18 = vld [vmem:[#allocation15 + $0xe0] ss:$16 sps:$4 sm:$0xff]  }
 0x8c2   :  { %v1849_v33 = vadd.f32 %v1802_v26, %v11029_v30  ;;  %v1851_v50 = vadd.f32 %v1843_v28, %v11030_v34  ;;  %v1804_v49 = vpop.f32.mrb[42].mxu0  ;;  %v1845_v51 = vpop.f32.mrb[42].mxu1  ;;  %v8317_v17 = vld [vmem:[#allocation15 + $0x2e4] ss:$16 sps:$4 sm:$0xff]   ;;  %v8318_v28 = vld [vmem:[#allocation15 + $0x100] ss:$16 sps:$4 sm:$0xff]  }
 0x8c3   :  { %v7359_v53 = vmul.f32 -1.442695, %v1848_v20  ;;  %v1805_v52 = vpop.f32.mrb[43].mxu0  ;;  %v1846_v54 = vpop.f32.mrb[43].mxu1  ;;  %v7361_v56 = vmul.f32 -1.442695, %v1850_v24 }
 0x8c4   :  { %v7360_v55 = vmul.f32 -1.442695, %v1849_v33  ;;  %v8315_v20 = vld [vmem:[#allocation15 + $0x2e0] ss:$16 sps:$4 sm:$0xff]   ;;  %v8320_v22 = vld [vmem:[#allocation15 + $0x104] ss:$16 sps:$4 sm:$0xff]  }
 0x8c5   :  { %9377 = vpow2.f32 %v7359_v53  ;;  %v8323_v24 = vld [vmem:[#allocation15 + $0xc] ss:$16 sps:$4 sm:$0xff]   ;;  %v10855_v26 = vld [vmem:[#allocation6 + $0x8] ss:$0 sps:$4 sm:$0xff]   ;;  %v8321_v30 = vld [vmem:[#allocation15 + $0x8] ss:$16 sps:$4 sm:$0xff]  }
 0x8c6   :  { %9379 = vpow2.f32 %v7360_v55  ;;  %v8327_v33 = vld [vmem:[#allocation15 + $0x124] ss:$16 sps:$4 sm:$0xff]   ;;  %v8330_v34 = vld [vmem:[#allocation15 + $0x2c] ss:$16 sps:$4 sm:$0xff]   ;;  %v8328_v49 = vld [vmem:[#allocation15 + $0x28] ss:$16 sps:$4 sm:$0xff]  }
 0x8c7   :  { %9381 = vtanh.f32 %v1851_v50  ;;  %v8325_v50 = vld [vmem:[#allocation15 + $0x120] ss:$16 sps:$4 sm:$0xff]   ;;  %v8333_v51 = vld [vmem:[#allocation15 + $0x144] ss:$16 sps:$4 sm:$0xff]   ;;  %v8336_v53 = vld [vmem:[#allocation15 + $0x4c] ss:$16 sps:$4 sm:$0xff]  }
 0x8c8   :  { %9383 = vpow2.f32 %v7361_v56  ;;  %v8331_v52 = vld [vmem:[#allocation15 + $0x140] ss:$16 sps:$4 sm:$0xff]   ;;  %v8334_v54 = vld [vmem:[#allocation15 + $0x48] ss:$16 sps:$4 sm:$0xff]   ;;  %v8339_v55 = vld [vmem:[#allocation15 + $0x164] ss:$16 sps:$4 sm:$0xff]  }
 0x8c9   :  { %v8342_v56 = vld [vmem:[#allocation15 + $0x6c] ss:$16 sps:$4 sm:$0xff]  }
 0x8cf   :  { %v9378_v36 = vpop.eup %9377 }
 0x8d0   :  { %v1861_v38 = vadd.f32 1.0, %v9378_v36  ;;  %v9380_v40 = vpop.eup %9379  ;;  %v8337_v36 = vld [vmem:[#allocation15 + $0x160] ss:$16 sps:$4 sm:$0xff]  }
 0x8d1   :  { %v1862_v43 = vadd.f32 1.0, %v9380_v40  ;;  %v9382_v57 = vpop.eup %9381  ;;  %v8345_v40 = vld [vmem:[#allocation15 + $0x184] ss:$16 sps:$4 sm:$0xff]  }
 0x8d2   :  { %9385 = vrcp.f32 %v1861_v38  ;;  %v9384_v2 = vpop.eup %9383  ;;  %v8340_v38 = vld [vmem:[#allocation15 + $0x68] ss:$16 sps:$4 sm:$0xff]  }
 0x8d3   :  { %9387 = vrcp.f32 %v1862_v43  ;;  %v1863_v48 = vadd.f32 1.0, %v9384_v2  ;;  %v8348_v43 = vld [vmem:[#allocation15 + $0x8c] ss:$16 sps:$4 sm:$0xff]   ;;  %v8346_v2 = vld [vmem:[#allocation15 + $0x88] ss:$16 sps:$4 sm:$0xff]  }
 0x8d5   :  { %9389 = vrcp.f32 %v1863_v48  ;;  %v8352_v48 = vld [vmem:[#allocation15 + $0xa8] ss:$16 sps:$4 sm:$0xff]  }
 0x8dc   :  { %v9386_v4 = vpop.eup %9385 }
 0x8dd   :  { %v1872_v6 = vmul.f32 %v9386_v4, %v9382_v57  ;;  %v9388_v8 = vpop.eup %9387  ;;  %v8343_v57 = vld [vmem:[#allocation15 + $0x180] ss:$16 sps:$4 sm:$0xff]   ;;  %v8351_v4 = vld [vmem:[#allocation15 + $0x1a4] ss:$16 sps:$4 sm:$0xff]  }
 0x8de   :  { %v1871_v37 = vmul.f32 %v9388_v8, %v10804_v59  ;;  %v8305_v59 = vld [vmem:[#allocation15 + $0x2a4] ss:$16 sps:$4 sm:$0xff]   ;;  %v8349_v8 = vld [vmem:[#allocation15 + $0x1a0] ss:$16 sps:$4 sm:$0xff]  }
 0x8df   :  { %v9390_v31 = vpop.eup %9389 }
 0x8e0   :  { %v10844_v47 = vadd.f32 %v1872_v6, %v1871_v37  ;;  %v8354_v6 = vld [vmem:[#allocation15 + $0xac] ss:$16 sps:$4 sm:$0xff]   ;;  %v8357_v37 = vld [vmem:[#allocation15 + $0x1c4] ss:$16 sps:$4 sm:$0xff]  }
 0x8e2   :  { %9391 = vtanh.f32 %v10844_v47 }
 0x8ec   :  { %v9392_v25 = vpop.eup %9391 }
 0x8ed   :  { %v1875_v3 = vmul.f32 %v9392_v25, %v9390_v31  ;;  %v8360_v31 = vld [vmem:[#allocation15 + $0xcc] ss:$16 sps:$4 sm:$0xff]   ;;  %v8355_v25 = vld [vmem:[#allocation15 + $0x1c0] ss:$16 sps:$4 sm:$0xff]  }
 0x8ef   :  { %v1876_v9 = vpack.c.bf16 %v1875_v3, %v1875_v3  ;;  %v8358_v3 = vld [vmem:[#allocation15 + $0xc8] ss:$16 sps:$4 sm:$0xff]  }
 0x8f1   :  { %1910 = vmatmul.mubr.bf16.vlgmr.msra.gmra.mrb[44].mxu0 %v1876_v9  ;;  %1951 = vmatmul.mubr.bf16.vlgmr.msra.gmra.mrb[44].mxu1 %v1876_v9  ;;  %v8361_v9 = vld [vmem:[#allocation15 + $0x1e0] ss:$16 sps:$4 sm:$0xff]  }
 0x8f2   :  { %2610 = vmatpush1.bf16.msra.mxu0 %v8270_v7  ;;  %2651 = vmatpush1.bf16.msra.mxu1 %v8273_v29  ;;  %v8363_v7 = vld [vmem:[#allocation15 + $0x1e4] ss:$16 sps:$4 sm:$0xff]   ;;  %v8366_v29 = vld [vmem:[#allocation15 + $0xec] ss:$16 sps:$4 sm:$0xff]  }
 0x8f3   :  { %2611 = vmatprep.subr.bf16.mxu0 %v8278_v35  ;;  %2652 = vmatprep.subr.bf16.mxu1 %v8281_v11  ;;  %v8364_v35 = vld [vmem:[#allocation15 + $0xe8] ss:$16 sps:$4 sm:$0xff]   ;;  %v8371_v11 = vld [vmem:[#allocation15 + $0x20c] ss:$16 sps:$4 sm:$0xff]  }
 0x8f4   :  { %2682 = vmatprep.mubr.bf16.mxu1 %v11020_v23  ;;  %2641 = vmatprep.mubr.bf16.mxu0 %v10851_v13 }
 0x8f6   :  { %2612 = vmatpush1.bf16.msra.mxu0 %v8276_v15  ;;  %2653 = vmatpush1.bf16.msra.mxu1 %v8279_v27  ;;  %v10861_v15 = vcombine.low %v10847_v5, %v10847_v5  ;;  %v8369_v27 = vld [vmem:[#allocation15 + $0x208] ss:$16 sps:$4 sm:$0xff]  }
 0x8f7   :  { %2613 = vmatprep.subr.bf16.mxu0 %v8284_v41  ;;  %2654 = vmatprep.subr.bf16.mxu1 %v8287_v46  ;;  %v8372_v41 = vld [vmem:[#allocation15 + $0x108] ss:$16 sps:$4 sm:$0xff]   ;;  %v8377_v46 = vld [vmem:[#allocation15 + $0x22c] ss:$16 sps:$4 sm:$0xff]  }
 0x8f8   :  { %v8381_v5 = vld [vmem:[#allocation15 + $0x248] ss:$16 sps:$4 sm:$0xff]  }
 0x8fa   :  { %2614 = vmatpush1.bf16.msra.mxu0 %v8282_v19  ;;  %2655 = vmatpush1.bf16.msra.mxu1 %v8285_v21  ;;  %v8380_v19 = vld [vmem:[#allocation15 + $0x12c] ss:$16 sps:$4 sm:$0xff]   ;;  %v8375_v21 = vld [vmem:[#allocation15 + $0x228] ss:$16 sps:$4 sm:$0xff]  }
 0x8fb   :  { %2615 = vmatprep.subr.bf16.mxu0 %v8290_v16  ;;  %2656 = vmatprep.subr.bf16.mxu1 %v8293_v39  ;;  %v8378_v16 = vld [vmem:[#allocation15 + $0x128] ss:$16 sps:$4 sm:$0xff]   ;;  %v8383_v39 = vld [vmem:[#allocation15 + $0x24c] ss:$16 sps:$4 sm:$0xff]  }
 0x8fe   :  { %2616 = vmatpush1.bf16.msra.mxu0 %v8288_v42  ;;  %2657 = vmatpush1.bf16.msra.mxu1 %v8291_v58  ;;  %v8386_v42 = vld [vmem:[#allocation15 + $0x14c] ss:$16 sps:$4 sm:$0xff]   ;;  %v8384_v58 = vld [vmem:[#allocation15 + $0x148] ss:$16 sps:$4 sm:$0xff]  }
 0x8ff   :  { %2617 = vmatprep.subr.bf16.mxu0 %v8296_v62  ;;  %2658 = vmatprep.subr.bf16.mxu1 %v8299_v60  ;;  %v8389_v62 = vld [vmem:[#allocation15 + $0x26c] ss:$16 sps:$4 sm:$0xff]  }
 0x900   :  { %v8392_v60 = vld [vmem:[#allocation15 + $0x16c] ss:$16 sps:$4 sm:$0xff]  }
 0x902   :  { %2618 = vmatpush1.bf16.msra.mxu0 %v8294_v32  ;;  %2659 = vmatpush1.bf16.msra.mxu1 %v8297_v44  ;;  %v8387_v32 = vld [vmem:[#allocation15 + $0x268] ss:$16 sps:$4 sm:$0xff]  }
 0x903   :  { %2619 = vmatprep.subr.bf16.mxu0 %v8302_v45  ;;  %2660 = vmatprep.subr.bf16.mxu1 %v8305_v59  ;;  %v8390_v44 = vld [vmem:[#allocation15 + $0x168] ss:$16 sps:$4 sm:$0xff]   ;;  %v8395_v45 = vld [vmem:[#allocation15 + $0x28c] ss:$16 sps:$4 sm:$0xff]  }
 0x904   :  { %v8393_v59 = vld [vmem:[#allocation15 + $0x288] ss:$16 sps:$4 sm:$0xff]  }
 0x906   :  { %2620 = vmatpush1.bf16.msra.mxu0 %v8300_v61  ;;  %2661 = vmatpush1.bf16.msra.mxu1 %v8303_v1  ;;  %v8398_v61 = vld [vmem:[#allocation15 + $0x18c] ss:$16 sps:$4 sm:$0xff]   ;;  %v8396_v1 = vld [vmem:[#allocation15 + $0x188] ss:$16 sps:$4 sm:$0xff]  }
 0x907   :  { %2621 = vmatprep.subr.bf16.mxu0 %v8308_v63  ;;  %2662 = vmatprep.subr.bf16.mxu1 %v8311_v0  ;;  %v8401_v63 = vld [vmem:[#allocation15 + $0x2ac] ss:$16 sps:$4 sm:$0xff]   ;;  %v8399_v0 = vld [vmem:[#allocation15 + $0x2a8] ss:$16 sps:$4 sm:$0xff]  }
 0x90a   :  { %2622 = vmatpush1.bf16.msra.mxu0 %v8306_v10  ;;  %2663 = vmatpush1.bf16.msra.mxu1 %v8309_v12  ;;  %v8404_v10 = vld [vmem:[#allocation15 + $0x1ac] ss:$16 sps:$4 sm:$0xff]   ;;  %v8402_v12 = vld [vmem:[#allocation15 + $0x1a8] ss:$16 sps:$4 sm:$0xff]  }
 0x90b   :  { %2623 = vmatprep.subr.bf16.mxu0 %v8314_v14  ;;  %2664 = vmatprep.subr.bf16.mxu1 %v8317_v17  ;;  %v8407_v14 = vld [vmem:[#allocation15 + $0x2cc] ss:$16 sps:$4 sm:$0xff]   ;;  %v8405_v17 = vld [vmem:[#allocation15 + $0x2c8] ss:$16 sps:$4 sm:$0xff]  }
 0x90e   :  { %2624 = vmatpush1.bf16.msra.mxu0 %v8312_v18  ;;  %2665 = vmatpush1.bf16.msra.mxu1 %v8315_v20  ;;  %v8410_v18 = vld [vmem:[#allocation15 + $0x1cc] ss:$16 sps:$4 sm:$0xff]   ;;  %v8408_v20 = vld [vmem:[#allocation15 + $0x1c8] ss:$16 sps:$4 sm:$0xff]  }
 0x90f   :  { %2625 = vmatprep.subr.bf16.mxu0 %v8320_v22  ;;  %2691 = vmatprep.subr.bf16.mxu1 %v8323_v24  ;;  %v8413_v22 = vld [vmem:[#allocation15 + $0x2ec] ss:$16 sps:$4 sm:$0xff]   ;;  %v8411_v24 = vld [vmem:[#allocation15 + $0x2e8] ss:$16 sps:$4 sm:$0xff]  }
 0x911   :  { %2683 = vmatmul.mubr.bf16.vlgmr.msra.gmra.mrb[48].mxu1 %v10855_v26 }
 0x912   :  { %2626 = vmatpush1.bf16.msra.mxu0 %v8318_v28  ;;  %2692 = vmatpush1.bf16.msra.mxu1 %v8321_v30  ;;  %v8416_v28 = vld [vmem:[#allocation15 + $0x1ec] ss:$16 sps:$4 sm:$0xff]   ;;  %v8414_v30 = vld [vmem:[#allocation15 + $0x1e8] ss:$16 sps:$4 sm:$0xff]  }
 0x913   :  { %2627 = vmatprep.subr.bf16.mxu0 %v8327_v33  ;;  %2693 = vmatprep.subr.bf16.mxu1 %v8330_v34  ;;  %v8419_v33 = vld [vmem:[#allocation14 + $0x4] ss:$16 sps:$4 sm:$0xff]   ;;  %v8422_v34 = vld [vmem:[#allocation14 + $0xc] ss:$16 sps:$4 sm:$0xff]  }
 0x914   :  { %2723 = vmatprep.mubr.bf16.mxu1 %v10851_v13  ;;  %v8374_v13 = vld [vmem:[#allocation15 + $0x10c] ss:$16 sps:$4 sm:$0xff]  }
 0x916   :  { %2628 = vmatpush1.bf16.msra.mxu0 %v8325_v50  ;;  %2694 = vmatpush1.bf16.msra.mxu1 %v8328_v49  ;;  %v8417_v50 = vld [vmem:[#allocation14] ss:$16 sps:$4 sm:$0xff]   ;;  %v8420_v49 = vld [vmem:[#allocation14 + $0x8] ss:$16 sps:$4 sm:$0xff]  }
 0x917   :  { %2629 = vmatprep.subr.bf16.mxu0 %v8333_v51  ;;  %2695 = vmatprep.subr.bf16.mxu1 %v8336_v53  ;;  %v8425_v51 = vld [vmem:[#allocation14 + $0x24] ss:$16 sps:$4 sm:$0xff]   ;;  %v8428_v53 = vld [vmem:[#allocation14 + $0x2c] ss:$16 sps:$4 sm:$0xff]  }
 0x91a   :  { %2630 = vmatpush1.bf16.msra.mxu0 %v8331_v52  ;;  %2696 = vmatpush1.bf16.msra.mxu1 %v8334_v54  ;;  %v8423_v52 = vld [vmem:[#allocation14 + $0x20] ss:$16 sps:$4 sm:$0xff]   ;;  %v8426_v54 = vld [vmem:[#allocation14 + $0x28] ss:$16 sps:$4 sm:$0xff]  }
 0x91b   :  { %2631 = vmatprep.subr.bf16.mxu0 %v8339_v55  ;;  %2697 = vmatprep.subr.bf16.mxu1 %v8342_v56  ;;  %v8434_v55 = vld [vmem:[#allocation14 + $0x4c] ss:$16 sps:$4 sm:$0xff]   ;;  %v8429_v56 = vld [vmem:[#allocation14 + $0x40] ss:$16 sps:$4 sm:$0xff]  }
 0x91e   :  { %2632 = vmatpush1.bf16.msra.mxu0 %v8337_v36  ;;  %2698 = vmatpush1.bf16.msra.mxu1 %v8340_v38  ;;  %v8432_v36 = vld [vmem:[#allocation14 + $0x48] ss:$16 sps:$4 sm:$0xff]   ;;  %v8437_v38 = vld [vmem:[#allocation14 + $0x64] ss:$16 sps:$4 sm:$0xff]  }
 0x91f   :  { %2633 = vmatprep.subr.bf16.mxu0 %v8345_v40  ;;  %2699 = vmatprep.subr.bf16.mxu1 %v8348_v43  ;;  %v8440_v40 = vld [vmem:[#allocation14 + $0x6c] ss:$16 sps:$4 sm:$0xff]   ;;  %v8435_v43 = vld [vmem:[#allocation14 + $0x60] ss:$16 sps:$4 sm:$0xff]  }
 0x922   :  { %2634 = vmatpush1.bf16.msra.mxu0 %v8343_v57  ;;  %2700 = vmatpush1.bf16.msra.mxu1 %v8346_v2  ;;  %v8438_v57 = vld [vmem:[#allocation14 + $0x68] ss:$16 sps:$4 sm:$0xff]   ;;  %v8443_v2 = vld [vmem:[#allocation14 + $0x84] ss:$16 sps:$4 sm:$0xff]  }
 0x923   :  { %2635 = vmatprep.subr.bf16.mxu0 %v8351_v4  ;;  %2701 = vmatprep.subr.bf16.mxu1 %v8354_v6  ;;  %v8446_v4 = vld [vmem:[#allocation14 + $0x8c] ss:$16 sps:$4 sm:$0xff]   ;;  %v8441_v6 = vld [vmem:[#allocation14 + $0x80] ss:$16 sps:$4 sm:$0xff]  }
 0x926   :  { %2636 = vmatpush1.bf16.msra.mxu0 %v8349_v8  ;;  %2702 = vmatpush1.bf16.msra.mxu1 %v8352_v48  ;;  %v8444_v8 = vld [vmem:[#allocation14 + $0x88] ss:$16 sps:$4 sm:$0xff]   ;;  %v8447_v48 = vld [vmem:[#allocation14 + $0xa0] ss:$16 sps:$4 sm:$0xff]  }
 0x927   :  { %2637 = vmatprep.subr.bf16.mxu0 %v8357_v37  ;;  %2703 = vmatprep.subr.bf16.mxu1 %v8360_v31  ;;  %v8449_v37 = vld [vmem:[#allocation14 + $0xa4] ss:$16 sps:$4 sm:$0xff]   ;;  %v8450_v31 = vld [vmem:[#allocation14 + $0xa8] ss:$16 sps:$4 sm:$0xff]  }
 0x92a   :  { %2638 = vmatpush1.bf16.msra.mxu0 %v8355_v25  ;;  %2704 = vmatpush1.bf16.msra.mxu1 %v8358_v3  ;;  %v8452_v25 = vld [vmem:[#allocation14 + $0xac] ss:$16 sps:$4 sm:$0xff]   ;;  %v8455_v3 = vld [vmem:[#allocation14 + $0xc4] ss:$16 sps:$4 sm:$0xff]  }
 0x92b   :  { %2639 = vmatprep.subr.bf16.mxu0 %v8363_v7  ;;  %2705 = vmatprep.subr.bf16.mxu1 %v8366_v29  ;;  %v8458_v7 = vld [vmem:[#allocation14 + $0xcc] ss:$16 sps:$4 sm:$0xff]   ;;  %v8453_v29 = vld [vmem:[#allocation14 + $0xc0] ss:$16 sps:$4 sm:$0xff]  }
 0x92e   :  { %2640 = vmatpush1.bf16.msra.mxu0 %v8361_v9  ;;  %2706 = vmatpush1.bf16.msra.mxu1 %v8364_v35  ;;  %v8456_v9 = vld [vmem:[#allocation14 + $0xc8] ss:$16 sps:$4 sm:$0xff]   ;;  %v8461_v35 = vld [vmem:[#allocation14 + $0xe4] ss:$16 sps:$4 sm:$0xff]  }
 0x92f   :  { %2732 = vmatprep.subr.bf16.mxu0 %v8371_v11  ;;  %2707 = vmatprep.subr.bf16.mxu1 %v8374_v13  ;;  %v8464_v11 = vld [vmem:[#allocation14 + $0xec] ss:$16 sps:$4 sm:$0xff]   ;;  %v8459_v13 = vld [vmem:[#allocation14 + $0xe0] ss:$16 sps:$4 sm:$0xff]  }
 0x931   :  { %2642 = vmatmul.mubr.bf16.vlgmr.msra.gmra.mrb[48].mxu0 %v10861_v15 }
 0x932   :  { %2733 = vmatpush1.bf16.msra.mxu0 %v8369_v27  ;;  %2708 = vmatpush1.bf16.msra.mxu1 %v8372_v41  ;;  %v8467_v27 = vld [vmem:[#allocation17 + $0x4] ss:$16 sps:$4 sm:$0xff]   ;;  %v8470_v41 = vld [vmem:[#allocation17 + $0xc] ss:$16 sps:$4 sm:$0xff]  }
 0x933   :  { %2734 = vmatprep.subr.bf16.mxu0 %v8377_v46  ;;  %2709 = vmatprep.subr.bf16.mxu1 %v8380_v19 }
 0x934   :  { %2764 = vmatprep.mubr.bf16.mxu0 %v11020_v23 }
 0x936   :  { %2735 = vmatpush1.bf16.msra.mxu0 %v8375_v21  ;;  %2710 = vmatpush1.bf16.msra.mxu1 %v8378_v16  ;;  %v11031_v21 = vld [vmem:[#allocation59_spill] sm:$0xff] }
 0x937   :  { %2736 = vmatprep.subr.bf16.mxu0 %v8383_v39  ;;  %2711 = vmatprep.subr.bf16.mxu1 %v8386_v42  ;;  %v11032_v39 = vld [vmem:[#allocation60_spill] sm:$0xff] }
 0x93a   :  { %2737 = vmatpush1.bf16.msra.mxu0 %v8381_v5  ;;  %2712 = vmatpush1.bf16.msra.mxu1 %v8384_v58 }
 0x93b   :  { %2738 = vmatprep.subr.bf16.mxu0 %v8389_v62  ;;  %2713 = vmatprep.subr.bf16.mxu1 %v8392_v60  ;;  %v11033_v62 = vld [vmem:[#allocation61_spill] sm:$0xff] }
 0x93e   :  { %2739 = vmatpush1.bf16.msra.mxu0 %v8387_v32  ;;  %2714 = vmatpush1.bf16.msra.mxu1 %v8390_v44  ;;  %v11034_v32 = vld [vmem:[#allocation62_spill] sm:$0xff] }
 0x93f   :  { %2740 = vmatprep.subr.bf16.mxu0 %v8395_v45  ;;  %2715 = vmatprep.subr.bf16.mxu1 %v8398_v61 }
 0x942   :  { %2741 = vmatpush1.bf16.msra.mxu0 %v8393_v59  ;;  %2716 = vmatpush1.bf16.msra.mxu1 %v8396_v1 }
 0x943   :  { %2742 = vmatprep.subr.bf16.mxu0 %v8401_v63  ;;  %2717 = vmatprep.subr.bf16.mxu1 %v8404_v10 }
 0x946   :  { %2743 = vmatpush1.bf16.msra.mxu0 %v8399_v0  ;;  %2718 = vmatpush1.bf16.msra.mxu1 %v8402_v12 }
 0x947   :  { %2744 = vmatprep.subr.bf16.mxu0 %v8407_v14  ;;  %2719 = vmatprep.subr.bf16.mxu1 %v8410_v18 }
 0x94a   :  { %2745 = vmatpush1.bf16.msra.mxu0 %v8405_v17  ;;  %2720 = vmatpush1.bf16.msra.mxu1 %v8408_v20 }
 0x94b   :  { %2746 = vmatprep.subr.bf16.mxu0 %v8413_v22  ;;  %2721 = vmatprep.subr.bf16.mxu1 %v8416_v28 }
 0x94e   :  { %2747 = vmatpush1.bf16.msra.mxu0 %v8411_v24  ;;  %2722 = vmatpush1.bf16.msra.mxu1 %v8414_v30 }
 0x94f   :  { %2933 = vmatprep.subr.bf16.mxu0 %v8419_v33  ;;  %2974 = vmatprep.subr.bf16.mxu1 %v8422_v34 }
 0x951   :  { %2765 = vmatmul.mubr.bf16.vlgmr.msra.gmra.mrb[52].mxu0 %v10855_v26  ;;  %2724 = vmatmul.mubr.bf16.vlgmr.msra.gmra.mrb[52].mxu1 %v10861_v15  ;;  %v8431_v26 = vld [vmem:[#allocation14 + $0x44] ss:$16 sps:$4 sm:$0xff]   ;;  %v8462_v15 = vld [vmem:[#allocation14 + $0xe8] ss:$16 sps:$4 sm:$0xff]  }
 0x952   :  { %2965 = vmatprep.mubr.bf16.mxu0 %v11020_v23  ;;  %2934 = vmatpush1.bf16.msra.mxu0 %v8417_v50 }
 0x953   :  { %2975 = vmatpush1.bf16.msra.mxu1 %v8420_v49  ;;  %3006 = vmatprep.mubr.bf16.mxu1 %v11020_v23 }
 0x954   :  { %2935 = vmatprep.subr.bf16.mxu0 %v8425_v51  ;;  %2976 = vmatprep.subr.bf16.mxu1 %v8428_v53 }
 0x956   :  { %2936 = vmatpush1.bf16.msra.mxu0 %v8423_v52 }
 0x957   :  { %2977 = vmatpush1.bf16.msra.mxu1 %v8426_v54  ;;  %2937 = vmatprep.subr.bf16.mxu0 %v8431_v26 }
 0x958   :  { %2978 = vmatprep.subr.bf16.mxu1 %v8434_v55 }
 0x95a   :  { %2938 = vmatpush1.bf16.msra.mxu0 %v8429_v56  ;;  %v8465_v56 = vld [vmem:[#allocation17] ss:$16 sps:$4 sm:$0xff]  }
 0x95b   :  { %2979 = vmatpush1.bf16.msra.mxu1 %v8432_v36  ;;  %2939 = vmatprep.subr.bf16.mxu0 %v8437_v38  ;;  %v8468_v36 = vld [vmem:[#allocation17 + $0x8] ss:$16 sps:$4 sm:$0xff]  }
 0x95c   :  { %2980 = vmatprep.subr.bf16.mxu1 %v8440_v40  ;;  %v8473_v40 = vld [vmem:[#allocation17 + $0x24] ss:$16 sps:$4 sm:$0xff]  }
 0x95e   :  { %2940 = vmatpush1.bf16.msra.mxu0 %v8435_v43  ;;  %v8476_v43 = vld [vmem:[#allocation17 + $0x2c] ss:$16 sps:$4 sm:$0xff]  }
 0x95f   :  { %2981 = vmatpush1.bf16.msra.mxu1 %v8438_v57  ;;  %2941 = vmatprep.subr.bf16.mxu0 %v8443_v2  ;;  %v8474_v57 = vld [vmem:[#allocation17 + $0x28] ss:$16 sps:$4 sm:$0xff]   ;;  %v8479_v2 = vld [vmem:[#allocation17 + $0x44] ss:$16 sps:$4 sm:$0xff]  }
 0x960   :  { %2982 = vmatprep.subr.bf16.mxu1 %v8446_v4  ;;  %v8482_v4 = vld [vmem:[#allocation17 + $0x4c] ss:$16 sps:$4 sm:$0xff]  }
 0x962   :  { %2942 = vmatpush1.bf16.msra.mxu0 %v8441_v6  ;;  %v8477_v6 = vld [vmem:[#allocation17 + $0x40] ss:$16 sps:$4 sm:$0xff]  }
 0x963   :  { %2983 = vmatpush1.bf16.msra.mxu1 %v8444_v8  ;;  %2943 = vmatprep.subr.bf16.mxu0 %v8449_v37  ;;  %v8480_v8 = vld [vmem:[#allocation17 + $0x48] ss:$16 sps:$4 sm:$0xff]   ;;  %v8488_v37 = vld [vmem:[#allocation17 + $0x6c] ss:$16 sps:$4 sm:$0xff]  }
 0x964   :  { %2984 = vmatprep.subr.bf16.mxu1 %v8452_v25  ;;  %v8486_v25 = vld [vmem:[#allocation17 + $0x68] ss:$16 sps:$4 sm:$0xff]  }
 0x966   :  { %2944 = vmatpush1.bf16.msra.mxu0 %v8447_v48  ;;  %v8485_v48 = vld [vmem:[#allocation17 + $0x64] ss:$16 sps:$4 sm:$0xff]  }
 0x967   :  { %2985 = vmatpush1.bf16.msra.mxu1 %v8450_v31  ;;  %2945 = vmatprep.subr.bf16.mxu0 %v8455_v3  ;;  %v8483_v31 = vld [vmem:[#allocation17 + $0x60] ss:$16 sps:$4 sm:$0xff]   ;;  %v8491_v3 = vld [vmem:[#allocation17 + $0x84] ss:$16 sps:$4 sm:$0xff]  }
 0x968   :  { %2986 = vmatprep.subr.bf16.mxu1 %v8458_v7  ;;  %v8494_v7 = vld [vmem:[#allocation17 + $0x8c] ss:$16 sps:$4 sm:$0xff]  }
 0x96a   :  { %2946 = vmatpush1.bf16.msra.mxu0 %v8453_v29  ;;  %v8489_v29 = vld [vmem:[#allocation17 + $0x80] ss:$16 sps:$4 sm:$0xff]  }
 0x96b   :  { %2987 = vmatpush1.bf16.msra.mxu1 %v8456_v9  ;;  %2947 = vmatprep.subr.bf16.mxu0 %v8461_v35  ;;  %v8497_v9 = vld [vmem:[#allocation17 + $0xa4] ss:$16 sps:$4 sm:$0xff]   ;;  %v8500_v35 = vld [vmem:[#allocation17 + $0xac] ss:$16 sps:$4 sm:$0xff]  }
 0x96c   :  { %2988 = vmatprep.subr.bf16.mxu1 %v8464_v11 }
 0x96e   :  { %2948 = vmatpush1.bf16.msra.mxu0 %v8459_v13 }
 0x96f   :  { %2989 = vmatpush1.bf16.msra.mxu1 %v8462_v15  ;;  %3208 = vmatprep.subr.bf16.mxu0 %v8467_v27 }
 0x970   :  { %3249 = vmatprep.subr.bf16.mxu1 %v8470_v41 }
 0x9c4   :  { %v1911_v46 = vpop.f32.mrb[44].mxu0  ;;  %v1952_v19 = vpop.f32.mrb[44].mxu1 }
 0x9c5   :  { %v1959_v16 = vadd.f32 %v1911_v46, %v11031_v21  ;;  %v1961_v42 = vadd.f32 %v1952_v19, %v11032_v39  ;;  %v1913_v5 = vpop.f32.mrb[45].mxu0  ;;  %v1954_v58 = vpop.f32.mrb[45].mxu1  ;;  %v8495_v46 = vld [vmem:[#allocation17 + $0xa0] ss:$16 sps:$4 sm:$0xff]   ;;  %v8498_v19 = vld [vmem:[#allocation17 + $0xa8] ss:$16 sps:$4 sm:$0xff]  }
 0x9c6   :  { %v1960_v60 = vadd.f32 %v1913_v5, %v11033_v62  ;;  %v1962_v44 = vadd.f32 %v1954_v58, %v11034_v32  ;;  %v1915_v45 = vpop.f32.mrb[46].mxu0  ;;  %v1956_v59 = vpop.f32.mrb[46].mxu1  ;;  %v8506_v39 = vld [vmem:[#allocation17 + $0xcc] ss:$16 sps:$4 sm:$0xff]   ;;  %v8504_v5 = vld [vmem:[#allocation17 + $0xc8] ss:$16 sps:$4 sm:$0xff]  }
 0x9c7   :  { %v7362_v61 = vmul.f32 -1.442695, %v1959_v16  ;;  %v1916_v1 = vpop.f32.mrb[47].mxu0  ;;  %v1957_v63 = vpop.f32.mrb[47].mxu1  ;;  %v7364_v10 = vmul.f32 -1.442695, %v1961_v42 }
 0x9c8   :  { %v7363_v0 = vmul.f32 -1.442695, %v1960_v60  ;;  %v8503_v16 = vld [vmem:[#allocation17 + $0xc4] ss:$16 sps:$4 sm:$0xff]   ;;  %v8501_v42 = vld [vmem:[#allocation17 + $0xc0] ss:$16 sps:$4 sm:$0xff]  }
 0x9c9   :  { %9393 = vpow2.f32 %v7362_v61  ;;  %v8509_v58 = vld [vmem:[#allocation17 + $0xe4] ss:$16 sps:$4 sm:$0xff]   ;;  %v8512_v62 = vld [vmem:[#allocation17 + $0xec] ss:$16 sps:$4 sm:$0xff]   ;;  %v8507_v60 = vld [vmem:[#allocation17 + $0xe0] ss:$16 sps:$4 sm:$0xff]  }
 0x9ca   :  { %9395 = vpow2.f32 %v7363_v0  ;;  %v8510_v32 = vld [vmem:[#allocation17 + $0xe8] ss:$16 sps:$4 sm:$0xff]   ;;  %v8518_v45 = vld [vmem:[#allocation20 + $0xc] ss:$16 sps:$4 sm:$0xff]   ;;  %v8513_v61 = vld [vmem:[#allocation20] ss:$16 sps:$4 sm:$0xff]  }
 0x9cb   :  { %9397 = vtanh.f32 %v1962_v44  ;;  %v8515_v44 = vld [vmem:[#allocation20 + $0x4] ss:$16 sps:$4 sm:$0xff]   ;;  %v8516_v1 = vld [vmem:[#allocation20 + $0x8] ss:$16 sps:$4 sm:$0xff]   ;;  %v8524_v0 = vld [vmem:[#allocation20 + $0x2c] ss:$16 sps:$4 sm:$0xff]  }
 0x9cc   :  { %9399 = vpow2.f32 %v7364_v10  ;;  %v3015_v59 = vld [vmem:[#allocation8] sm:$0xf]  ;;  %v8519_v10 = vld [vmem:[#allocation20 + $0x20] ss:$16 sps:$4 sm:$0xff]  }
 0x9cd   :  { %v8521_v63 = vld [vmem:[#allocation20 + $0x24] ss:$16 sps:$4 sm:$0xff]  }
 0x9d3   :  { %v9394_v12 = vpop.eup %9393 }
 0x9d4   :  { %v1972_v14 = vadd.f32 1.0, %v9394_v12  ;;  %v9396_v17 = vpop.eup %9395  ;;  %v8522_v12 = vld [vmem:[#allocation20 + $0x28] ss:$16 sps:$4 sm:$0xff]  }
 0x9d5   :  { %v1973_v18 = vadd.f32 1.0, %v9396_v17  ;;  %v9398_v20 = vpop.eup %9397  ;;  %v8530_v17 = vld [vmem:[#allocation20 + $0x4c] ss:$16 sps:$4 sm:$0xff]  }
 0x9d6   :  { %9401 = vrcp.f32 %v1972_v14  ;;  %v9400_v22 = vpop.eup %9399  ;;  %v8527_v14 = vld [vmem:[#allocation20 + $0x44] ss:$16 sps:$4 sm:$0xff]  }
 0x9d7   :  { %9403 = vrcp.f32 %v1973_v18  ;;  %v1974_v33 = vadd.f32 1.0, %v9400_v22  ;;  %v8525_v18 = vld [vmem:[#allocation20 + $0x40] ss:$16 sps:$4 sm:$0xff]   ;;  %v8533_v22 = vld [vmem:[#allocation20 + $0x64] ss:$16 sps:$4 sm:$0xff]  }
 0x9d9   :  { %9405 = vrcp.f32 %v1974_v33  ;;  %v8539_v33 = vld [vmem:[#allocation20 + $0x84] ss:$16 sps:$4 sm:$0xff]  }
 0x9e0   :  { %v9402_v24 = vpop.eup %9401 }
 0x9e1   :  { %v1983_v28 = vmul.f32 %v9402_v24, %v9398_v20  ;;  %v9404_v30 = vpop.eup %9403  ;;  %v8528_v20 = vld [vmem:[#allocation20 + $0x48] ss:$16 sps:$4 sm:$0xff]   ;;  %v8536_v24 = vld [vmem:[#allocation20 + $0x6c] ss:$16 sps:$4 sm:$0xff]  }
 0x9e2   :  { %v1982_v34 = vmul.f32 %v9404_v30, %v10844_v47  ;;  %v8471_v47 = vld [vmem:[#allocation17 + $0x20] ss:$16 sps:$4 sm:$0xff]   ;;  %v8534_v30 = vld [vmem:[#allocation20 + $0x68] ss:$16 sps:$4 sm:$0xff]  }
 0x9e3   :  { %v9406_v54 = vpop.eup %9405 }
 0x9e4   :  { %v2684_v50 = vpop.f32.mrb[48].mxu1  ;;  %v1984_v49 = vadd.f32 %v1983_v28, %v1982_v34  ;;  %v8531_v28 = vld [vmem:[#allocation20 + $0x60] ss:$16 sps:$4 sm:$0xff]   ;;  %v8542_v34 = vld [vmem:[#allocation20 + $0x8c] ss:$16 sps:$4 sm:$0xff]  }
 0x9e5   :  { %v2686_v51 = vpop.f32.mrb[49].mxu1 }
 0x9e6   :  { %v2688_v53 = vpop.f32.mrb[50].mxu1  ;;  %9407 = vtanh.f32 %v1984_v49  ;;  %v8540_v49 = vld [vmem:[#allocation20 + $0x88] ss:$16 sps:$4 sm:$0xff]  }
 0x9e7   :  { %v2689_v52 = vpop.f32.mrb[51].mxu1  ;;  %v8548_v53 = vld [vmem:[#allocation20 + $0xac] ss:$16 sps:$4 sm:$0xff]  }
 0x9f0   :  { %v9408_v26 = vpop.eup %9407 }
 0x9f1   :  { %v1986_v55 = vmul.f32 %v9408_v26, %v9406_v54  ;;  %v8543_v26 = vld [vmem:[#allocation20 + $0xa0] ss:$16 sps:$4 sm:$0xff]  }
 0x9f3   :  { %v1987_v38 = vpack.c.bf16 %v1986_v55, %v1986_v55  ;;  %v8546_v55 = vld [vmem:[#allocation20 + $0xa8] ss:$16 sps:$4 sm:$0xff]  }
 0x9f5   :  { %2966 = vmatmul.mubr.bf16.vlgmr.msra.gmra.mrb[56].mxu0 %v1987_v38  ;;  %3007 = vmatmul.mubr.bf16.vlgmr.msra.gmra.mrb[56].mxu1 %v1987_v38 }
 0x9f6   :  { %3209 = vmatpush1.bf16.msra.mxu0 %v8465_v56  ;;  %3250 = vmatpush1.bf16.msra.mxu1 %v8468_v36 }
 0x9f7   :  { %3210 = vmatprep.subr.bf16.mxu0 %v8473_v40  ;;  %3251 = vmatprep.subr.bf16.mxu1 %v8476_v43 }
 0x9f8   :  { %3240 = vmatprep.mubr.bf16.mxu0 %v11020_v23  ;;  %3281 = vmatprep.mubr.bf16.mxu1 %v11020_v23  ;;  %v8492_v23 = vld [vmem:[#allocation17 + $0x88] ss:$16 sps:$4 sm:$0xff]  }
 0x9fa   :  { %3211 = vmatpush1.bf16.msra.mxu0 %v8471_v47  ;;  %3252 = vmatpush1.bf16.msra.mxu1 %v8474_v57 }
 0x9fb   :  { %3212 = vmatprep.subr.bf16.mxu0 %v8479_v2  ;;  %3253 = vmatprep.subr.bf16.mxu1 %v8482_v4  ;;  %v8551_v4 = vld [vmem:[#allocation20 + $0xc4] ss:$16 sps:$4 sm:$0xff]  }
 0x9fe   :  { %3213 = vmatpush1.bf16.msra.mxu0 %v8477_v6  ;;  %3254 = vmatpush1.bf16.msra.mxu1 %v8480_v8  ;;  %v8554_v6 = vld [vmem:[#allocation20 + $0xcc] ss:$16 sps:$4 sm:$0xff]   ;;  %v8549_v8 = vld [vmem:[#allocation20 + $0xc0] ss:$16 sps:$4 sm:$0xff]  }
 0x9ff   :  { %3214 = vmatprep.subr.bf16.mxu0 %v8485_v48  ;;  %3255 = vmatprep.subr.bf16.mxu1 %v8488_v37  ;;  %v8552_v48 = vld [vmem:[#allocation20 + $0xc8] ss:$16 sps:$4 sm:$0xff]   ;;  %v8555_v37 = vld [vmem:[#allocation20 + $0xe0] ss:$16 sps:$4 sm:$0xff]  }
 0xa02   :  { %3215 = vmatpush1.bf16.msra.mxu0 %v8483_v31  ;;  %3256 = vmatpush1.bf16.msra.mxu1 %v8486_v25  ;;  %v8557_v31 = vld [vmem:[#allocation20 + $0xe4] ss:$16 sps:$4 sm:$0xff]   ;;  %v8558_v25 = vld [vmem:[#allocation20 + $0xe8] ss:$16 sps:$4 sm:$0xff]  }
 0xa03   :  { %3216 = vmatprep.subr.bf16.mxu0 %v8491_v3  ;;  %3257 = vmatprep.subr.bf16.mxu1 %v8494_v7  ;;  %v8560_v3 = vld [vmem:[#allocation20 + $0xec] ss:$16 sps:$4 sm:$0xff]   ;;  %v8563_v7 = vld [vmem:[#allocation20 + $0x104] ss:$16 sps:$4 sm:$0xff]  }
 0xa04   :  { %v2643_v11 = vpop.f32.mrb[48].mxu0 }
 0xa05   :  { %v2645_v13 = vpop.f32.mrb[49].mxu0  ;;  %v10876_v15 = vadd.f32 %v2684_v50, %v2643_v11  ;;  %v8537_v50 = vld [vmem:[#allocation20 + $0x80] ss:$16 sps:$4 sm:$0xff]   ;;  %v8572_v11 = vld [vmem:[#allocation20 + $0x12c] ss:$16 sps:$4 sm:$0xff]  }
 0xa06   :  { %v2647_v27 = vpop.f32.mrb[50].mxu0  ;;  %v10878_v41 = vadd.f32 %v2686_v51, %v2645_v13  ;;  %3217 = vmatpush1.bf16.msra.mxu0 %v8489_v29  ;;  %3258 = vmatpush1.bf16.msra.mxu1 %v8492_v23  ;;  %v8545_v51 = vld [vmem:[#allocation20 + $0xa4] ss:$16 sps:$4 sm:$0xff]   ;;  %v8566_v29 = vld [vmem:[#allocation20 + $0x10c] ss:$16 sps:$4 sm:$0xff]  }
 0xa07   :  { %v2648_v21 = vpop.f32.mrb[51].mxu0  ;;  %3218 = vmatprep.subr.bf16.mxu0 %v8497_v9  ;;  %3259 = vmatprep.subr.bf16.mxu1 %v8500_v35  ;;  %v8561_v23 = vld [vmem:[#allocation20 + $0x100] ss:$16 sps:$4 sm:$0xff]   ;;  %v8564_v9 = vld [vmem:[#allocation20 + $0x108] ss:$16 sps:$4 sm:$0xff]  }
 0xa08   :  { %v8569_v35 = vld [vmem:[#allocation20 + $0x124] ss:$16 sps:$4 sm:$0xff]   ;;  %v8567_v13 = vld [vmem:[#allocation20 + $0x120] ss:$16 sps:$4 sm:$0xff]   ;;  %v8570_v27 = vld [vmem:[#allocation20 + $0x128] ss:$16 sps:$4 sm:$0xff]  }
 0xa09   :  { %v8573_v21 = vld [vmem:[#allocation20 + $0x140] ss:$16 sps:$4 sm:$0xff]  }
 0xa0a   :  { %3219 = vmatpush1.bf16.msra.mxu0 %v8495_v46  ;;  %3260 = vmatpush1.bf16.msra.mxu1 %v8498_v19  ;;  %v8575_v46 = vld [vmem:[#allocation20 + $0x144] ss:$16 sps:$4 sm:$0xff]   ;;  %v8578_v19 = vld [vmem:[#allocation20 + $0x14c] ss:$16 sps:$4 sm:$0xff]  }
 0xa0b   :  { %3220 = vmatprep.subr.bf16.mxu0 %v8503_v16  ;;  %3261 = vmatprep.subr.bf16.mxu1 %v8506_v39  ;;  %v8576_v16 = vld [vmem:[#allocation20 + $0x148] ss:$16 sps:$4 sm:$0xff]   ;;  %v8581_v39 = vld [vmem:[#allocation20 + $0x164] ss:$16 sps:$4 sm:$0xff]  }
 0xa0e   :  { %3221 = vmatpush1.bf16.msra.mxu0 %v8501_v42  ;;  %3262 = vmatpush1.bf16.msra.mxu1 %v8504_v5  ;;  %v8584_v42 = vld [vmem:[#allocation20 + $0x16c] ss:$16 sps:$4 sm:$0xff]   ;;  %v8579_v5 = vld [vmem:[#allocation20 + $0x160] ss:$16 sps:$4 sm:$0xff]  }
 0xa0f   :  { %3222 = vmatprep.subr.bf16.mxu0 %v8509_v58  ;;  %3263 = vmatprep.subr.bf16.mxu1 %v8512_v62  ;;  %v8582_v58 = vld [vmem:[#allocation20 + $0x168] ss:$16 sps:$4 sm:$0xff]   ;;  %v8587_v62 = vld [vmem:[#allocation20 + $0x184] ss:$16 sps:$4 sm:$0xff]  }
 0xa12   :  { %3223 = vmatpush1.bf16.msra.mxu0 %v8507_v60  ;;  %3264 = vmatpush1.bf16.msra.mxu1 %v8510_v32  ;;  %v8590_v60 = vld [vmem:[#allocation20 + $0x18c] ss:$16 sps:$4 sm:$0xff]   ;;  %v8585_v32 = vld [vmem:[#allocation20 + $0x180] ss:$16 sps:$4 sm:$0xff]  }
 0xa13   :  { %4118 = vmatprep.subr.bf16.mxu0 %v8515_v44  ;;  %4200 = vmatprep.subr.bf16.mxu1 %v8518_v45  ;;  %v8588_v44 = vld [vmem:[#allocation20 + $0x188] ss:$16 sps:$4 sm:$0xff]   ;;  %v8593_v45 = vld [vmem:[#allocation20 + $0x1a4] ss:$16 sps:$4 sm:$0xff]  }
 0xa15   :  { %3241 = vmatmul.mubr.bf16.vlgmr.msra.gmra.mrb[60].mxu0 %v3015_v59  ;;  %3282 = vmatmul.mubr.bf16.vlgmr.msra.gmra.mrb[60].mxu1 %v3015_v59  ;;  %v8596_v59 = vld [vmem:[#allocation20 + $0x1ac] ss:$16 sps:$4 sm:$0xff]  }
 0xa16   :  { %4119 = vmatpush1.bf16.msra.mxu0 %v8513_v61  ;;  %4201 = vmatpush1.bf16.msra.mxu1 %v8516_v1  ;;  %v8591_v61 = vld [vmem:[#allocation20 + $0x1a0] ss:$16 sps:$4 sm:$0xff]   ;;  %v8594_v1 = vld [vmem:[#allocation20 + $0x1a8] ss:$16 sps:$4 sm:$0xff]  }
 0xa17   :  { %4120 = vmatprep.subr.bf16.mxu0 %v8521_v63  ;;  %4202 = vmatprep.subr.bf16.mxu1 %v8524_v0  ;;  %v8599_v63 = vld [vmem:[#allocation20 + $0x1c4] ss:$16 sps:$4 sm:$0xff]   ;;  %v8602_v0 = vld [vmem:[#allocation20 + $0x1cc] ss:$16 sps:$4 sm:$0xff]  }
 0xa1a   :  { %4121 = vmatpush1.bf16.msra.mxu0 %v8519_v10  ;;  %4203 = vmatpush1.bf16.msra.mxu1 %v8522_v12  ;;  %v8597_v10 = vld [vmem:[#allocation20 + $0x1c0] ss:$16 sps:$4 sm:$0xff]   ;;  %v8600_v12 = vld [vmem:[#allocation20 + $0x1c8] ss:$16 sps:$4 sm:$0xff]  }
 0xa1b   :  { %4122 = vmatprep.subr.bf16.mxu0 %v8527_v14  ;;  %4204 = vmatprep.subr.bf16.mxu1 %v8530_v17  ;;  %v8605_v14 = vld [vmem:[#allocation20 + $0x1e4] ss:$16 sps:$4 sm:$0xff]   ;;  %v8608_v17 = vld [vmem:[#allocation20 + $0x1ec] ss:$16 sps:$4 sm:$0xff]  }
 0xa1e   :  { %4123 = vmatpush1.bf16.msra.mxu0 %v8525_v18  ;;  %4205 = vmatpush1.bf16.msra.mxu1 %v8528_v20  ;;  %v8603_v18 = vld [vmem:[#allocation20 + $0x1e0] ss:$16 sps:$4 sm:$0xff]   ;;  %v8606_v20 = vld [vmem:[#allocation20 + $0x1e8] ss:$16 sps:$4 sm:$0xff]  }
 0xa1f   :  { %4124 = vmatprep.subr.bf16.mxu0 %v8533_v22  ;;  %4206 = vmatprep.subr.bf16.mxu1 %v8536_v24  ;;  %v8611_v22 = vld [vmem:[#allocation20 + $0x204] ss:$16 sps:$4 sm:$0xff]   ;;  %v8614_v24 = vld [vmem:[#allocation20 + $0x20c] ss:$16 sps:$4 sm:$0xff]  }
 0xa22   :  { %4125 = vmatpush1.bf16.msra.mxu0 %v8531_v28  ;;  %4207 = vmatpush1.bf16.msra.mxu1 %v8534_v30 }
 0xa23   :  { %4126 = vmatprep.subr.bf16.mxu0 %v8539_v33  ;;  %4208 = vmatprep.subr.bf16.mxu1 %v8542_v34 }
 0xa24   :  { %v2766_v52 = vpop.f32.mrb[52].mxu0  ;;  %v2725_v36 = vpop.f32.mrb[52].mxu1 }
 0xa25   :  { %v2768_v54 = vpop.f32.mrb[53].mxu0  ;;  %v10880_v40 = vadd.f32 %v2766_v52, %v2725_v36  ;;  %v2727_v43 = vpop.f32.mrb[53].mxu1  ;;  %v11035_v36 = vld [vmem:[#allocation47_spill] sm:$0xff] }
 0xa26   :  { %4127 = vmatpush1.bf16.msra.mxu0 %v8537_v50  ;;  %4209 = vmatpush1.bf16.msra.mxu1 %v8540_v49  ;;  %v2770_v56 = vpop.f32.mrb[54].mxu0  ;;  %v10882_v47 = vadd.f32 %v2768_v54, %v2727_v43  ;;  %v2729_v57 = vpop.f32.mrb[54].mxu1  ;;  %v11036_v43 = vld [vmem:[#allocation45_spill] sm:$0xff] }
 0xa27   :  { %4128 = vmatprep.subr.bf16.mxu0 %v8545_v51  ;;  %4210 = vmatprep.subr.bf16.mxu1 %v8548_v53  ;;  %v2771_v38 = vpop.f32.mrb[55].mxu0  ;;  %v2730_v2 = vpop.f32.mrb[55].mxu1  ;;  %v3294_v56 = vld [vmem:[#allocation18] sm:$0xf] }
 0xa28   :  { %v3299_v38 = vrot.slane %v3294_v56, %v11035_v36  ;;  %v3307_v57 = vrot.slane %v3294_v56, %v11036_v43 }
 0xa2a   :  { %4129 = vmatpush1.bf16.msra.mxu0 %v8543_v26  ;;  %4211 = vmatpush1.bf16.msra.mxu1 %v8546_v55 }
 0xa2b   :  { %4130 = vmatprep.subr.bf16.mxu0 %v8551_v4  ;;  %4212 = vmatprep.subr.bf16.mxu1 %v8554_v6 }
 0xa2e   :  { %4131 = vmatpush1.bf16.msra.mxu0 %v8549_v8  ;;  %4213 = vmatpush1.bf16.msra.mxu1 %v8552_v48 }
 0xa2f   :  { %4132 = vmatprep.subr.bf16.mxu0 %v8557_v31  ;;  %4214 = vmatprep.subr.bf16.mxu1 %v8560_v3 }
 0xa32   :  { %4133 = vmatpush1.bf16.msra.mxu0 %v8555_v37  ;;  %4215 = vmatpush1.bf16.msra.mxu1 %v8558_v25 }
 0xa33   :  { %4134 = vmatprep.subr.bf16.mxu0 %v8563_v7  ;;  %4216 = vmatprep.subr.bf16.mxu1 %v8566_v29 }
 0xa36   :  { %4135 = vmatpush1.bf16.msra.mxu0 %v8561_v23  ;;  %4217 = vmatpush1.bf16.msra.mxu1 %v8564_v9 }
 0xa37   :  { %4136 = vmatprep.subr.bf16.mxu0 %v8569_v35  ;;  %4218 = vmatprep.subr.bf16.mxu1 %v8572_v11 }
 0xa3a   :  { %4137 = vmatpush1.bf16.msra.mxu0 %v8567_v13  ;;  %4219 = vmatpush1.bf16.msra.mxu1 %v8570_v27 }
 0xa3b   :  { %4138 = vmatprep.subr.bf16.mxu0 %v8575_v46  ;;  %4220 = vmatprep.subr.bf16.mxu1 %v8578_v19 }
 0xa3e   :  { %4139 = vmatpush1.bf16.msra.mxu0 %v8573_v21  ;;  %4221 = vmatpush1.bf16.msra.mxu1 %v8576_v16  ;;  %v8609_v16 = vld [vmem:[#allocation20 + $0x200] ss:$16 sps:$4 sm:$0xff]  }
 0xa3f   :  { %4140 = vmatprep.subr.bf16.mxu0 %v8581_v39  ;;  %4222 = vmatprep.subr.bf16.mxu1 %v8584_v42  ;;  %v8612_v39 = vld [vmem:[#allocation20 + $0x208] ss:$16 sps:$4 sm:$0xff]  }
 0xa42   :  { %4141 = vmatpush1.bf16.msra.mxu0 %v8579_v5  ;;  %4223 = vmatpush1.bf16.msra.mxu1 %v8582_v58  ;;  %v8617_v5 = vld [vmem:[#allocation20 + $0x224] ss:$16 sps:$4 sm:$0xff]   ;;  %v8620_v58 = vld [vmem:[#allocation20 + $0x22c] ss:$16 sps:$4 sm:$0xff]  }
 0xa43   :  { %4142 = vmatprep.subr.bf16.mxu0 %v8587_v62  ;;  %4224 = vmatprep.subr.bf16.mxu1 %v8590_v60  ;;  %v8615_v60 = vld [vmem:[#allocation20 + $0x220] ss:$16 sps:$4 sm:$0xff]  }
 0xa46   :  { %4143 = vmatpush1.bf16.msra.mxu0 %v8585_v32  ;;  %4225 = vmatpush1.bf16.msra.mxu1 %v8588_v44  ;;  %v8618_v32 = vld [vmem:[#allocation20 + $0x228] ss:$16 sps:$4 sm:$0xff]   ;;  %v8623_v44 = vld [vmem:[#allocation20 + $0x244] ss:$16 sps:$4 sm:$0xff]  }
 0xa47   :  { %4144 = vmatprep.subr.bf16.mxu0 %v8593_v45  ;;  %4226 = vmatprep.subr.bf16.mxu1 %v8596_v59  ;;  %v8626_v45 = vld [vmem:[#allocation20 + $0x24c] ss:$16 sps:$4 sm:$0xff]   ;;  %v8621_v59 = vld [vmem:[#allocation20 + $0x240] ss:$16 sps:$4 sm:$0xff]  }
 0xa4a   :  { %4145 = vmatpush1.bf16.msra.mxu0 %v8591_v61  ;;  %4227 = vmatpush1.bf16.msra.mxu1 %v8594_v1  ;;  %v8624_v61 = vld [vmem:[#allocation20 + $0x248] ss:$16 sps:$4 sm:$0xff]   ;;  %v8629_v1 = vld [vmem:[#allocation20 + $0x264] ss:$16 sps:$4 sm:$0xff]  }
 0xa4b   :  { %4146 = vmatprep.subr.bf16.mxu0 %v8599_v63  ;;  %4228 = vmatprep.subr.bf16.mxu1 %v8602_v0  ;;  %v8632_v63 = vld [vmem:[#allocation20 + $0x26c] ss:$16 sps:$4 sm:$0xff]   ;;  %v8627_v0 = vld [vmem:[#allocation20 + $0x260] ss:$16 sps:$4 sm:$0xff]  }
 0xa4e   :  { %4147 = vmatpush1.bf16.msra.mxu0 %v8597_v10  ;;  %4229 = vmatpush1.bf16.msra.mxu1 %v8600_v12  ;;  %v8630_v10 = vld [vmem:[#allocation20 + $0x268] ss:$16 sps:$4 sm:$0xff]   ;;  %v8635_v12 = vld [vmem:[#allocation20 + $0x284] ss:$16 sps:$4 sm:$0xff]  }
 0xa4f   :  { %4148 = vmatprep.subr.bf16.mxu0 %v8605_v14  ;;  %4230 = vmatprep.subr.bf16.mxu1 %v8608_v17  ;;  %v8638_v14 = vld [vmem:[#allocation20 + $0x28c] ss:$16 sps:$4 sm:$0xff]   ;;  %v8633_v17 = vld [vmem:[#allocation20 + $0x280] ss:$16 sps:$4 sm:$0xff]  }
 0xa52   :  { %4149 = vmatpush1.bf16.msra.mxu0 %v8603_v18  ;;  %4231 = vmatpush1.bf16.msra.mxu1 %v8606_v20  ;;  %v8636_v18 = vld [vmem:[#allocation20 + $0x288] ss:$16 sps:$4 sm:$0xff]   ;;  %v8641_v20 = vld [vmem:[#allocation20 + $0x2a4] ss:$16 sps:$4 sm:$0xff]  }
 0xa53   :  { %4159 = vmatprep.subr.bf16.mxu0 %v8611_v22  ;;  %4241 = vmatprep.subr.bf16.mxu1 %v8614_v24  ;;  %v8644_v22 = vld [vmem:[#allocation20 + $0x2ac] ss:$16 sps:$4 sm:$0xff]   ;;  %v8639_v24 = vld [vmem:[#allocation20 + $0x2a0] ss:$16 sps:$4 sm:$0xff]  }
 0xac8   :  { %v2967_v28 = vpop.f32.mrb[56].mxu0  ;;  %v3008_v30 = vpop.f32.mrb[56].mxu1 }
 0xac9   :  { %v2968_v33 = vadd.f32 %v2967_v28, %v10876_v15  ;;  %v3009_v34 = vadd.f32 %v3008_v30, %v10880_v40  ;;  %v2969_v50 = vpop.f32.mrb[57].mxu0  ;;  %v3010_v49 = vpop.f32.mrb[57].mxu1  ;;  %v11037_v15 = vld [vmem:[#allocation48_spill] sm:$0xff]  ;;  %v11038_v40 = vld [vmem:[#allocation46_spill] sm:$0xff] }
 0xaca   :  { %v2970_v51 = vadd.f32 %v2969_v50, %v10878_v41  ;;  %v3011_v53 = vadd.f32 %v3010_v49, %v10882_v47  ;;  %v2971_v52 = vpop.f32.mrb[58].mxu0  ;;  %v3012_v54 = vpop.f32.mrb[58].mxu1  ;;  %v3303_v6 = vrot.slane %v3294_v56, %v11037_v15  ;;  %v3311_v8 = vrot.slane %v3294_v56, %v11038_v40  ;;  %v8642_v28 = vld [vmem:[#allocation20 + $0x2a8] ss:$16 sps:$4 sm:$0xff]   ;;  %v8647_v30 = vld [vmem:[#allocation20 + $0x2c4] ss:$16 sps:$4 sm:$0xff]  }
 0xacb   :  { %v2972_v26 = vpop.f32.mrb[59].mxu0  ;;  %v3013_v55 = vpop.f32.mrb[59].mxu1  ;;  %v8648_v50 = vld [vmem:[#allocation20 + $0x2c8] ss:$16 sps:$4 sm:$0xff]   ;;  %v8653_v49 = vld [vmem:[#allocation20 + $0x2e4] ss:$16 sps:$4 sm:$0xff]  }
 0xacc   :  { %v8654_v52 = vld [vmem:[#allocation20 + $0x2e8] ss:$16 sps:$4 sm:$0xff]   ;;  %v8659_v54 = vld [vmem:[#allocation20 + $0x304] ss:$16 sps:$4 sm:$0xff]   ;;  %v8662_v26 = vld [vmem:[#allocation20 + $0x30c] ss:$16 sps:$4 sm:$0xff]  }
 0xacd   :  { %v8657_v55 = vld [vmem:[#allocation20 + $0x300] ss:$16 sps:$4 sm:$0xff]   ;;  %v8660_v56 = vld [vmem:[#allocation20 + $0x308] ss:$16 sps:$4 sm:$0xff]  }
 0xae8   :  { %v3242_v2 = vpop.f32.mrb[60].mxu0  ;;  %v3283_v4 = vpop.f32.mrb[60].mxu1 }
 0xae9   :  { %v3290_v48 = vadd.f32 %v3242_v2, %v2968_v33  ;;  %v3292_v37 = vadd.f32 %v3283_v4, %v3009_v34  ;;  %v3244_v41 = vpop.f32.mrb[61].mxu0  ;;  %v3285_v31 = vpop.f32.mrb[61].mxu1  ;;  %v8650_v33 = vld [vmem:[#allocation20 + $0x2cc] ss:$16 sps:$4 sm:$0xff]   ;;  %v8645_v34 = vld [vmem:[#allocation20 + $0x2c0] ss:$16 sps:$4 sm:$0xff]  }
 0xaea   :  { %v3291_v47 = vadd.f32 %v3244_v41, %v2970_v51  ;;  %v3293_v25 = vadd.f32 %v3285_v31, %v3011_v53  ;;  %v3246_v3 = vpop.f32.mrb[62].mxu0  ;;  %v3287_v7 = vpop.f32.mrb[62].mxu1  ;;  %v8656_v51 = vld [vmem:[#allocation20 + $0x2ec] ss:$16 sps:$4 sm:$0xff]   ;;  %v8651_v53 = vld [vmem:[#allocation20 + $0x2e0] ss:$16 sps:$4 sm:$0xff]  }
 0xaeb   :  { %v3316_v29 = vadd.f32 %v3299_v38, %v3290_v48  ;;  %v10892_v23 = vadd.f32 %v3307_v57, %v3292_v37  ;;  %v3247_v9 = vpop.f32.mrb[63].mxu0  ;;  %v3288_v35 = vpop.f32.mrb[63].mxu1  ;;  %v8665_v38 = vld [vmem:[#allocation20 + $0x324] ss:$16 sps:$4 sm:$0xff]   ;;  %v8668_v57 = vld [vmem:[#allocation20 + $0x32c] ss:$16 sps:$4 sm:$0xff]  }
 0xaec   :  { %v3317_v11 = vadd.f32 %v3303_v6, %v3291_v47  ;;  %v3319_v13 = vadd.f32 %v3311_v8, %v3293_v25  ;;  %v8663_v2 = vld [vmem:[#allocation20 + $0x320] ss:$16 sps:$4 sm:$0xff]   ;;  %v8666_v4 = vld [vmem:[#allocation20 + $0x328] ss:$16 sps:$4 sm:$0xff]   ;;  %v8671_v6 = vld [vmem:[#allocation20 + $0x344] ss:$16 sps:$4 sm:$0xff]  }
 0xaed   :  { %v3320_v27 = vmax.f32 %v3316_v29, 0.0  ;;  %v8674_v8 = vld [vmem:[#allocation20 + $0x34c] ss:$16 sps:$4 sm:$0xff]   ;;  %v8669_v48 = vld [vmem:[#allocation20 + $0x340] ss:$16 sps:$4 sm:$0xff]  }
 0xaee   :  { %v3321_v46 = vmax.f32 %v3317_v11, 0.0  ;;  %v3323_v19 = vmax.f32 %v3319_v13, 0.0  ;;  %v8672_v37 = vld [vmem:[#allocation20 + $0x348] ss:$16 sps:$4 sm:$0xff]   ;;  %v8677_v41 = vld [vmem:[#allocation20 + $0x364] ss:$16 sps:$4 sm:$0xff]  }
 0xaef   :  { %v3324_v42 = vpack.c.bf16 %v3320_v27, %v3320_v27  ;;  %v8680_v31 = vld [vmem:[#allocation20 + $0x36c] ss:$16 sps:$4 sm:$0xff]   ;;  %v8675_v47 = vld [vmem:[#allocation20 + $0x360] ss:$16 sps:$4 sm:$0xff]   ;;  %v8678_v25 = vld [vmem:[#allocation20 + $0x368] ss:$16 sps:$4 sm:$0xff]  }
 0xaf0   :  { %v3325_v21 = vpack.c.bf16 %v3321_v46, %v3321_v46  ;;  %v3327_v62 = vpack.c.bf16 %v3323_v19, %v3323_v19  ;;  %v8683_v3 = vld [vmem:[#allocation20 + $0x384] ss:$16 sps:$4 sm:$0xff]   ;;  %v8686_v7 = vld [vmem:[#allocation20 + $0x38c] ss:$16 sps:$4 sm:$0xff]   ;;  %v8681_v29 = vld [vmem:[#allocation20 + $0x380] ss:$16 sps:$4 sm:$0xff]  }
 0xaf1   :  { %v8684_v9 = vld [vmem:[#allocation20 + $0x388] ss:$16 sps:$4 sm:$0xff]   ;;  %v8689_v35 = vld [vmem:[#allocation20 + $0x3a4] ss:$16 sps:$4 sm:$0xff]   ;;  %v8692_v11 = vld [vmem:[#allocation20 + $0x3ac] ss:$16 sps:$4 sm:$0xff]  }
 0xaf2   :  { %4150 = vmatprep.mubr.bf16.mxu0 %v3325_v21  ;;  %4232 = vmatprep.mubr.bf16.mxu1 %v3325_v21  ;;  %v8687_v13 = vld [vmem:[#allocation20 + $0x3a0] ss:$16 sps:$4 sm:$0xff]   ;;  %v8690_v27 = vld [vmem:[#allocation20 + $0x3a8] ss:$16 sps:$4 sm:$0xff]   ;;  %v8695_v46 = vld [vmem:[#allocation20 + $0x3c4] ss:$16 sps:$4 sm:$0xff]  }
 0xaf3   :  { %4151 = vmatmul.mubr.bf16.vlgmr.msra.gmra.mrb[64].mxu0 %v3324_v42  ;;  %4233 = vmatmul.mubr.bf16.vlgmr.msra.gmra.mrb[64].mxu1 %v3324_v42  ;;  %v8698_v19 = vld [vmem:[#allocation20 + $0x3cc] ss:$16 sps:$4 sm:$0xff]   ;;  %v8693_v21 = vld [vmem:[#allocation20 + $0x3c0] ss:$16 sps:$4 sm:$0xff]  }
 0xaf4   :  { %4160 = vmatpush1.bf16.msra.mxu0 %v8609_v16  ;;  %4242 = vmatpush1.bf16.msra.mxu1 %v8612_v39  ;;  %v8696_v16 = vld [vmem:[#allocation20 + $0x3c8] ss:$16 sps:$4 sm:$0xff]   ;;  %v8701_v39 = vld [vmem:[#allocation20 + $0x3e4] ss:$16 sps:$4 sm:$0xff]   ;;  %v8704_v42 = vld [vmem:[#allocation20 + $0x3ec] ss:$16 sps:$4 sm:$0xff]  }
 0xaf5   :  { %4191 = vmatprep.mubr.bf16.mxu0 %v3327_v62  ;;  %4273 = vmatprep.mubr.bf16.mxu1 %v3327_v62  ;;  %v3322_v62 = vmax.f32 %v10892_v23, 0.0  ;;  %v8719_v23 = vld [vmem:[#allocation23 + $0x44] ss:$16 sps:$4 sm:$0xff]  }
 0xaf6   :  { %4161 = vmatprep.subr.bf16.mxu0 %v8617_v5  ;;  %4243 = vmatprep.subr.bf16.mxu1 %v8620_v58  ;;  %v8699_v5 = vld [vmem:[#allocation20 + $0x3e0] ss:$16 sps:$4 sm:$0xff]   ;;  %v8702_v58 = vld [vmem:[#allocation20 + $0x3e8] ss:$16 sps:$4 sm:$0xff]  }
 0xaf8   :  { %4162 = vmatpush1.bf16.msra.mxu0 %v8615_v60  ;;  %4244 = vmatpush1.bf16.msra.mxu1 %v8618_v32  ;;  %v8707_v60 = vld [vmem:[#allocation23 + $0x4] ss:$16 sps:$4 sm:$0xff]   ;;  %v8710_v32 = vld [vmem:[#allocation23 + $0xc] ss:$16 sps:$4 sm:$0xff]  }
 0xaf9   :  { %4163 = vmatprep.subr.bf16.mxu0 %v8623_v44  ;;  %4245 = vmatprep.subr.bf16.mxu1 %v8626_v45  ;;  %v8705_v44 = vld [vmem:[#allocation23] ss:$16 sps:$4 sm:$0xff]   ;;  %v8708_v45 = vld [vmem:[#allocation23 + $0x8] ss:$16 sps:$4 sm:$0xff]  }
 0xafc   :  { %4164 = vmatpush1.bf16.msra.mxu0 %v8621_v59  ;;  %4246 = vmatpush1.bf16.msra.mxu1 %v8624_v61  ;;  %v3326_v59 = vpack.c.bf16 %v3322_v62, %v3322_v62  ;;  %v8713_v61 = vld [vmem:[#allocation23 + $0x24] ss:$16 sps:$4 sm:$0xff]   ;;  %v8789_v62 = vld [vmem:[#allocation23 + $0x1c0] ss:$16 sps:$4 sm:$0xff]  }
 0xafd   :  { %4165 = vmatprep.subr.bf16.mxu0 %v8629_v1  ;;  %4247 = vmatprep.subr.bf16.mxu1 %v8632_v63  ;;  %v8716_v1 = vld [vmem:[#allocation23 + $0x2c] ss:$16 sps:$4 sm:$0xff]   ;;  %v8711_v63 = vld [vmem:[#allocation23 + $0x20] ss:$16 sps:$4 sm:$0xff]  }
 0xb00   :  { %4166 = vmatpush1.bf16.msra.mxu0 %v8627_v0  ;;  %4248 = vmatpush1.bf16.msra.mxu1 %v8630_v10  ;;  %v8714_v0 = vld [vmem:[#allocation23 + $0x28] ss:$16 sps:$4 sm:$0xff]   ;;  %v8722_v10 = vld [vmem:[#allocation23 + $0x4c] ss:$16 sps:$4 sm:$0xff]  }
 0xb01   :  { %4167 = vmatprep.subr.bf16.mxu0 %v8635_v12  ;;  %4249 = vmatprep.subr.bf16.mxu1 %v8638_v14  ;;  %v8717_v12 = vld [vmem:[#allocation23 + $0x40] ss:$16 sps:$4 sm:$0xff]   ;;  %v8720_v14 = vld [vmem:[#allocation23 + $0x48] ss:$16 sps:$4 sm:$0xff]  }
 0xb04   :  { %4168 = vmatpush1.bf16.msra.mxu0 %v8633_v17  ;;  %4250 = vmatpush1.bf16.msra.mxu1 %v8636_v18  ;;  %v8725_v17 = vld [vmem:[#allocation23 + $0x64] ss:$16 sps:$4 sm:$0xff]   ;;  %v8728_v18 = vld [vmem:[#allocation23 + $0x6c] ss:$16 sps:$4 sm:$0xff]  }
 0xb05   :  { %4169 = vmatprep.subr.bf16.mxu0 %v8641_v20  ;;  %4251 = vmatprep.subr.bf16.mxu1 %v8644_v22  ;;  %v8723_v20 = vld [vmem:[#allocation23 + $0x60] ss:$16 sps:$4 sm:$0xff]   ;;  %v8726_v22 = vld [vmem:[#allocation23 + $0x68] ss:$16 sps:$4 sm:$0xff]  }
 0xb08   :  { %4170 = vmatpush1.bf16.msra.mxu0 %v8639_v24  ;;  %4252 = vmatpush1.bf16.msra.mxu1 %v8642_v28  ;;  %v8731_v24 = vld [vmem:[#allocation23 + $0x84] ss:$16 sps:$4 sm:$0xff]   ;;  %v8734_v28 = vld [vmem:[#allocation23 + $0x8c] ss:$16 sps:$4 sm:$0xff]  }
 0xb09   :  { %4171 = vmatprep.subr.bf16.mxu0 %v8647_v30  ;;  %4253 = vmatprep.subr.bf16.mxu1 %v8650_v33  ;;  %v8729_v30 = vld [vmem:[#allocation23 + $0x80] ss:$16 sps:$4 sm:$0xff]   ;;  %v8732_v33 = vld [vmem:[#allocation23 + $0x88] ss:$16 sps:$4 sm:$0xff]  }
 0xb0c   :  { %4172 = vmatpush1.bf16.msra.mxu0 %v8645_v34  ;;  %4254 = vmatpush1.bf16.msra.mxu1 %v8648_v50  ;;  %v8737_v34 = vld [vmem:[#allocation23 + $0xa4] ss:$16 sps:$4 sm:$0xff]   ;;  %v8740_v50 = vld [vmem:[#allocation23 + $0xac] ss:$16 sps:$4 sm:$0xff]  }
 0xb0d   :  { %4173 = vmatprep.subr.bf16.mxu0 %v8653_v49  ;;  %4255 = vmatprep.subr.bf16.mxu1 %v8656_v51  ;;  %v8735_v49 = vld [vmem:[#allocation23 + $0xa0] ss:$16 sps:$4 sm:$0xff]   ;;  %v8738_v51 = vld [vmem:[#allocation23 + $0xa8] ss:$16 sps:$4 sm:$0xff]  }
 0xb10   :  { %4174 = vmatpush1.bf16.msra.mxu0 %v8651_v53  ;;  %4256 = vmatpush1.bf16.msra.mxu1 %v8654_v52  ;;  %v8743_v53 = vld [vmem:[#allocation23 + $0xc4] ss:$16 sps:$4 sm:$0xff]   ;;  %v8746_v52 = vld [vmem:[#allocation23 + $0xcc] ss:$16 sps:$4 sm:$0xff]  }
 0xb11   :  { %4175 = vmatprep.subr.bf16.mxu0 %v8659_v54  ;;  %4257 = vmatprep.subr.bf16.mxu1 %v8662_v26  ;;  %v8741_v54 = vld [vmem:[#allocation23 + $0xc0] ss:$16 sps:$4 sm:$0xff]   ;;  %v8744_v26 = vld [vmem:[#allocation23 + $0xc8] ss:$16 sps:$4 sm:$0xff]  }
 0xb14   :  { %4176 = vmatpush1.bf16.msra.mxu0 %v8657_v55  ;;  %4258 = vmatpush1.bf16.msra.mxu1 %v8660_v56  ;;  %v8749_v55 = vld [vmem:[#allocation23 + $0xe4] ss:$16 sps:$4 sm:$0xff]   ;;  %v8752_v56 = vld [vmem:[#allocation23 + $0xec] ss:$16 sps:$4 sm:$0xff]  }
 0xb15   :  { %4177 = vmatprep.subr.bf16.mxu0 %v8665_v38  ;;  %4259 = vmatprep.subr.bf16.mxu1 %v8668_v57  ;;  %v8747_v38 = vld [vmem:[#allocation23 + $0xe0] ss:$16 sps:$4 sm:$0xff]   ;;  %v8750_v57 = vld [vmem:[#allocation23 + $0xe8] ss:$16 sps:$4 sm:$0xff]  }
 0xb18   :  { %4178 = vmatpush1.bf16.msra.mxu0 %v8663_v2  ;;  %4260 = vmatpush1.bf16.msra.mxu1 %v8666_v4  ;;  %v8755_v2 = vld [vmem:[#allocation23 + $0x104] ss:$16 sps:$4 sm:$0xff]   ;;  %v8758_v4 = vld [vmem:[#allocation23 + $0x10c] ss:$16 sps:$4 sm:$0xff]  }
 0xb19   :  { %4179 = vmatprep.subr.bf16.mxu0 %v8671_v6  ;;  %4261 = vmatprep.subr.bf16.mxu1 %v8674_v8  ;;  %v8753_v6 = vld [vmem:[#allocation23 + $0x100] ss:$16 sps:$4 sm:$0xff]   ;;  %v8756_v8 = vld [vmem:[#allocation23 + $0x108] ss:$16 sps:$4 sm:$0xff]  }
 0xb1c   :  { %4180 = vmatpush1.bf16.msra.mxu0 %v8669_v48  ;;  %4262 = vmatpush1.bf16.msra.mxu1 %v8672_v37  ;;  %v8761_v48 = vld [vmem:[#allocation23 + $0x124] ss:$16 sps:$4 sm:$0xff]   ;;  %v8764_v37 = vld [vmem:[#allocation23 + $0x12c] ss:$16 sps:$4 sm:$0xff]  }
 0xb1d   :  { %4181 = vmatprep.subr.bf16.mxu0 %v8677_v41  ;;  %4263 = vmatprep.subr.bf16.mxu1 %v8680_v31  ;;  %v8759_v41 = vld [vmem:[#allocation23 + $0x120] ss:$16 sps:$4 sm:$0xff]   ;;  %v8762_v31 = vld [vmem:[#allocation23 + $0x128] ss:$16 sps:$4 sm:$0xff]  }
 0xb20   :  { %4182 = vmatpush1.bf16.msra.mxu0 %v8675_v47  ;;  %4264 = vmatpush1.bf16.msra.mxu1 %v8678_v25  ;;  %v8767_v47 = vld [vmem:[#allocation23 + $0x144] ss:$16 sps:$4 sm:$0xff]   ;;  %v8770_v25 = vld [vmem:[#allocation23 + $0x14c] ss:$16 sps:$4 sm:$0xff]  }
 0xb21   :  { %4183 = vmatprep.subr.bf16.mxu0 %v8683_v3  ;;  %4265 = vmatprep.subr.bf16.mxu1 %v8686_v7  ;;  %v8765_v3 = vld [vmem:[#allocation23 + $0x140] ss:$16 sps:$4 sm:$0xff]   ;;  %v8768_v7 = vld [vmem:[#allocation23 + $0x148] ss:$16 sps:$4 sm:$0xff]  }
 0xb24   :  { %4184 = vmatpush1.bf16.msra.mxu0 %v8681_v29  ;;  %4266 = vmatpush1.bf16.msra.mxu1 %v8684_v9  ;;  %v8773_v29 = vld [vmem:[#allocation23 + $0x164] ss:$16 sps:$4 sm:$0xff]   ;;  %v8776_v9 = vld [vmem:[#allocation23 + $0x16c] ss:$16 sps:$4 sm:$0xff]  }
 0xb25   :  { %4185 = vmatprep.subr.bf16.mxu0 %v8689_v35  ;;  %4267 = vmatprep.subr.bf16.mxu1 %v8692_v11  ;;  %v8771_v35 = vld [vmem:[#allocation23 + $0x160] ss:$16 sps:$4 sm:$0xff]   ;;  %v8774_v11 = vld [vmem:[#allocation23 + $0x168] ss:$16 sps:$4 sm:$0xff]  }
 0xb28   :  { %4186 = vmatpush1.bf16.msra.mxu0 %v8687_v13  ;;  %4268 = vmatpush1.bf16.msra.mxu1 %v8690_v27  ;;  %v8779_v13 = vld [vmem:[#allocation23 + $0x184] ss:$16 sps:$4 sm:$0xff]   ;;  %v8782_v27 = vld [vmem:[#allocation23 + $0x18c] ss:$16 sps:$4 sm:$0xff]  }
 0xb29   :  { %4187 = vmatprep.subr.bf16.mxu0 %v8695_v46  ;;  %4269 = vmatprep.subr.bf16.mxu1 %v8698_v19  ;;  %v8777_v46 = vld [vmem:[#allocation23 + $0x180] ss:$16 sps:$4 sm:$0xff]   ;;  %v8780_v19 = vld [vmem:[#allocation23 + $0x188] ss:$16 sps:$4 sm:$0xff]  }
 0xb2c   :  { %4188 = vmatpush1.bf16.msra.mxu0 %v8693_v21  ;;  %4270 = vmatpush1.bf16.msra.mxu1 %v8696_v16  ;;  %v8785_v21 = vld [vmem:[#allocation23 + $0x1a4] ss:$16 sps:$4 sm:$0xff]   ;;  %v8788_v16 = vld [vmem:[#allocation23 + $0x1ac] ss:$16 sps:$4 sm:$0xff]  }
 0xb2d   :  { %4189 = vmatprep.subr.bf16.mxu0 %v8701_v39  ;;  %4271 = vmatprep.subr.bf16.mxu1 %v8704_v42  ;;  %v8783_v39 = vld [vmem:[#allocation23 + $0x1a0] ss:$16 sps:$4 sm:$0xff]   ;;  %v8786_v42 = vld [vmem:[#allocation23 + $0x1a8] ss:$16 sps:$4 sm:$0xff]  }
 0xb30   :  { %4190 = vmatpush1.bf16.msra.mxu0 %v8699_v5  ;;  %4272 = vmatpush1.bf16.msra.mxu1 %v8702_v58  ;;  %v8791_v5 = vld [vmem:[#allocation23 + $0x1c4] ss:$16 sps:$4 sm:$0xff]   ;;  %v8794_v58 = vld [vmem:[#allocation23 + $0x1cc] ss:$16 sps:$4 sm:$0xff]  }
 0xb31   :  { %5080 = vmatprep.subr.bf16.mxu0 %v8707_v60  ;;  %5162 = vmatprep.subr.bf16.mxu1 %v8710_v32  ;;  %v8792_v60 = vld [vmem:[#allocation23 + $0x1c8] ss:$16 sps:$4 sm:$0xff]   ;;  %v8797_v32 = vld [vmem:[#allocation23 + $0x1e4] ss:$16 sps:$4 sm:$0xff]  }
 0xb33   :  { %4192 = vmatmul.mubr.bf16.vlgmr.msra.gmra.mrb[64].mxu0 %v3326_v59  ;;  %4274 = vmatmul.mubr.bf16.vlgmr.msra.gmra.mrb[64].mxu1 %v3326_v59  ;;  %v8798_v59 = vld [vmem:[#allocation23 + $0x1e8] ss:$16 sps:$4 sm:$0xff]  }
 0xb34   :  { %5081 = vmatpush1.bf16.msra.mxu0 %v8705_v44  ;;  %5163 = vmatpush1.bf16.msra.mxu1 %v8708_v45  ;;  %v8800_v44 = vld [vmem:[#allocation23 + $0x1ec] ss:$16 sps:$4 sm:$0xff]   ;;  %v8795_v45 = vld [vmem:[#allocation23 + $0x1e0] ss:$16 sps:$4 sm:$0xff]  }
 0xb35   :  { %5082 = vmatprep.subr.bf16.mxu0 %v8713_v61  ;;  %5164 = vmatprep.subr.bf16.mxu1 %v8716_v1  ;;  %v8803_v61 = vld [vmem:[#allocation23 + $0x204] ss:$16 sps:$4 sm:$0xff]   ;;  %v8806_v1 = vld [vmem:[#allocation23 + $0x20c] ss:$16 sps:$4 sm:$0xff]  }
 0xb38   :  { %5083 = vmatpush1.bf16.msra.mxu0 %v8711_v63  ;;  %5165 = vmatpush1.bf16.msra.mxu1 %v8714_v0  ;;  %v10895_v63 = vld [vmem:[#allocation21] sm:$0xf] }
 0xb39   :  { %5084 = vmatprep.subr.bf16.mxu0 %v8719_v23  ;;  %5166 = vmatprep.subr.bf16.mxu1 %v8722_v10  ;;  %v3461_v0 = vrot.slane %v10895_v63, %v11035_v36  ;;  %v3465_v23 = vrot.slane %v10895_v63, %v11037_v15  ;;  %v3473_v10 = vrot.slane %v10895_v63, %v11038_v40 }
 0xb3c   :  { %5085 = vmatpush1.bf16.msra.mxu0 %v8717_v12  ;;  %5167 = vmatpush1.bf16.msra.mxu1 %v8720_v14 }
 0xb3d   :  { %5086 = vmatprep.subr.bf16.mxu0 %v8725_v17  ;;  %5168 = vmatprep.subr.bf16.mxu1 %v8728_v18 }
 0xb40   :  { %5087 = vmatpush1.bf16.msra.mxu0 %v8723_v20  ;;  %5169 = vmatpush1.bf16.msra.mxu1 %v8726_v22 }
 0xb41   :  { %5088 = vmatprep.subr.bf16.mxu0 %v8731_v24  ;;  %5170 = vmatprep.subr.bf16.mxu1 %v8734_v28 }
 0xb44   :  { %5089 = vmatpush1.bf16.msra.mxu0 %v8729_v30  ;;  %5171 = vmatpush1.bf16.msra.mxu1 %v8732_v33 }
 0xb45   :  { %5090 = vmatprep.subr.bf16.mxu0 %v8737_v34  ;;  %5172 = vmatprep.subr.bf16.mxu1 %v8740_v50 }
 0xb48   :  { %5091 = vmatpush1.bf16.msra.mxu0 %v8735_v49  ;;  %5173 = vmatpush1.bf16.msra.mxu1 %v8738_v51 }
 0xb49   :  { %5092 = vmatprep.subr.bf16.mxu0 %v8743_v53  ;;  %5174 = vmatprep.subr.bf16.mxu1 %v8746_v52  ;;  %v8801_v52 = vld [vmem:[#allocation23 + $0x200] ss:$16 sps:$4 sm:$0xff]  }
 0xb4c   :  { %5093 = vmatpush1.bf16.msra.mxu0 %v8741_v54  ;;  %5175 = vmatpush1.bf16.msra.mxu1 %v8744_v26  ;;  %v8804_v54 = vld [vmem:[#allocation23 + $0x208] ss:$16 sps:$4 sm:$0xff]  }
 0xb4d   :  { %5094 = vmatprep.subr.bf16.mxu0 %v8749_v55  ;;  %5176 = vmatprep.subr.bf16.mxu1 %v8752_v56  ;;  %v8809_v55 = vld [vmem:[#allocation23 + $0x224] ss:$16 sps:$4 sm:$0xff]   ;;  %v8812_v56 = vld [vmem:[#allocation23 + $0x22c] ss:$16 sps:$4 sm:$0xff]  }
 0xb50   :  { %5095 = vmatpush1.bf16.msra.mxu0 %v8747_v38  ;;  %5177 = vmatpush1.bf16.msra.mxu1 %v8750_v57  ;;  %v8807_v57 = vld [vmem:[#allocation23 + $0x220] ss:$16 sps:$4 sm:$0xff]  }
 0xb51   :  { %5096 = vmatprep.subr.bf16.mxu0 %v8755_v2  ;;  %5178 = vmatprep.subr.bf16.mxu1 %v8758_v4  ;;  %v8810_v2 = vld [vmem:[#allocation23 + $0x228] ss:$16 sps:$4 sm:$0xff]   ;;  %v8815_v4 = vld [vmem:[#allocation23 + $0x244] ss:$16 sps:$4 sm:$0xff]  }
 0xb54   :  { %5097 = vmatpush1.bf16.msra.mxu0 %v8753_v6  ;;  %5179 = vmatpush1.bf16.msra.mxu1 %v8756_v8  ;;  %v8818_v6 = vld [vmem:[#allocation23 + $0x24c] ss:$16 sps:$4 sm:$0xff]   ;;  %v8813_v8 = vld [vmem:[#allocation23 + $0x240] ss:$16 sps:$4 sm:$0xff]  }
 0xb55   :  { %5098 = vmatprep.subr.bf16.mxu0 %v8761_v48  ;;  %5180 = vmatprep.subr.bf16.mxu1 %v8764_v37  ;;  %v8816_v48 = vld [vmem:[#allocation23 + $0x248] ss:$16 sps:$4 sm:$0xff]   ;;  %v8821_v37 = vld [vmem:[#allocation23 + $0x264] ss:$16 sps:$4 sm:$0xff]  }
 0xb58   :  { %5099 = vmatpush1.bf16.msra.mxu0 %v8759_v41  ;;  %5181 = vmatpush1.bf16.msra.mxu1 %v8762_v31  ;;  %v8824_v41 = vld [vmem:[#allocation23 + $0x26c] ss:$16 sps:$4 sm:$0xff]   ;;  %v8819_v31 = vld [vmem:[#allocation23 + $0x260] ss:$16 sps:$4 sm:$0xff]  }
 0xb59   :  { %5100 = vmatprep.subr.bf16.mxu0 %v8767_v47  ;;  %5182 = vmatprep.subr.bf16.mxu1 %v8770_v25  ;;  %v8822_v47 = vld [vmem:[#allocation23 + $0x268] ss:$16 sps:$4 sm:$0xff]   ;;  %v8827_v25 = vld [vmem:[#allocation23 + $0x284] ss:$16 sps:$4 sm:$0xff]  }
 0xb5c   :  { %5101 = vmatpush1.bf16.msra.mxu0 %v8765_v3  ;;  %5183 = vmatpush1.bf16.msra.mxu1 %v8768_v7  ;;  %v8830_v3 = vld [vmem:[#allocation23 + $0x28c] ss:$16 sps:$4 sm:$0xff]   ;;  %v8825_v7 = vld [vmem:[#allocation23 + $0x280] ss:$16 sps:$4 sm:$0xff]  }
 0xb5d   :  { %5102 = vmatprep.subr.bf16.mxu0 %v8773_v29  ;;  %5184 = vmatprep.subr.bf16.mxu1 %v8776_v9  ;;  %v8828_v29 = vld [vmem:[#allocation23 + $0x288] ss:$16 sps:$4 sm:$0xff]   ;;  %v8833_v9 = vld [vmem:[#allocation23 + $0x2a4] ss:$16 sps:$4 sm:$0xff]  }
 0xb60   :  { %5103 = vmatpush1.bf16.msra.mxu0 %v8771_v35  ;;  %5185 = vmatpush1.bf16.msra.mxu1 %v8774_v11  ;;  %v8836_v35 = vld [vmem:[#allocation23 + $0x2ac] ss:$16 sps:$4 sm:$0xff]   ;;  %v8831_v11 = vld [vmem:[#allocation23 + $0x2a0] ss:$16 sps:$4 sm:$0xff]  }
 0xb61   :  { %5104 = vmatprep.subr.bf16.mxu0 %v8779_v13  ;;  %5186 = vmatprep.subr.bf16.mxu1 %v8782_v27  ;;  %v8834_v13 = vld [vmem:[#allocation23 + $0x2a8] ss:$16 sps:$4 sm:$0xff]   ;;  %v8839_v27 = vld [vmem:[#allocation23 + $0x2c4] ss:$16 sps:$4 sm:$0xff]  }
 0xb64   :  { %5105 = vmatpush1.bf16.msra.mxu0 %v8777_v46  ;;  %5187 = vmatpush1.bf16.msra.mxu1 %v8780_v19  ;;  %v8842_v46 = vld [vmem:[#allocation23 + $0x2cc] ss:$16 sps:$4 sm:$0xff]   ;;  %v8837_v19 = vld [vmem:[#allocation23 + $0x2c0] ss:$16 sps:$4 sm:$0xff]  }
 0xb65   :  { %5106 = vmatprep.subr.bf16.mxu0 %v8785_v21  ;;  %5188 = vmatprep.subr.bf16.mxu1 %v8788_v16  ;;  %v8840_v21 = vld [vmem:[#allocation23 + $0x2c8] ss:$16 sps:$4 sm:$0xff]   ;;  %v8845_v16 = vld [vmem:[#allocation23 + $0x2e4] ss:$16 sps:$4 sm:$0xff]  }
 0xb68   :  { %5107 = vmatpush1.bf16.msra.mxu0 %v8783_v39  ;;  %5189 = vmatpush1.bf16.msra.mxu1 %v8786_v42  ;;  %v8848_v39 = vld [vmem:[#allocation23 + $0x2ec] ss:$16 sps:$4 sm:$0xff]   ;;  %v8843_v42 = vld [vmem:[#allocation23 + $0x2e0] ss:$16 sps:$4 sm:$0xff]  }
 0xb69   :  { %5108 = vmatprep.subr.bf16.mxu0 %v8791_v5  ;;  %5190 = vmatprep.subr.bf16.mxu1 %v8794_v58  ;;  %v8846_v5 = vld [vmem:[#allocation23 + $0x2e8] ss:$16 sps:$4 sm:$0xff]   ;;  %v8851_v58 = vld [vmem:[#allocation23 + $0x304] ss:$16 sps:$4 sm:$0xff]  }
 0xb6c   :  { %5109 = vmatpush1.bf16.msra.mxu0 %v8789_v62  ;;  %5191 = vmatpush1.bf16.msra.mxu1 %v8792_v60  ;;  %v8854_v62 = vld [vmem:[#allocation23 + $0x30c] ss:$16 sps:$4 sm:$0xff]   ;;  %v8849_v60 = vld [vmem:[#allocation23 + $0x300] ss:$16 sps:$4 sm:$0xff]  }
 0xb6d   :  { %5110 = vmatprep.subr.bf16.mxu0 %v8797_v32  ;;  %5192 = vmatprep.subr.bf16.mxu1 %v8800_v44  ;;  %v8852_v32 = vld [vmem:[#allocation23 + $0x308] ss:$16 sps:$4 sm:$0xff]   ;;  %v8857_v44 = vld [vmem:[#allocation23 + $0x324] ss:$16 sps:$4 sm:$0xff]  }
 0xb70   :  { %5111 = vmatpush1.bf16.msra.mxu0 %v8795_v45  ;;  %5193 = vmatpush1.bf16.msra.mxu1 %v8798_v59  ;;  %v8860_v45 = vld [vmem:[#allocation23 + $0x32c] ss:$16 sps:$4 sm:$0xff]   ;;  %v8855_v59 = vld [vmem:[#allocation23 + $0x320] ss:$16 sps:$4 sm:$0xff]  }
 0xb71   :  { %5121 = vmatprep.subr.bf16.mxu0 %v8803_v61  ;;  %5203 = vmatprep.subr.bf16.mxu1 %v8806_v1  ;;  %v8858_v61 = vld [vmem:[#allocation23 + $0x328] ss:$16 sps:$4 sm:$0xff]   ;;  %v8863_v1 = vld [vmem:[#allocation23 + $0x344] ss:$16 sps:$4 sm:$0xff]  }
 0xc06   :  { %v4193_v12 = vpop.f32.mrb[64].mxu0  ;;  %v10903_v14 = vpop.f32.mrb[64].mxu1 }
 0xc07   :  { %v8041_v17 = vadd.f32 %v4193_v12, %v3461_v0  ;;  %v4195_v18 = vpop.f32.mrb[65].mxu0  ;;  %v4277_v20 = vpop.f32.mrb[65].mxu1  ;;  %v8866_v0 = vld [vmem:[#allocation23 + $0x34c] ss:$16 sps:$4 sm:$0xff]   ;;  %v8869_v12 = vld [vmem:[#allocation23 + $0x364] ss:$16 sps:$4 sm:$0xff]  }
 0xc08   :  { %v8042_v22 = vadd.f32 %v4195_v18, %v3465_v23  ;;  %v8044_v24 = vadd.f32 %v4277_v20, %v3473_v10  ;;  %v4197_v28 = vpop.f32.mrb[66].mxu0  ;;  %v4279_v30 = vpop.f32.mrb[66].mxu1  ;;  %v8861_v23 = vld [vmem:[#allocation23 + $0x340] ss:$16 sps:$4 sm:$0xff]   ;;  %v8864_v10 = vld [vmem:[#allocation23 + $0x348] ss:$16 sps:$4 sm:$0xff]  }
 0xc09   :  { %v4282_v33 = vmax.f32 %v8041_v17, 0.0  ;;  %v4198_v34 = vpop.f32.mrb[67].mxu0  ;;  %v4280_v50 = vpop.f32.mrb[67].mxu1  ;;  %v8872_v17 = vld [vmem:[#allocation23 + $0x36c] ss:$16 sps:$4 sm:$0xff]  }
 0xc0a   :  { %v4283_v49 = vmax.f32 %v8042_v22, 0.0  ;;  %v4285_v51 = vmax.f32 %v8044_v24, 0.0  ;;  %v8867_v18 = vld [vmem:[#allocation23 + $0x360] ss:$16 sps:$4 sm:$0xff]   ;;  %v8870_v20 = vld [vmem:[#allocation23 + $0x368] ss:$16 sps:$4 sm:$0xff]  }
 0xc0b   :  { %v4286_v26 = vpack.c.bf16 %v4282_v33, %v4282_v33  ;;  %v8875_v22 = vld [vmem:[#allocation23 + $0x384] ss:$16 sps:$4 sm:$0xff]   ;;  %v8878_v24 = vld [vmem:[#allocation23 + $0x38c] ss:$16 sps:$4 sm:$0xff]   ;;  %v8873_v28 = vld [vmem:[#allocation23 + $0x380] ss:$16 sps:$4 sm:$0xff]  }
 0xc0c   :  { %v4287_v53 = vpack.c.bf16 %v4283_v49, %v4283_v49  ;;  %v4289_v38 = vpack.c.bf16 %v4285_v51, %v4285_v51  ;;  %v8876_v30 = vld [vmem:[#allocation23 + $0x388] ss:$16 sps:$4 sm:$0xff]   ;;  %v8881_v33 = vld [vmem:[#allocation23 + $0x3a4] ss:$16 sps:$4 sm:$0xff]   ;;  %v8884_v34 = vld [vmem:[#allocation23 + $0x3ac] ss:$16 sps:$4 sm:$0xff]   ;;  %v3469_v51 = vrot.slane %v10895_v63, %v11036_v43 }
 0xc0d   :  { %v8879_v50 = vld [vmem:[#allocation23 + $0x3a0] ss:$16 sps:$4 sm:$0xff]   ;;  %v8882_v49 = vld [vmem:[#allocation23 + $0x3a8] ss:$16 sps:$4 sm:$0xff]  }
 0xc0e   :  { %5112 = vmatprep.mubr.bf16.mxu0 %v4287_v53  ;;  %5194 = vmatprep.mubr.bf16.mxu1 %v4287_v53  ;;  %v8887_v53 = vld [vmem:[#allocation23 + $0x3c4] ss:$16 sps:$4 sm:$0xff]   ;;  %v8899_v63 = vld [vmem:[#allocation26 + $0x4] ss:$16 sps:$4 sm:$0xff]  }
 0xc0f   :  { %5113 = vmatmul.mubr.bf16.vlgmr.msra.gmra.mrb[68].mxu0 %v4286_v26  ;;  %5195 = vmatmul.mubr.bf16.vlgmr.msra.gmra.mrb[68].mxu1 %v4286_v26  ;;  %v8888_v26 = vld [vmem:[#allocation23 + $0x3c8] ss:$16 sps:$4 sm:$0xff]  }
 0xc10   :  { %5122 = vmatpush1.bf16.msra.mxu0 %v8801_v52  ;;  %5204 = vmatpush1.bf16.msra.mxu1 %v8804_v54  ;;  %v8890_v52 = vld [vmem:[#allocation23 + $0x3cc] ss:$16 sps:$4 sm:$0xff]   ;;  %v8885_v54 = vld [vmem:[#allocation23 + $0x3c0] ss:$16 sps:$4 sm:$0xff]  }
 0xc11   :  { %5153 = vmatprep.mubr.bf16.mxu0 %v4289_v38  ;;  %5235 = vmatprep.mubr.bf16.mxu1 %v4289_v38  ;;  %v8896_v38 = vld [vmem:[#allocation23 + $0x3ec] ss:$16 sps:$4 sm:$0xff]  }
 0xc12   :  { %5123 = vmatprep.subr.bf16.mxu0 %v8809_v55  ;;  %5205 = vmatprep.subr.bf16.mxu1 %v8812_v56  ;;  %v8043_v55 = vadd.f32 %v10903_v14, %v3469_v51  ;;  %v8893_v56 = vld [vmem:[#allocation23 + $0x3e4] ss:$16 sps:$4 sm:$0xff]   ;;  %v8905_v14 = vld [vmem:[#allocation26 + $0x24] ss:$16 sps:$4 sm:$0xff]  }
 0xc13   :  { %v8971_v51 = vld [vmem:[#allocation26 + $0x184] ss:$16 sps:$4 sm:$0xff]  }
 0xc14   :  { %5124 = vmatpush1.bf16.msra.mxu0 %v8807_v57  ;;  %5206 = vmatpush1.bf16.msra.mxu1 %v8810_v2  ;;  %v8891_v57 = vld [vmem:[#allocation23 + $0x3e0] ss:$16 sps:$4 sm:$0xff]   ;;  %v8894_v2 = vld [vmem:[#allocation23 + $0x3e8] ss:$16 sps:$4 sm:$0xff]  }
 0xc15   :  { %5125 = vmatprep.subr.bf16.mxu0 %v8815_v4  ;;  %5207 = vmatprep.subr.bf16.mxu1 %v8818_v6  ;;  %v4284_v4 = vmax.f32 %v8043_v55, 0.0  ;;  %v8902_v6 = vld [vmem:[#allocation26 + $0xc] ss:$16 sps:$4 sm:$0xff]  }
 0xc16   :  { %v8980_v55 = vld [vmem:[#allocation26 + $0x1ac] ss:$16 sps:$4 sm:$0xff]  }
 0xc18   :  { %5126 = vmatpush1.bf16.msra.mxu0 %v8813_v8  ;;  %5208 = vmatpush1.bf16.msra.mxu1 %v8816_v48  ;;  %v8897_v8 = vld [vmem:[#allocation26] ss:$16 sps:$4 sm:$0xff]   ;;  %v8900_v48 = vld [vmem:[#allocation26 + $0x8] ss:$16 sps:$4 sm:$0xff]  }
 0xc19   :  { %5127 = vmatprep.subr.bf16.mxu0 %v8821_v37  ;;  %5209 = vmatprep.subr.bf16.mxu1 %v8824_v41  ;;  %v4288_v37 = vpack.c.bf16 %v4284_v4, %v4284_v4  ;;  %v8908_v41 = vld [vmem:[#allocation26 + $0x2c] ss:$16 sps:$4 sm:$0xff]   ;;  %v8981_v4 = vld [vmem:[#allocation26 + $0x1c0] ss:$16 sps:$4 sm:$0xff]  }
 0xc1c   :  { %5128 = vmatpush1.bf16.msra.mxu0 %v8819_v31  ;;  %5210 = vmatpush1.bf16.msra.mxu1 %v8822_v47  ;;  %v8903_v31 = vld [vmem:[#allocation26 + $0x20] ss:$16 sps:$4 sm:$0xff]   ;;  %v8906_v47 = vld [vmem:[#allocation26 + $0x28] ss:$16 sps:$4 sm:$0xff]  }
 0xc1d   :  { %5129 = vmatprep.subr.bf16.mxu0 %v8827_v25  ;;  %5211 = vmatprep.subr.bf16.mxu1 %v8830_v3  ;;  %v8911_v25 = vld [vmem:[#allocation26 + $0x44] ss:$16 sps:$4 sm:$0xff]   ;;  %v8914_v3 = vld [vmem:[#allocation26 + $0x4c] ss:$16 sps:$4 sm:$0xff]  }
 0xc20   :  { %5130 = vmatpush1.bf16.msra.mxu0 %v8825_v7  ;;  %5212 = vmatpush1.bf16.msra.mxu1 %v8828_v29  ;;  %v8909_v7 = vld [vmem:[#allocation26 + $0x40] ss:$16 sps:$4 sm:$0xff]   ;;  %v8912_v29 = vld [vmem:[#allocation26 + $0x48] ss:$16 sps:$4 sm:$0xff]  }
 0xc21   :  { %5131 = vmatprep.subr.bf16.mxu0 %v8833_v9  ;;  %5213 = vmatprep.subr.bf16.mxu1 %v8836_v35  ;;  %v8917_v9 = vld [vmem:[#allocation26 + $0x64] ss:$16 sps:$4 sm:$0xff]   ;;  %v8920_v35 = vld [vmem:[#allocation26 + $0x6c] ss:$16 sps:$4 sm:$0xff]  }
 0xc24   :  { %5132 = vmatpush1.bf16.msra.mxu0 %v8831_v11  ;;  %5214 = vmatpush1.bf16.msra.mxu1 %v8834_v13  ;;  %v8915_v11 = vld [vmem:[#allocation26 + $0x60] ss:$16 sps:$4 sm:$0xff]   ;;  %v8918_v13 = vld [vmem:[#allocation26 + $0x68] ss:$16 sps:$4 sm:$0xff]  }
 0xc25   :  { %5133 = vmatprep.subr.bf16.mxu0 %v8839_v27  ;;  %5215 = vmatprep.subr.bf16.mxu1 %v8842_v46  ;;  %v8923_v27 = vld [vmem:[#allocation26 + $0x84] ss:$16 sps:$4 sm:$0xff]   ;;  %v8926_v46 = vld [vmem:[#allocation26 + $0x8c] ss:$16 sps:$4 sm:$0xff]  }
 0xc28   :  { %5134 = vmatpush1.bf16.msra.mxu0 %v8837_v19  ;;  %5216 = vmatpush1.bf16.msra.mxu1 %v8840_v21  ;;  %v8921_v19 = vld [vmem:[#allocation26 + $0x80] ss:$16 sps:$4 sm:$0xff]   ;;  %v8924_v21 = vld [vmem:[#allocation26 + $0x88] ss:$16 sps:$4 sm:$0xff]  }
 0xc29   :  { %5135 = vmatprep.subr.bf16.mxu0 %v8845_v16  ;;  %5217 = vmatprep.subr.bf16.mxu1 %v8848_v39  ;;  %v8929_v16 = vld [vmem:[#allocation26 + $0xa4] ss:$16 sps:$4 sm:$0xff]   ;;  %v8932_v39 = vld [vmem:[#allocation26 + $0xac] ss:$16 sps:$4 sm:$0xff]  }
 0xc2c   :  { %5136 = vmatpush1.bf16.msra.mxu0 %v8843_v42  ;;  %5218 = vmatpush1.bf16.msra.mxu1 %v8846_v5  ;;  %v8927_v42 = vld [vmem:[#allocation26 + $0xa0] ss:$16 sps:$4 sm:$0xff]   ;;  %v8930_v5 = vld [vmem:[#allocation26 + $0xa8] ss:$16 sps:$4 sm:$0xff]  }
 0xc2d   :  { %5137 = vmatprep.subr.bf16.mxu0 %v8851_v58  ;;  %5219 = vmatprep.subr.bf16.mxu1 %v8854_v62  ;;  %v8935_v58 = vld [vmem:[#allocation26 + $0xc4] ss:$16 sps:$4 sm:$0xff]   ;;  %v8938_v62 = vld [vmem:[#allocation26 + $0xcc] ss:$16 sps:$4 sm:$0xff]  }
 0xc30   :  { %5138 = vmatpush1.bf16.msra.mxu0 %v8849_v60  ;;  %5220 = vmatpush1.bf16.msra.mxu1 %v8852_v32  ;;  %v8933_v60 = vld [vmem:[#allocation26 + $0xc0] ss:$16 sps:$4 sm:$0xff]   ;;  %v8936_v32 = vld [vmem:[#allocation26 + $0xc8] ss:$16 sps:$4 sm:$0xff]  }
 0xc31   :  { %5139 = vmatprep.subr.bf16.mxu0 %v8857_v44  ;;  %5221 = vmatprep.subr.bf16.mxu1 %v8860_v45  ;;  %v8941_v44 = vld [vmem:[#allocation26 + $0xe4] ss:$16 sps:$4 sm:$0xff]   ;;  %v8944_v45 = vld [vmem:[#allocation26 + $0xec] ss:$16 sps:$4 sm:$0xff]  }
 0xc34   :  { %5140 = vmatpush1.bf16.msra.mxu0 %v8855_v59  ;;  %5222 = vmatpush1.bf16.msra.mxu1 %v8858_v61  ;;  %v8939_v59 = vld [vmem:[#allocation26 + $0xe0] ss:$16 sps:$4 sm:$0xff]   ;;  %v8942_v61 = vld [vmem:[#allocation26 + $0xe8] ss:$16 sps:$4 sm:$0xff]  }
 0xc35   :  { %5141 = vmatprep.subr.bf16.mxu0 %v8863_v1  ;;  %5223 = vmatprep.subr.bf16.mxu1 %v8866_v0  ;;  %v8947_v1 = vld [vmem:[#allocation26 + $0x104] ss:$16 sps:$4 sm:$0xff]   ;;  %v8950_v0 = vld [vmem:[#allocation26 + $0x10c] ss:$16 sps:$4 sm:$0xff]  }
 0xc38   :  { %5142 = vmatpush1.bf16.msra.mxu0 %v8861_v23  ;;  %5224 = vmatpush1.bf16.msra.mxu1 %v8864_v10  ;;  %v8945_v23 = vld [vmem:[#allocation26 + $0x100] ss:$16 sps:$4 sm:$0xff]   ;;  %v8948_v10 = vld [vmem:[#allocation26 + $0x108] ss:$16 sps:$4 sm:$0xff]  }
 0xc39   :  { %5143 = vmatprep.subr.bf16.mxu0 %v8869_v12  ;;  %5225 = vmatprep.subr.bf16.mxu1 %v8872_v17  ;;  %v8953_v12 = vld [vmem:[#allocation26 + $0x124] ss:$16 sps:$4 sm:$0xff]   ;;  %v8956_v17 = vld [vmem:[#allocation26 + $0x12c] ss:$16 sps:$4 sm:$0xff]  }
 0xc3c   :  { %5144 = vmatpush1.bf16.msra.mxu0 %v8867_v18  ;;  %5226 = vmatpush1.bf16.msra.mxu1 %v8870_v20  ;;  %v8951_v18 = vld [vmem:[#allocation26 + $0x120] ss:$16 sps:$4 sm:$0xff]   ;;  %v8954_v20 = vld [vmem:[#allocation26 + $0x128] ss:$16 sps:$4 sm:$0xff]  }
 0xc3d   :  { %5145 = vmatprep.subr.bf16.mxu0 %v8875_v22  ;;  %5227 = vmatprep.subr.bf16.mxu1 %v8878_v24  ;;  %v8959_v22 = vld [vmem:[#allocation26 + $0x144] ss:$16 sps:$4 sm:$0xff]   ;;  %v8962_v24 = vld [vmem:[#allocation26 + $0x14c] ss:$16 sps:$4 sm:$0xff]  }
 0xc40   :  { %5146 = vmatpush1.bf16.msra.mxu0 %v8873_v28  ;;  %5228 = vmatpush1.bf16.msra.mxu1 %v8876_v30  ;;  %v8957_v28 = vld [vmem:[#allocation26 + $0x140] ss:$16 sps:$4 sm:$0xff]   ;;  %v8960_v30 = vld [vmem:[#allocation26 + $0x148] ss:$16 sps:$4 sm:$0xff]  }
 0xc41   :  { %5147 = vmatprep.subr.bf16.mxu0 %v8881_v33  ;;  %5229 = vmatprep.subr.bf16.mxu1 %v8884_v34  ;;  %v8965_v33 = vld [vmem:[#allocation26 + $0x164] ss:$16 sps:$4 sm:$0xff]   ;;  %v8968_v34 = vld [vmem:[#allocation26 + $0x16c] ss:$16 sps:$4 sm:$0xff]  }
 0xc44   :  { %5148 = vmatpush1.bf16.msra.mxu0 %v8879_v50  ;;  %5230 = vmatpush1.bf16.msra.mxu1 %v8882_v49  ;;  %v8963_v50 = vld [vmem:[#allocation26 + $0x160] ss:$16 sps:$4 sm:$0xff]   ;;  %v8966_v49 = vld [vmem:[#allocation26 + $0x168] ss:$16 sps:$4 sm:$0xff]  }
 0xc45   :  { %5149 = vmatprep.subr.bf16.mxu0 %v8887_v53  ;;  %5231 = vmatprep.subr.bf16.mxu1 %v8890_v52  ;;  %v8974_v53 = vld [vmem:[#allocation26 + $0x18c] ss:$16 sps:$4 sm:$0xff]   ;;  %v8969_v52 = vld [vmem:[#allocation26 + $0x180] ss:$16 sps:$4 sm:$0xff]  }
 0xc48   :  { %5150 = vmatpush1.bf16.msra.mxu0 %v8885_v54  ;;  %5232 = vmatpush1.bf16.msra.mxu1 %v8888_v26  ;;  %v8972_v54 = vld [vmem:[#allocation26 + $0x188] ss:$16 sps:$4 sm:$0xff]   ;;  %v8977_v26 = vld [vmem:[#allocation26 + $0x1a4] ss:$16 sps:$4 sm:$0xff]  }
 0xc49   :  { %5151 = vmatprep.subr.bf16.mxu0 %v8893_v56  ;;  %5233 = vmatprep.subr.bf16.mxu1 %v8896_v38  ;;  %v8975_v56 = vld [vmem:[#allocation26 + $0x1a0] ss:$16 sps:$4 sm:$0xff]   ;;  %v8978_v38 = vld [vmem:[#allocation26 + $0x1a8] ss:$16 sps:$4 sm:$0xff]  }
 0xc4c   :  { %5152 = vmatpush1.bf16.msra.mxu0 %v8891_v57  ;;  %5234 = vmatpush1.bf16.msra.mxu1 %v8894_v2  ;;  %v8983_v57 = vld [vmem:[#allocation26 + $0x1c4] ss:$16 sps:$4 sm:$0xff]   ;;  %v8986_v2 = vld [vmem:[#allocation26 + $0x1cc] ss:$16 sps:$4 sm:$0xff]  }
 0xc4d   :  { %6042 = vmatprep.subr.bf16.mxu0 %v8899_v63  ;;  %6124 = vmatprep.subr.bf16.mxu1 %v8902_v6  ;;  %v8984_v63 = vld [vmem:[#allocation26 + $0x1c8] ss:$16 sps:$4 sm:$0xff]   ;;  %v8989_v6 = vld [vmem:[#allocation26 + $0x1e4] ss:$16 sps:$4 sm:$0xff]  }
 0xc4f   :  { %5154 = vmatmul.mubr.bf16.vlgmr.msra.gmra.mrb[68].mxu0 %v4288_v37  ;;  %5236 = vmatmul.mubr.bf16.vlgmr.msra.gmra.mrb[68].mxu1 %v4288_v37  ;;  %v8990_v37 = vld [vmem:[#allocation26 + $0x1e8] ss:$16 sps:$4 sm:$0xff]  }
 0xc50   :  { %6043 = vmatpush1.bf16.msra.mxu0 %v8897_v8  ;;  %6125 = vmatpush1.bf16.msra.mxu1 %v8900_v48  ;;  %v8992_v8 = vld [vmem:[#allocation26 + $0x1ec] ss:$16 sps:$4 sm:$0xff]   ;;  %v8987_v48 = vld [vmem:[#allocation26 + $0x1e0] ss:$16 sps:$4 sm:$0xff]  }
 0xc51   :  { %6044 = vmatprep.subr.bf16.mxu0 %v8905_v14  ;;  %6126 = vmatprep.subr.bf16.mxu1 %v8908_v41  ;;  %v8995_v14 = vld [vmem:[#allocation26 + $0x204] ss:$16 sps:$4 sm:$0xff]   ;;  %v8998_v41 = vld [vmem:[#allocation26 + $0x20c] ss:$16 sps:$4 sm:$0xff]  }
 0xc54   :  { %6045 = vmatpush1.bf16.msra.mxu0 %v8903_v31  ;;  %6127 = vmatpush1.bf16.msra.mxu1 %v8906_v47  ;;  %v10908_v31 = vld [vmem:[#allocation24] sm:$0xf] }
 0xc55   :  { %6046 = vmatprep.subr.bf16.mxu0 %v8911_v25  ;;  %6128 = vmatprep.subr.bf16.mxu1 %v8914_v3  ;;  %v4423_v47 = vrot.slane %v10908_v31, %v11035_v36  ;;  %v4427_v25 = vrot.slane %v10908_v31, %v11037_v15  ;;  %v4435_v3 = vrot.slane %v10908_v31, %v11038_v40 }
 0xc58   :  { %6047 = vmatpush1.bf16.msra.mxu0 %v8909_v7  ;;  %6129 = vmatpush1.bf16.msra.mxu1 %v8912_v29 }
 0xc59   :  { %6048 = vmatprep.subr.bf16.mxu0 %v8917_v9  ;;  %6130 = vmatprep.subr.bf16.mxu1 %v8920_v35 }
 0xc5c   :  { %6049 = vmatpush1.bf16.msra.mxu0 %v8915_v11  ;;  %6131 = vmatpush1.bf16.msra.mxu1 %v8918_v13 }
 0xc5d   :  { %6050 = vmatprep.subr.bf16.mxu0 %v8923_v27  ;;  %6132 = vmatprep.subr.bf16.mxu1 %v8926_v46 }
 0xc60   :  { %6051 = vmatpush1.bf16.msra.mxu0 %v8921_v19  ;;  %6133 = vmatpush1.bf16.msra.mxu1 %v8924_v21 }
 0xc61   :  { %6052 = vmatprep.subr.bf16.mxu0 %v8929_v16  ;;  %6134 = vmatprep.subr.bf16.mxu1 %v8932_v39 }
 0xc64   :  { %6053 = vmatpush1.bf16.msra.mxu0 %v8927_v42  ;;  %6135 = vmatpush1.bf16.msra.mxu1 %v8930_v5 }
 0xc65   :  { %6054 = vmatprep.subr.bf16.mxu0 %v8935_v58  ;;  %6136 = vmatprep.subr.bf16.mxu1 %v8938_v62  ;;  %v8993_v62 = vld [vmem:[#allocation26 + $0x200] ss:$16 sps:$4 sm:$0xff]  }
 0xc68   :  { %6055 = vmatpush1.bf16.msra.mxu0 %v8933_v60  ;;  %6137 = vmatpush1.bf16.msra.mxu1 %v8936_v32  ;;  %v8996_v60 = vld [vmem:[#allocation26 + $0x208] ss:$16 sps:$4 sm:$0xff]  }
 0xc69   :  { %6056 = vmatprep.subr.bf16.mxu0 %v8941_v44  ;;  %6138 = vmatprep.subr.bf16.mxu1 %v8944_v45  ;;  %v9001_v44 = vld [vmem:[#allocation26 + $0x224] ss:$16 sps:$4 sm:$0xff]   ;;  %v9004_v45 = vld [vmem:[#allocation26 + $0x22c] ss:$16 sps:$4 sm:$0xff]  }
 0xc6c   :  { %6057 = vmatpush1.bf16.msra.mxu0 %v8939_v59  ;;  %6139 = vmatpush1.bf16.msra.mxu1 %v8942_v61  ;;  %v8999_v61 = vld [vmem:[#allocation26 + $0x220] ss:$16 sps:$4 sm:$0xff]  }
 0xc6d   :  { %6058 = vmatprep.subr.bf16.mxu0 %v8947_v1  ;;  %6140 = vmatprep.subr.bf16.mxu1 %v8950_v0  ;;  %v9002_v1 = vld [vmem:[#allocation26 + $0x228] ss:$16 sps:$4 sm:$0xff]   ;;  %v9007_v0 = vld [vmem:[#allocation26 + $0x244] ss:$16 sps:$4 sm:$0xff]  }
 0xc70   :  { %6059 = vmatpush1.bf16.msra.mxu0 %v8945_v23  ;;  %6141 = vmatpush1.bf16.msra.mxu1 %v8948_v10  ;;  %v9010_v23 = vld [vmem:[#allocation26 + $0x24c] ss:$16 sps:$4 sm:$0xff]   ;;  %v9005_v10 = vld [vmem:[#allocation26 + $0x240] ss:$16 sps:$4 sm:$0xff]  }
 0xc71   :  { %6060 = vmatprep.subr.bf16.mxu0 %v8953_v12  ;;  %6142 = vmatprep.subr.bf16.mxu1 %v8956_v17  ;;  %v9008_v12 = vld [vmem:[#allocation26 + $0x248] ss:$16 sps:$4 sm:$0xff]   ;;  %v9013_v17 = vld [vmem:[#allocation26 + $0x264] ss:$16 sps:$4 sm:$0xff]  }
 0xc74   :  { %6061 = vmatpush1.bf16.msra.mxu0 %v8951_v18  ;;  %6143 = vmatpush1.bf16.msra.mxu1 %v8954_v20  ;;  %v9016_v18 = vld [vmem:[#allocation26 + $0x26c] ss:$16 sps:$4 sm:$0xff]   ;;  %v9011_v20 = vld [vmem:[#allocation26 + $0x260] ss:$16 sps:$4 sm:$0xff]  }
 0xc75   :  { %6062 = vmatprep.subr.bf16.mxu0 %v8959_v22  ;;  %6144 = vmatprep.subr.bf16.mxu1 %v8962_v24  ;;  %v9014_v22 = vld [vmem:[#allocation26 + $0x268] ss:$16 sps:$4 sm:$0xff]   ;;  %v9019_v24 = vld [vmem:[#allocation26 + $0x284] ss:$16 sps:$4 sm:$0xff]  }
 0xc78   :  { %6063 = vmatpush1.bf16.msra.mxu0 %v8957_v28  ;;  %6145 = vmatpush1.bf16.msra.mxu1 %v8960_v30  ;;  %v9022_v28 = vld [vmem:[#allocation26 + $0x28c] ss:$16 sps:$4 sm:$0xff]   ;;  %v9017_v30 = vld [vmem:[#allocation26 + $0x280] ss:$16 sps:$4 sm:$0xff]  }
 0xc79   :  { %6064 = vmatprep.subr.bf16.mxu0 %v8965_v33  ;;  %6146 = vmatprep.subr.bf16.mxu1 %v8968_v34  ;;  %v9020_v33 = vld [vmem:[#allocation26 + $0x288] ss:$16 sps:$4 sm:$0xff]   ;;  %v9025_v34 = vld [vmem:[#allocation26 + $0x2a4] ss:$16 sps:$4 sm:$0xff]  }
 0xc7c   :  { %6065 = vmatpush1.bf16.msra.mxu0 %v8963_v50  ;;  %6147 = vmatpush1.bf16.msra.mxu1 %v8966_v49  ;;  %v9028_v50 = vld [vmem:[#allocation26 + $0x2ac] ss:$16 sps:$4 sm:$0xff]   ;;  %v9023_v49 = vld [vmem:[#allocation26 + $0x2a0] ss:$16 sps:$4 sm:$0xff]  }
 0xc7d   :  { %6066 = vmatprep.subr.bf16.mxu0 %v8971_v51  ;;  %6148 = vmatprep.subr.bf16.mxu1 %v8974_v53  ;;  %v9026_v51 = vld [vmem:[#allocation26 + $0x2a8] ss:$16 sps:$4 sm:$0xff]   ;;  %v9031_v53 = vld [vmem:[#allocation26 + $0x2c4] ss:$16 sps:$4 sm:$0xff]  }
 0xc80   :  { %6067 = vmatpush1.bf16.msra.mxu0 %v8969_v52  ;;  %6149 = vmatpush1.bf16.msra.mxu1 %v8972_v54  ;;  %v9034_v52 = vld [vmem:[#allocation26 + $0x2cc] ss:$16 sps:$4 sm:$0xff]   ;;  %v9029_v54 = vld [vmem:[#allocation26 + $0x2c0] ss:$16 sps:$4 sm:$0xff]  }
 0xc81   :  { %6068 = vmatprep.subr.bf16.mxu0 %v8977_v26  ;;  %6150 = vmatprep.subr.bf16.mxu1 %v8980_v55  ;;  %v9032_v26 = vld [vmem:[#allocation26 + $0x2c8] ss:$16 sps:$4 sm:$0xff]   ;;  %v9037_v55 = vld [vmem:[#allocation26 + $0x2e4] ss:$16 sps:$4 sm:$0xff]  }
 0xc84   :  { %6069 = vmatpush1.bf16.msra.mxu0 %v8975_v56  ;;  %6151 = vmatpush1.bf16.msra.mxu1 %v8978_v38  ;;  %v9040_v56 = vld [vmem:[#allocation26 + $0x2ec] ss:$16 sps:$4 sm:$0xff]   ;;  %v9035_v38 = vld [vmem:[#allocation26 + $0x2e0] ss:$16 sps:$4 sm:$0xff]  }
 0xc85   :  { %6070 = vmatprep.subr.bf16.mxu0 %v8983_v57  ;;  %6152 = vmatprep.subr.bf16.mxu1 %v8986_v2  ;;  %v9038_v57 = vld [vmem:[#allocation26 + $0x2e8] ss:$16 sps:$4 sm:$0xff]   ;;  %v9043_v2 = vld [vmem:[#allocation26 + $0x304] ss:$16 sps:$4 sm:$0xff]  }
 0xc88   :  { %6071 = vmatpush1.bf16.msra.mxu0 %v8981_v4  ;;  %6153 = vmatpush1.bf16.msra.mxu1 %v8984_v63  ;;  %v9046_v4 = vld [vmem:[#allocation26 + $0x30c] ss:$16 sps:$4 sm:$0xff]   ;;  %v9041_v63 = vld [vmem:[#allocation26 + $0x300] ss:$16 sps:$4 sm:$0xff]  }
 0xc89   :  { %6072 = vmatprep.subr.bf16.mxu0 %v8989_v6  ;;  %6154 = vmatprep.subr.bf16.mxu1 %v8992_v8  ;;  %v9044_v6 = vld [vmem:[#allocation26 + $0x308] ss:$16 sps:$4 sm:$0xff]   ;;  %v9049_v8 = vld [vmem:[#allocation26 + $0x324] ss:$16 sps:$4 sm:$0xff]  }
 0xc8c   :  { %6073 = vmatpush1.bf16.msra.mxu0 %v8987_v48  ;;  %6155 = vmatpush1.bf16.msra.mxu1 %v8990_v37  ;;  %v9052_v48 = vld [vmem:[#allocation26 + $0x32c] ss:$16 sps:$4 sm:$0xff]   ;;  %v9047_v37 = vld [vmem:[#allocation26 + $0x320] ss:$16 sps:$4 sm:$0xff]  }
 0xc8d   :  { %6083 = vmatprep.subr.bf16.mxu0 %v8995_v14  ;;  %6165 = vmatprep.subr.bf16.mxu1 %v8998_v41  ;;  %v9050_v14 = vld [vmem:[#allocation26 + $0x328] ss:$16 sps:$4 sm:$0xff]   ;;  %v9055_v41 = vld [vmem:[#allocation26 + $0x344] ss:$16 sps:$4 sm:$0xff]  }
 0xd22   :  { %v5155_v7 = vpop.f32.mrb[68].mxu0  ;;  %v10916_v29 = vpop.f32.mrb[68].mxu1 }
 0xd23   :  { %v8045_v9 = vadd.f32 %v5155_v7, %v4423_v47  ;;  %v5157_v35 = vpop.f32.mrb[69].mxu0  ;;  %v5239_v11 = vpop.f32.mrb[69].mxu1  ;;  %v9058_v47 = vld [vmem:[#allocation26 + $0x34c] ss:$16 sps:$4 sm:$0xff]   ;;  %v9061_v7 = vld [vmem:[#allocation26 + $0x364] ss:$16 sps:$4 sm:$0xff]  }
 0xd24   :  { %v8046_v13 = vadd.f32 %v5157_v35, %v4427_v25  ;;  %v8048_v27 = vadd.f32 %v5239_v11, %v4435_v3  ;;  %v5159_v46 = vpop.f32.mrb[70].mxu0  ;;  %v5241_v19 = vpop.f32.mrb[70].mxu1  ;;  %v9053_v25 = vld [vmem:[#allocation26 + $0x340] ss:$16 sps:$4 sm:$0xff]   ;;  %v9056_v3 = vld [vmem:[#allocation26 + $0x348] ss:$16 sps:$4 sm:$0xff]  }
 0xd25   :  { %v5244_v21 = vmax.f32 %v8045_v9, 0.0  ;;  %v5160_v16 = vpop.f32.mrb[71].mxu0  ;;  %v5242_v39 = vpop.f32.mrb[71].mxu1  ;;  %v9064_v9 = vld [vmem:[#allocation26 + $0x36c] ss:$16 sps:$4 sm:$0xff]  }
 0xd26   :  { %v5245_v42 = vmax.f32 %v8046_v13, 0.0  ;;  %v5247_v5 = vmax.f32 %v8048_v27, 0.0  ;;  %v9059_v35 = vld [vmem:[#allocation26 + $0x360] ss:$16 sps:$4 sm:$0xff]   ;;  %v9062_v11 = vld [vmem:[#allocation26 + $0x368] ss:$16 sps:$4 sm:$0xff]  }
 0xd27   :  { %v5248_v32 = vpack.c.bf16 %v5244_v21, %v5244_v21  ;;  %v9067_v13 = vld [vmem:[#allocation26 + $0x384] ss:$16 sps:$4 sm:$0xff]   ;;  %v9070_v27 = vld [vmem:[#allocation26 + $0x38c] ss:$16 sps:$4 sm:$0xff]   ;;  %v9065_v46 = vld [vmem:[#allocation26 + $0x380] ss:$16 sps:$4 sm:$0xff]  }
 0xd28   :  { %v5249_v58 = vpack.c.bf16 %v5245_v42, %v5245_v42  ;;  %v5251_v59 = vpack.c.bf16 %v5247_v5, %v5247_v5  ;;  %v9068_v19 = vld [vmem:[#allocation26 + $0x388] ss:$16 sps:$4 sm:$0xff]   ;;  %v9073_v21 = vld [vmem:[#allocation26 + $0x3a4] ss:$16 sps:$4 sm:$0xff]   ;;  %v9076_v16 = vld [vmem:[#allocation26 + $0x3ac] ss:$16 sps:$4 sm:$0xff]   ;;  %v4431_v5 = vrot.slane %v10908_v31, %v11036_v43 }
 0xd29   :  { %v9071_v39 = vld [vmem:[#allocation26 + $0x3a0] ss:$16 sps:$4 sm:$0xff]   ;;  %v9074_v42 = vld [vmem:[#allocation26 + $0x3a8] ss:$16 sps:$4 sm:$0xff]  }
 0xd2a   :  { %6074 = vmatprep.mubr.bf16.mxu0 %v5249_v58  ;;  %6156 = vmatprep.mubr.bf16.mxu1 %v5249_v58  ;;  %v9079_v58 = vld [vmem:[#allocation26 + $0x3c4] ss:$16 sps:$4 sm:$0xff]   ;;  %v9091_v31 = vld [vmem:[#allocation29 + $0x4] ss:$16 sps:$4 sm:$0xff]  }
 0xd2b   :  { %6075 = vmatmul.mubr.bf16.vlgmr.msra.gmra.mrb[72].mxu0 %v5248_v32  ;;  %6157 = vmatmul.mubr.bf16.vlgmr.msra.gmra.mrb[72].mxu1 %v5248_v32  ;;  %v9080_v32 = vld [vmem:[#allocation26 + $0x3c8] ss:$16 sps:$4 sm:$0xff]  }
 0xd2c   :  { %6084 = vmatpush1.bf16.msra.mxu0 %v8993_v62  ;;  %6166 = vmatpush1.bf16.msra.mxu1 %v8996_v60  ;;  %v9082_v62 = vld [vmem:[#allocation26 + $0x3cc] ss:$16 sps:$4 sm:$0xff]   ;;  %v9077_v60 = vld [vmem:[#allocation26 + $0x3c0] ss:$16 sps:$4 sm:$0xff]  }
 0xd2d   :  { %6115 = vmatprep.mubr.bf16.mxu0 %v5251_v59  ;;  %6197 = vmatprep.mubr.bf16.mxu1 %v5251_v59  ;;  %v9088_v59 = vld [vmem:[#allocation26 + $0x3ec] ss:$16 sps:$4 sm:$0xff]  }
 0xd2e   :  { %6085 = vmatprep.subr.bf16.mxu0 %v9001_v44  ;;  %6167 = vmatprep.subr.bf16.mxu1 %v9004_v45  ;;  %v8047_v44 = vadd.f32 %v10916_v29, %v4431_v5  ;;  %v9085_v45 = vld [vmem:[#allocation26 + $0x3e4] ss:$16 sps:$4 sm:$0xff]   ;;  %v9097_v29 = vld [vmem:[#allocation29 + $0x24] ss:$16 sps:$4 sm:$0xff]  }
 0xd2f   :  { %v9163_v5 = vld [vmem:[#allocation29 + $0x184] ss:$16 sps:$4 sm:$0xff]  }
 0xd30   :  { %6086 = vmatpush1.bf16.msra.mxu0 %v8999_v61  ;;  %6168 = vmatpush1.bf16.msra.mxu1 %v9002_v1  ;;  %v9083_v61 = vld [vmem:[#allocation26 + $0x3e0] ss:$16 sps:$4 sm:$0xff]   ;;  %v9086_v1 = vld [vmem:[#allocation26 + $0x3e8] ss:$16 sps:$4 sm:$0xff]  }
 0xd31   :  { %6087 = vmatprep.subr.bf16.mxu0 %v9007_v0  ;;  %6169 = vmatprep.subr.bf16.mxu1 %v9010_v23  ;;  %v5246_v0 = vmax.f32 %v8047_v44, 0.0  ;;  %v9094_v23 = vld [vmem:[#allocation29 + $0xc] ss:$16 sps:$4 sm:$0xff]  }
 0xd32   :  { %v9172_v44 = vld [vmem:[#allocation29 + $0x1ac] ss:$16 sps:$4 sm:$0xff]  }
 0xd34   :  { %6088 = vmatpush1.bf16.msra.mxu0 %v9005_v10  ;;  %6170 = vmatpush1.bf16.msra.mxu1 %v9008_v12  ;;  %v9089_v10 = vld [vmem:[#allocation29] ss:$16 sps:$4 sm:$0xff]   ;;  %v9092_v12 = vld [vmem:[#allocation29 + $0x8] ss:$16 sps:$4 sm:$0xff]  }
 0xd35   :  { %6089 = vmatprep.subr.bf16.mxu0 %v9013_v17  ;;  %6171 = vmatprep.subr.bf16.mxu1 %v9016_v18  ;;  %v5250_v17 = vpack.c.bf16 %v5246_v0, %v5246_v0  ;;  %v9100_v18 = vld [vmem:[#allocation29 + $0x2c] ss:$16 sps:$4 sm:$0xff]   ;;  %v9173_v0 = vld [vmem:[#allocation29 + $0x1c0] ss:$16 sps:$4 sm:$0xff]  }
 0xd38   :  { %6090 = vmatpush1.bf16.msra.mxu0 %v9011_v20  ;;  %6172 = vmatpush1.bf16.msra.mxu1 %v9014_v22  ;;  %v9095_v20 = vld [vmem:[#allocation29 + $0x20] ss:$16 sps:$4 sm:$0xff]   ;;  %v9098_v22 = vld [vmem:[#allocation29 + $0x28] ss:$16 sps:$4 sm:$0xff]  }
 0xd39   :  { %6091 = vmatprep.subr.bf16.mxu0 %v9019_v24  ;;  %6173 = vmatprep.subr.bf16.mxu1 %v9022_v28  ;;  %v9103_v24 = vld [vmem:[#allocation29 + $0x44] ss:$16 sps:$4 sm:$0xff]   ;;  %v9106_v28 = vld [vmem:[#allocation29 + $0x4c] ss:$16 sps:$4 sm:$0xff]  }
 0xd3c   :  { %6092 = vmatpush1.bf16.msra.mxu0 %v9017_v30  ;;  %6174 = vmatpush1.bf16.msra.mxu1 %v9020_v33  ;;  %v9101_v30 = vld [vmem:[#allocation29 + $0x40] ss:$16 sps:$4 sm:$0xff]   ;;  %v9104_v33 = vld [vmem:[#allocation29 + $0x48] ss:$16 sps:$4 sm:$0xff]  }
 0xd3d   :  { %6093 = vmatprep.subr.bf16.mxu0 %v9025_v34  ;;  %6175 = vmatprep.subr.bf16.mxu1 %v9028_v50  ;;  %v9109_v34 = vld [vmem:[#allocation29 + $0x64] ss:$16 sps:$4 sm:$0xff]   ;;  %v9112_v50 = vld [vmem:[#allocation29 + $0x6c] ss:$16 sps:$4 sm:$0xff]  }
 0xd40   :  { %6094 = vmatpush1.bf16.msra.mxu0 %v9023_v49  ;;  %6176 = vmatpush1.bf16.msra.mxu1 %v9026_v51  ;;  %v9107_v49 = vld [vmem:[#allocation29 + $0x60] ss:$16 sps:$4 sm:$0xff]   ;;  %v9110_v51 = vld [vmem:[#allocation29 + $0x68] ss:$16 sps:$4 sm:$0xff]  }
 0xd41   :  { %6095 = vmatprep.subr.bf16.mxu0 %v9031_v53  ;;  %6177 = vmatprep.subr.bf16.mxu1 %v9034_v52  ;;  %v9115_v53 = vld [vmem:[#allocation29 + $0x84] ss:$16 sps:$4 sm:$0xff]   ;;  %v9118_v52 = vld [vmem:[#allocation29 + $0x8c] ss:$16 sps:$4 sm:$0xff]  }
 0xd44   :  { %6096 = vmatpush1.bf16.msra.mxu0 %v9029_v54  ;;  %6178 = vmatpush1.bf16.msra.mxu1 %v9032_v26  ;;  %v9113_v54 = vld [vmem:[#allocation29 + $0x80] ss:$16 sps:$4 sm:$0xff]   ;;  %v9116_v26 = vld [vmem:[#allocation29 + $0x88] ss:$16 sps:$4 sm:$0xff]  }
 0xd45   :  { %6097 = vmatprep.subr.bf16.mxu0 %v9037_v55  ;;  %6179 = vmatprep.subr.bf16.mxu1 %v9040_v56  ;;  %v9121_v55 = vld [vmem:[#allocation29 + $0xa4] ss:$16 sps:$4 sm:$0xff]   ;;  %v9124_v56 = vld [vmem:[#allocation29 + $0xac] ss:$16 sps:$4 sm:$0xff]  }
 0xd48   :  { %6098 = vmatpush1.bf16.msra.mxu0 %v9035_v38  ;;  %6180 = vmatpush1.bf16.msra.mxu1 %v9038_v57  ;;  %v9119_v38 = vld [vmem:[#allocation29 + $0xa0] ss:$16 sps:$4 sm:$0xff]   ;;  %v9122_v57 = vld [vmem:[#allocation29 + $0xa8] ss:$16 sps:$4 sm:$0xff]  }
 0xd49   :  { %6099 = vmatprep.subr.bf16.mxu0 %v9043_v2  ;;  %6181 = vmatprep.subr.bf16.mxu1 %v9046_v4  ;;  %v9127_v2 = vld [vmem:[#allocation29 + $0xc4] ss:$16 sps:$4 sm:$0xff]   ;;  %v9130_v4 = vld [vmem:[#allocation29 + $0xcc] ss:$16 sps:$4 sm:$0xff]  }
 0xd4c   :  { %6100 = vmatpush1.bf16.msra.mxu0 %v9041_v63  ;;  %6182 = vmatpush1.bf16.msra.mxu1 %v9044_v6  ;;  %v9125_v63 = vld [vmem:[#allocation29 + $0xc0] ss:$16 sps:$4 sm:$0xff]   ;;  %v9128_v6 = vld [vmem:[#allocation29 + $0xc8] ss:$16 sps:$4 sm:$0xff]  }
 0xd4d   :  { %6101 = vmatprep.subr.bf16.mxu0 %v9049_v8  ;;  %6183 = vmatprep.subr.bf16.mxu1 %v9052_v48  ;;  %v9133_v8 = vld [vmem:[#allocation29 + $0xe4] ss:$16 sps:$4 sm:$0xff]   ;;  %v9136_v48 = vld [vmem:[#allocation29 + $0xec] ss:$16 sps:$4 sm:$0xff]  }
 0xd50   :  { %6102 = vmatpush1.bf16.msra.mxu0 %v9047_v37  ;;  %6184 = vmatpush1.bf16.msra.mxu1 %v9050_v14  ;;  %v9131_v37 = vld [vmem:[#allocation29 + $0xe0] ss:$16 sps:$4 sm:$0xff]   ;;  %v9134_v14 = vld [vmem:[#allocation29 + $0xe8] ss:$16 sps:$4 sm:$0xff]  }
 0xd51   :  { %6103 = vmatprep.subr.bf16.mxu0 %v9055_v41  ;;  %6185 = vmatprep.subr.bf16.mxu1 %v9058_v47  ;;  %v9139_v41 = vld [vmem:[#allocation29 + $0x104] ss:$16 sps:$4 sm:$0xff]   ;;  %v9142_v47 = vld [vmem:[#allocation29 + $0x10c] ss:$16 sps:$4 sm:$0xff]  }
 0xd54   :  { %6104 = vmatpush1.bf16.msra.mxu0 %v9053_v25  ;;  %6186 = vmatpush1.bf16.msra.mxu1 %v9056_v3  ;;  %v9137_v25 = vld [vmem:[#allocation29 + $0x100] ss:$16 sps:$4 sm:$0xff]   ;;  %v9140_v3 = vld [vmem:[#allocation29 + $0x108] ss:$16 sps:$4 sm:$0xff]  }
 0xd55   :  { %6105 = vmatprep.subr.bf16.mxu0 %v9061_v7  ;;  %6187 = vmatprep.subr.bf16.mxu1 %v9064_v9  ;;  %v9145_v7 = vld [vmem:[#allocation29 + $0x124] ss:$16 sps:$4 sm:$0xff]   ;;  %v9148_v9 = vld [vmem:[#allocation29 + $0x12c] ss:$16 sps:$4 sm:$0xff]  }
 0xd58   :  { %6106 = vmatpush1.bf16.msra.mxu0 %v9059_v35  ;;  %6188 = vmatpush1.bf16.msra.mxu1 %v9062_v11  ;;  %v9143_v35 = vld [vmem:[#allocation29 + $0x120] ss:$16 sps:$4 sm:$0xff]   ;;  %v9146_v11 = vld [vmem:[#allocation29 + $0x128] ss:$16 sps:$4 sm:$0xff]  }
 0xd59   :  { %6107 = vmatprep.subr.bf16.mxu0 %v9067_v13  ;;  %6189 = vmatprep.subr.bf16.mxu1 %v9070_v27  ;;  %v9151_v13 = vld [vmem:[#allocation29 + $0x144] ss:$16 sps:$4 sm:$0xff]   ;;  %v9154_v27 = vld [vmem:[#allocation29 + $0x14c] ss:$16 sps:$4 sm:$0xff]  }
 0xd5c   :  { %6108 = vmatpush1.bf16.msra.mxu0 %v9065_v46  ;;  %6190 = vmatpush1.bf16.msra.mxu1 %v9068_v19  ;;  %v9149_v46 = vld [vmem:[#allocation29 + $0x140] ss:$16 sps:$4 sm:$0xff]   ;;  %v9152_v19 = vld [vmem:[#allocation29 + $0x148] ss:$16 sps:$4 sm:$0xff]  }
 0xd5d   :  { %6109 = vmatprep.subr.bf16.mxu0 %v9073_v21  ;;  %6191 = vmatprep.subr.bf16.mxu1 %v9076_v16  ;;  %v9157_v21 = vld [vmem:[#allocation29 + $0x164] ss:$16 sps:$4 sm:$0xff]   ;;  %v9160_v16 = vld [vmem:[#allocation29 + $0x16c] ss:$16 sps:$4 sm:$0xff]  }
 0xd60   :  { %6110 = vmatpush1.bf16.msra.mxu0 %v9071_v39  ;;  %6192 = vmatpush1.bf16.msra.mxu1 %v9074_v42  ;;  %v9155_v39 = vld [vmem:[#allocation29 + $0x160] ss:$16 sps:$4 sm:$0xff]   ;;  %v9158_v42 = vld [vmem:[#allocation29 + $0x168] ss:$16 sps:$4 sm:$0xff]  }
 0xd61   :  { %6111 = vmatprep.subr.bf16.mxu0 %v9079_v58  ;;  %6193 = vmatprep.subr.bf16.mxu1 %v9082_v62  ;;  %v9166_v58 = vld [vmem:[#allocation29 + $0x18c] ss:$16 sps:$4 sm:$0xff]   ;;  %v9161_v62 = vld [vmem:[#allocation29 + $0x180] ss:$16 sps:$4 sm:$0xff]  }
 0xd64   :  { %6112 = vmatpush1.bf16.msra.mxu0 %v9077_v60  ;;  %6194 = vmatpush1.bf16.msra.mxu1 %v9080_v32  ;;  %v9164_v60 = vld [vmem:[#allocation29 + $0x188] ss:$16 sps:$4 sm:$0xff]   ;;  %v9169_v32 = vld [vmem:[#allocation29 + $0x1a4] ss:$16 sps:$4 sm:$0xff]  }
 0xd65   :  { %6113 = vmatprep.subr.bf16.mxu0 %v9085_v45  ;;  %6195 = vmatprep.subr.bf16.mxu1 %v9088_v59  ;;  %v9167_v45 = vld [vmem:[#allocation29 + $0x1a0] ss:$16 sps:$4 sm:$0xff]   ;;  %v9170_v59 = vld [vmem:[#allocation29 + $0x1a8] ss:$16 sps:$4 sm:$0xff]  }
 0xd68   :  { %6114 = vmatpush1.bf16.msra.mxu0 %v9083_v61  ;;  %6196 = vmatpush1.bf16.msra.mxu1 %v9086_v1  ;;  %v9175_v61 = vld [vmem:[#allocation29 + $0x1c4] ss:$16 sps:$4 sm:$0xff]   ;;  %v9178_v1 = vld [vmem:[#allocation29 + $0x1cc] ss:$16 sps:$4 sm:$0xff]  }
 0xd69   :  { %7004 = vmatprep.subr.bf16.mxu0 %v9091_v31  ;;  %7086 = vmatprep.subr.bf16.mxu1 %v9094_v23  ;;  %v9176_v31 = vld [vmem:[#allocation29 + $0x1c8] ss:$16 sps:$4 sm:$0xff]   ;;  %v9181_v23 = vld [vmem:[#allocation29 + $0x1e4] ss:$16 sps:$4 sm:$0xff]  }
 0xd6b   :  { %6116 = vmatmul.mubr.bf16.vlgmr.msra.gmra.mrb[72].mxu0 %v5250_v17  ;;  %6198 = vmatmul.mubr.bf16.vlgmr.msra.gmra.mrb[72].mxu1 %v5250_v17  ;;  %v9182_v17 = vld [vmem:[#allocation29 + $0x1e8] ss:$16 sps:$4 sm:$0xff]  }
 0xd6c   :  { %7005 = vmatpush1.bf16.msra.mxu0 %v9089_v10  ;;  %7087 = vmatpush1.bf16.msra.mxu1 %v9092_v12  ;;  %v9184_v10 = vld [vmem:[#allocation29 + $0x1ec] ss:$16 sps:$4 sm:$0xff]   ;;  %v9179_v12 = vld [vmem:[#allocation29 + $0x1e0] ss:$16 sps:$4 sm:$0xff]  }
 0xd6d   :  { %7006 = vmatprep.subr.bf16.mxu0 %v9097_v29  ;;  %7088 = vmatprep.subr.bf16.mxu1 %v9100_v18  ;;  %v9187_v29 = vld [vmem:[#allocation29 + $0x204] ss:$16 sps:$4 sm:$0xff]   ;;  %v9190_v18 = vld [vmem:[#allocation29 + $0x20c] ss:$16 sps:$4 sm:$0xff]  }
 0xd70   :  { %7007 = vmatpush1.bf16.msra.mxu0 %v9095_v20  ;;  %7089 = vmatpush1.bf16.msra.mxu1 %v9098_v22  ;;  %v10921_v20 = vld [vmem:[#allocation27] sm:$0xf] }
 0xd71   :  { %7008 = vmatprep.subr.bf16.mxu0 %v9103_v24  ;;  %7090 = vmatprep.subr.bf16.mxu1 %v9106_v28  ;;  %v5385_v22 = vrot.slane %v10921_v20, %v11035_v36  ;;  %v5389_v24 = vrot.slane %v10921_v20, %v11037_v15  ;;  %v5397_v28 = vrot.slane %v10921_v20, %v11038_v40 }
 0xd74   :  { %7009 = vmatpush1.bf16.msra.mxu0 %v9101_v30  ;;  %7091 = vmatpush1.bf16.msra.mxu1 %v9104_v33 }
 0xd75   :  { %7010 = vmatprep.subr.bf16.mxu0 %v9109_v34  ;;  %7092 = vmatprep.subr.bf16.mxu1 %v9112_v50 }
 0xd78   :  { %7011 = vmatpush1.bf16.msra.mxu0 %v9107_v49  ;;  %7093 = vmatpush1.bf16.msra.mxu1 %v9110_v51 }
 0xd79   :  { %7012 = vmatprep.subr.bf16.mxu0 %v9115_v53  ;;  %7094 = vmatprep.subr.bf16.mxu1 %v9118_v52 }
 0xd7c   :  { %7013 = vmatpush1.bf16.msra.mxu0 %v9113_v54  ;;  %7095 = vmatpush1.bf16.msra.mxu1 %v9116_v26 }
 0xd7d   :  { %7014 = vmatprep.subr.bf16.mxu0 %v9121_v55  ;;  %7096 = vmatprep.subr.bf16.mxu1 %v9124_v56 }
 0xd80   :  { %7015 = vmatpush1.bf16.msra.mxu0 %v9119_v38  ;;  %7097 = vmatpush1.bf16.msra.mxu1 %v9122_v57 }
 0xd81   :  { %7016 = vmatprep.subr.bf16.mxu0 %v9127_v2  ;;  %7098 = vmatprep.subr.bf16.mxu1 %v9130_v4  ;;  %v9185_v4 = vld [vmem:[#allocation29 + $0x200] ss:$16 sps:$4 sm:$0xff]  }
 0xd84   :  { %7017 = vmatpush1.bf16.msra.mxu0 %v9125_v63  ;;  %7099 = vmatpush1.bf16.msra.mxu1 %v9128_v6  ;;  %v9188_v63 = vld [vmem:[#allocation29 + $0x208] ss:$16 sps:$4 sm:$0xff]  }
 0xd85   :  { %7018 = vmatprep.subr.bf16.mxu0 %v9133_v8  ;;  %7100 = vmatprep.subr.bf16.mxu1 %v9136_v48  ;;  %v9193_v8 = vld [vmem:[#allocation29 + $0x224] ss:$16 sps:$4 sm:$0xff]   ;;  %v9196_v48 = vld [vmem:[#allocation29 + $0x22c] ss:$16 sps:$4 sm:$0xff]  }
 0xd88   :  { %7019 = vmatpush1.bf16.msra.mxu0 %v9131_v37  ;;  %7101 = vmatpush1.bf16.msra.mxu1 %v9134_v14  ;;  %v9191_v14 = vld [vmem:[#allocation29 + $0x220] ss:$16 sps:$4 sm:$0xff]  }
 0xd89   :  { %7020 = vmatprep.subr.bf16.mxu0 %v9139_v41  ;;  %7102 = vmatprep.subr.bf16.mxu1 %v9142_v47  ;;  %v9194_v41 = vld [vmem:[#allocation29 + $0x228] ss:$16 sps:$4 sm:$0xff]   ;;  %v9199_v47 = vld [vmem:[#allocation29 + $0x244] ss:$16 sps:$4 sm:$0xff]  }
 0xd8c   :  { %7021 = vmatpush1.bf16.msra.mxu0 %v9137_v25  ;;  %7103 = vmatpush1.bf16.msra.mxu1 %v9140_v3  ;;  %v9202_v25 = vld [vmem:[#allocation29 + $0x24c] ss:$16 sps:$4 sm:$0xff]   ;;  %v9197_v3 = vld [vmem:[#allocation29 + $0x240] ss:$16 sps:$4 sm:$0xff]  }
 0xd8d   :  { %7022 = vmatprep.subr.bf16.mxu0 %v9145_v7  ;;  %7104 = vmatprep.subr.bf16.mxu1 %v9148_v9  ;;  %v9200_v7 = vld [vmem:[#allocation29 + $0x248] ss:$16 sps:$4 sm:$0xff]   ;;  %v9205_v9 = vld [vmem:[#allocation29 + $0x264] ss:$16 sps:$4 sm:$0xff]  }
 0xd90   :  { %7023 = vmatpush1.bf16.msra.mxu0 %v9143_v35  ;;  %7105 = vmatpush1.bf16.msra.mxu1 %v9146_v11  ;;  %v9208_v35 = vld [vmem:[#allocation29 + $0x26c] ss:$16 sps:$4 sm:$0xff]   ;;  %v9203_v11 = vld [vmem:[#allocation29 + $0x260] ss:$16 sps:$4 sm:$0xff]  }
 0xd91   :  { %7024 = vmatprep.subr.bf16.mxu0 %v9151_v13  ;;  %7106 = vmatprep.subr.bf16.mxu1 %v9154_v27  ;;  %v9206_v13 = vld [vmem:[#allocation29 + $0x268] ss:$16 sps:$4 sm:$0xff]   ;;  %v9211_v27 = vld [vmem:[#allocation29 + $0x284] ss:$16 sps:$4 sm:$0xff]  }
 0xd94   :  { %7025 = vmatpush1.bf16.msra.mxu0 %v9149_v46  ;;  %7107 = vmatpush1.bf16.msra.mxu1 %v9152_v19  ;;  %v9214_v46 = vld [vmem:[#allocation29 + $0x28c] ss:$16 sps:$4 sm:$0xff]   ;;  %v9209_v19 = vld [vmem:[#allocation29 + $0x280] ss:$16 sps:$4 sm:$0xff]  }
 0xd95   :  { %7026 = vmatprep.subr.bf16.mxu0 %v9157_v21  ;;  %7108 = vmatprep.subr.bf16.mxu1 %v9160_v16  ;;  %v9212_v21 = vld [vmem:[#allocation29 + $0x288] ss:$16 sps:$4 sm:$0xff]   ;;  %v9217_v16 = vld [vmem:[#allocation29 + $0x2a4] ss:$16 sps:$4 sm:$0xff]  }
 0xd98   :  { %7027 = vmatpush1.bf16.msra.mxu0 %v9155_v39  ;;  %7109 = vmatpush1.bf16.msra.mxu1 %v9158_v42  ;;  %v9220_v39 = vld [vmem:[#allocation29 + $0x2ac] ss:$16 sps:$4 sm:$0xff]   ;;  %v9215_v42 = vld [vmem:[#allocation29 + $0x2a0] ss:$16 sps:$4 sm:$0xff]  }
 0xd99   :  { %7028 = vmatprep.subr.bf16.mxu0 %v9163_v5  ;;  %7110 = vmatprep.subr.bf16.mxu1 %v9166_v58  ;;  %v9218_v5 = vld [vmem:[#allocation29 + $0x2a8] ss:$16 sps:$4 sm:$0xff]   ;;  %v9223_v58 = vld [vmem:[#allocation29 + $0x2c4] ss:$16 sps:$4 sm:$0xff]  }
 0xd9c   :  { %7029 = vmatpush1.bf16.msra.mxu0 %v9161_v62  ;;  %7111 = vmatpush1.bf16.msra.mxu1 %v9164_v60  ;;  %v9226_v62 = vld [vmem:[#allocation29 + $0x2cc] ss:$16 sps:$4 sm:$0xff]   ;;  %v9221_v60 = vld [vmem:[#allocation29 + $0x2c0] ss:$16 sps:$4 sm:$0xff]  }
 0xd9d   :  { %7030 = vmatprep.subr.bf16.mxu0 %v9169_v32  ;;  %7112 = vmatprep.subr.bf16.mxu1 %v9172_v44  ;;  %v9224_v32 = vld [vmem:[#allocation29 + $0x2c8] ss:$16 sps:$4 sm:$0xff]   ;;  %v9229_v44 = vld [vmem:[#allocation29 + $0x2e4] ss:$16 sps:$4 sm:$0xff]  }
 0xda0   :  { %7031 = vmatpush1.bf16.msra.mxu0 %v9167_v45  ;;  %7113 = vmatpush1.bf16.msra.mxu1 %v9170_v59  ;;  %v9232_v45 = vld [vmem:[#allocation29 + $0x2ec] ss:$16 sps:$4 sm:$0xff]   ;;  %v9227_v59 = vld [vmem:[#allocation29 + $0x2e0] ss:$16 sps:$4 sm:$0xff]  }
 0xda1   :  { %7032 = vmatprep.subr.bf16.mxu0 %v9175_v61  ;;  %7114 = vmatprep.subr.bf16.mxu1 %v9178_v1  ;;  %v9230_v61 = vld [vmem:[#allocation29 + $0x2e8] ss:$16 sps:$4 sm:$0xff]   ;;  %v9235_v1 = vld [vmem:[#allocation29 + $0x304] ss:$16 sps:$4 sm:$0xff]  }
 0xda4   :  { %7033 = vmatpush1.bf16.msra.mxu0 %v9173_v0  ;;  %7115 = vmatpush1.bf16.msra.mxu1 %v9176_v31  ;;  %v9238_v0 = vld [vmem:[#allocation29 + $0x30c] ss:$16 sps:$4 sm:$0xff]   ;;  %v9233_v31 = vld [vmem:[#allocation29 + $0x300] ss:$16 sps:$4 sm:$0xff]  }
 0xda5   :  { %7034 = vmatprep.subr.bf16.mxu0 %v9181_v23  ;;  %7116 = vmatprep.subr.bf16.mxu1 %v9184_v10  ;;  %v9236_v23 = vld [vmem:[#allocation29 + $0x308] ss:$16 sps:$4 sm:$0xff]   ;;  %v9241_v10 = vld [vmem:[#allocation29 + $0x324] ss:$16 sps:$4 sm:$0xff]  }
 0xda8   :  { %7035 = vmatpush1.bf16.msra.mxu0 %v9179_v12  ;;  %7117 = vmatpush1.bf16.msra.mxu1 %v9182_v17  ;;  %v9244_v12 = vld [vmem:[#allocation29 + $0x32c] ss:$16 sps:$4 sm:$0xff]   ;;  %v9239_v17 = vld [vmem:[#allocation29 + $0x320] ss:$16 sps:$4 sm:$0xff]  }
 0xda9   :  { %7045 = vmatprep.subr.bf16.mxu0 %v9187_v29  ;;  %7127 = vmatprep.subr.bf16.mxu1 %v9190_v18  ;;  %v9242_v29 = vld [vmem:[#allocation29 + $0x328] ss:$16 sps:$4 sm:$0xff]   ;;  %v9247_v18 = vld [vmem:[#allocation29 + $0x344] ss:$16 sps:$4 sm:$0xff]  }
 0xe3e   :  { %v6117_v30 = vpop.f32.mrb[72].mxu0  ;;  %v10929_v33 = vpop.f32.mrb[72].mxu1 }
 0xe3f   :  { %v8049_v34 = vadd.f32 %v6117_v30, %v5385_v22  ;;  %v6119_v50 = vpop.f32.mrb[73].mxu0  ;;  %v6201_v49 = vpop.f32.mrb[73].mxu1  ;;  %v9250_v22 = vld [vmem:[#allocation29 + $0x34c] ss:$16 sps:$4 sm:$0xff]   ;;  %v9253_v30 = vld [vmem:[#allocation29 + $0x364] ss:$16 sps:$4 sm:$0xff]  }
 0xe40   :  { %v8050_v51 = vadd.f32 %v6119_v50, %v5389_v24  ;;  %v8052_v53 = vadd.f32 %v6201_v49, %v5397_v28  ;;  %v6121_v52 = vpop.f32.mrb[74].mxu0  ;;  %v6203_v54 = vpop.f32.mrb[74].mxu1  ;;  %v9245_v24 = vld [vmem:[#allocation29 + $0x340] ss:$16 sps:$4 sm:$0xff]   ;;  %v9248_v28 = vld [vmem:[#allocation29 + $0x348] ss:$16 sps:$4 sm:$0xff]  }
 0xe41   :  { %v6206_v26 = vmax.f32 %v8049_v34, 0.0  ;;  %v6122_v55 = vpop.f32.mrb[75].mxu0  ;;  %v6204_v56 = vpop.f32.mrb[75].mxu1  ;;  %v9256_v34 = vld [vmem:[#allocation29 + $0x36c] ss:$16 sps:$4 sm:$0xff]  }
 0xe42   :  { %v6207_v38 = vmax.f32 %v8050_v51, 0.0  ;;  %v6209_v57 = vmax.f32 %v8052_v53, 0.0  ;;  %v9251_v50 = vld [vmem:[#allocation29 + $0x360] ss:$16 sps:$4 sm:$0xff]   ;;  %v9254_v49 = vld [vmem:[#allocation29 + $0x368] ss:$16 sps:$4 sm:$0xff]  }
 0xe43   :  { %v6210_v6 = vpack.c.bf16 %v6206_v26, %v6206_v26  ;;  %v9259_v51 = vld [vmem:[#allocation29 + $0x384] ss:$16 sps:$4 sm:$0xff]   ;;  %v9262_v53 = vld [vmem:[#allocation29 + $0x38c] ss:$16 sps:$4 sm:$0xff]   ;;  %v9257_v52 = vld [vmem:[#allocation29 + $0x380] ss:$16 sps:$4 sm:$0xff]  }
 0xe44   :  { %v6211_v2 = vpack.c.bf16 %v6207_v38, %v6207_v38  ;;  %v6213_v37 = vpack.c.bf16 %v6209_v57, %v6209_v57  ;;  %v9260_v54 = vld [vmem:[#allocation29 + $0x388] ss:$16 sps:$4 sm:$0xff]   ;;  %v9265_v26 = vld [vmem:[#allocation29 + $0x3a4] ss:$16 sps:$4 sm:$0xff]   ;;  %v9268_v55 = vld [vmem:[#allocation29 + $0x3ac] ss:$16 sps:$4 sm:$0xff]   ;;  %v5393_v57 = vrot.slane %v10921_v20, %v11036_v43 }
 0xe45   :  { %v9263_v56 = vld [vmem:[#allocation29 + $0x3a0] ss:$16 sps:$4 sm:$0xff]   ;;  %v9266_v38 = vld [vmem:[#allocation29 + $0x3a8] ss:$16 sps:$4 sm:$0xff]  }
 0xe46   :  { %7036 = vmatprep.mubr.bf16.mxu0 %v6211_v2  ;;  %7118 = vmatprep.mubr.bf16.mxu1 %v6211_v2  ;;  %v9271_v2 = vld [vmem:[#allocation29 + $0x3c4] ss:$16 sps:$4 sm:$0xff]  }
 0xe47   :  { %7037 = vmatmul.mubr.bf16.vlgmr.msra.gmra.mrb[76].mxu0 %v6210_v6  ;;  %7119 = vmatmul.mubr.bf16.vlgmr.msra.gmra.mrb[76].mxu1 %v6210_v6  ;;  %v9272_v6 = vld [vmem:[#allocation29 + $0x3c8] ss:$16 sps:$4 sm:$0xff]  }
 0xe48   :  { %7046 = vmatpush1.bf16.msra.mxu0 %v9185_v4  ;;  %7128 = vmatpush1.bf16.msra.mxu1 %v9188_v63  ;;  %v9274_v4 = vld [vmem:[#allocation29 + $0x3cc] ss:$16 sps:$4 sm:$0xff]   ;;  %v9269_v63 = vld [vmem:[#allocation29 + $0x3c0] ss:$16 sps:$4 sm:$0xff]  }
 0xe49   :  { %7077 = vmatprep.mubr.bf16.mxu0 %v6213_v37  ;;  %7159 = vmatprep.mubr.bf16.mxu1 %v6213_v37  ;;  %v9280_v37 = vld [vmem:[#allocation29 + $0x3ec] ss:$16 sps:$4 sm:$0xff]  }
 0xe4a   :  { %7047 = vmatprep.subr.bf16.mxu0 %v9193_v8  ;;  %7129 = vmatprep.subr.bf16.mxu1 %v9196_v48  ;;  %v8051_v8 = vadd.f32 %v10929_v33, %v5393_v57  ;;  %v9277_v48 = vld [vmem:[#allocation29 + $0x3e4] ss:$16 sps:$4 sm:$0xff]  }
 0xe4c   :  { %7048 = vmatpush1.bf16.msra.mxu0 %v9191_v14  ;;  %7130 = vmatpush1.bf16.msra.mxu1 %v9194_v41  ;;  %v9275_v14 = vld [vmem:[#allocation29 + $0x3e0] ss:$16 sps:$4 sm:$0xff]   ;;  %v9278_v41 = vld [vmem:[#allocation29 + $0x3e8] ss:$16 sps:$4 sm:$0xff]  }
 0xe4d   :  { %7049 = vmatprep.subr.bf16.mxu0 %v9199_v47  ;;  %7131 = vmatprep.subr.bf16.mxu1 %v9202_v25  ;;  %v6208_v47 = vmax.f32 %v8051_v8, 0.0  ;;  %v6342_v25 = vld [vmem:[#allocation30] sm:$0xf] }
 0xe4e   :  { %v6355_v33 = vrot.slane %v6342_v25, %v11036_v43 }
 0xe4f   :  { %v6212_v20 = vpack.c.bf16 %v6208_v47, %v6208_v47 }
 0xe50   :  { %7050 = vmatpush1.bf16.msra.mxu0 %v9197_v3  ;;  %7132 = vmatpush1.bf16.msra.mxu1 %v9200_v7  ;;  %v6347_v3 = vrot.slane %v6342_v25, %v11035_v36  ;;  %v7172_v7 = vld [vmem:[#allocation32] sm:$0xf] }
 0xe51   :  { %7051 = vmatprep.subr.bf16.mxu0 %v9205_v9  ;;  %7133 = vmatprep.subr.bf16.mxu1 %v9208_v35  ;;  %v6351_v9 = vrot.slane %v6342_v25, %v11037_v15  ;;  %v6359_v35 = vrot.slane %v6342_v25, %v11038_v40 }
 0xe54   :  { %7052 = vmatpush1.bf16.msra.mxu0 %v9203_v11  ;;  %7134 = vmatpush1.bf16.msra.mxu1 %v9206_v13 }
 0xe55   :  { %7053 = vmatprep.subr.bf16.mxu0 %v9211_v27  ;;  %7135 = vmatprep.subr.bf16.mxu1 %v9214_v46  ;;  %v7177_v46 = vrot.slane %v7172_v7, %v11035_v36  ;;  %v7189_v36 = vrot.slane %v7172_v7, %v11038_v40 }
 0xe58   :  { %7054 = vmatpush1.bf16.msra.mxu0 %v9209_v19  ;;  %7136 = vmatpush1.bf16.msra.mxu1 %v9212_v21 }
 0xe59   :  { %7055 = vmatprep.subr.bf16.mxu0 %v9217_v16  ;;  %7137 = vmatprep.subr.bf16.mxu1 %v9220_v39 }
 0xe5c   :  { %7056 = vmatpush1.bf16.msra.mxu0 %v9215_v42  ;;  %7138 = vmatpush1.bf16.msra.mxu1 %v9218_v5  ;;  %v7181_v42 = vrot.slane %v7172_v7, %v11037_v15 }
 0xe5d   :  { %7057 = vmatprep.subr.bf16.mxu0 %v9223_v58  ;;  %7139 = vmatprep.subr.bf16.mxu1 %v9226_v62 }
 0xe60   :  { %7058 = vmatpush1.bf16.msra.mxu0 %v9221_v60  ;;  %7140 = vmatpush1.bf16.msra.mxu1 %v9224_v32 }
 0xe61   :  { %7059 = vmatprep.subr.bf16.mxu0 %v9229_v44  ;;  %7141 = vmatprep.subr.bf16.mxu1 %v9232_v45 }
 0xe64   :  { %7060 = vmatpush1.bf16.msra.mxu0 %v9227_v59  ;;  %7142 = vmatpush1.bf16.msra.mxu1 %v9230_v61  ;;  %v7185_v59 = vrot.slane %v7172_v7, %v11036_v43 }
 0xe65   :  { %7061 = vmatprep.subr.bf16.mxu0 %v9235_v1  ;;  %7143 = vmatprep.subr.bf16.mxu1 %v9238_v0 }
 0xe68   :  { %7062 = vmatpush1.bf16.msra.mxu0 %v9233_v31  ;;  %7144 = vmatpush1.bf16.msra.mxu1 %v9236_v23 }
 0xe69   :  { %7063 = vmatprep.subr.bf16.mxu0 %v9241_v10  ;;  %7145 = vmatprep.subr.bf16.mxu1 %v9244_v12 }
 0xe6c   :  { %7064 = vmatpush1.bf16.msra.mxu0 %v9239_v17  ;;  %7146 = vmatpush1.bf16.msra.mxu1 %v9242_v29  ;;  %v8040_v29 = vld [vmem:[#allocation2] ss:$0 sm:$0xff] }
 0xe6d   :  { %7065 = vmatprep.subr.bf16.mxu0 %v9247_v18  ;;  %7147 = vmatprep.subr.bf16.mxu1 %v9250_v22 }
 0xe70   :  { %7066 = vmatpush1.bf16.msra.mxu0 %v9245_v24  ;;  %7148 = vmatpush1.bf16.msra.mxu1 %v9248_v28 }
 0xe71   :  { %7067 = vmatprep.subr.bf16.mxu0 %v9253_v30  ;;  %7149 = vmatprep.subr.bf16.mxu1 %v9256_v34 }
 0xe74   :  { %7068 = vmatpush1.bf16.msra.mxu0 %v9251_v50  ;;  %7150 = vmatpush1.bf16.msra.mxu1 %v9254_v49 }
 0xe75   :  { %7069 = vmatprep.subr.bf16.mxu0 %v9259_v51  ;;  %7151 = vmatprep.subr.bf16.mxu1 %v9262_v53 }
 0xe78   :  { %7070 = vmatpush1.bf16.msra.mxu0 %v9257_v52  ;;  %7152 = vmatpush1.bf16.msra.mxu1 %v9260_v54 }
 0xe79   :  { %7071 = vmatprep.subr.bf16.mxu0 %v9265_v26  ;;  %7153 = vmatprep.subr.bf16.mxu1 %v9268_v55 }
 0xe7c   :  { %7072 = vmatpush1.bf16.msra.mxu0 %v9263_v56  ;;  %7154 = vmatpush1.bf16.msra.mxu1 %v9266_v38 }
 0xe7d   :  { %7073 = vmatprep.subr.bf16.mxu0 %v9271_v2  ;;  %7155 = vmatprep.subr.bf16.mxu1 %v9274_v4 }
 0xe80   :  { %7074 = vmatpush1.bf16.msra.mxu0 %v9269_v63  ;;  %7156 = vmatpush1.bf16.msra.mxu1 %v9272_v6 }
 0xe81   :  { %7075 = vmatprep.subr.bf16.mxu0 %v9277_v48  ;;  %7157 = vmatprep.subr.bf16.mxu1 %v9280_v37 }
 0xe84   :  { %7076 = vmatpush1.bf16.msra.mxu0 %v9275_v14  ;;  %7158 = vmatpush1.bf16.msra.mxu1 %v9278_v41 }
 0xe87   :  { %7078 = vmatmul.mubr.bf16.vlgmr.msra.gmra.mrb[76].mxu0 %v6212_v20  ;;  %7160 = vmatmul.mubr.bf16.vlgmr.msra.gmra.mrb[76].mxu1 %v6212_v20 }
 0xf5a   :  { %v7079_v11 = vpop.f32.mrb[76].mxu0  ;;  %v7161_v13 = vpop.f32.mrb[76].mxu1 }
 0xf5b   :  { %v8053_v27 = vadd.f32 %v7079_v11, %v6347_v3  ;;  %v8055_v19 = vadd.f32 %v7161_v13, %v6355_v33  ;;  %v7081_v21 = vpop.f32.mrb[77].mxu0  ;;  %v7163_v16 = vpop.f32.mrb[77].mxu1 }
 0xf5c   :  { %v8054_v39 = vadd.f32 %v7081_v21, %v6351_v9  ;;  %v8056_v5 = vadd.f32 %v7163_v16, %v6359_v35  ;;  %v7083_v58 = vpop.f32.mrb[78].mxu0  ;;  %v7165_v62 = vpop.f32.mrb[78].mxu1 }
 0xf5d   :  { %v7168_v60 = vmax.f32 %v8053_v27, 0.0  ;;  %v7084_v32 = vpop.f32.mrb[79].mxu0  ;;  %v7166_v44 = vpop.f32.mrb[79].mxu1  ;;  %v7170_v45 = vmax.f32 %v8055_v19, 0.0 }
 0xf5e   :  { %v7169_v61 = vmax.f32 %v8054_v39, 0.0  ;;  %v7171_v31 = vmax.f32 %v8056_v5, 0.0 }
 0xf5f   :  { %v7194_v1 = vmul.f32 %v7177_v46, %v7168_v60  ;;  %v7196_v23 = vmul.f32 %v7185_v59, %v7170_v45 }
 0xf60   :  { %v7195_v0 = vmul.f32 %v7181_v42, %v7169_v61  ;;  %v7197_v12 = vmul.f32 %v7189_v36, %v7171_v31 }
 0xf62   :  { %v7198_v10 = vadd.f32 %v7195_v0, %v7194_v1 }
 0xf64   :  { %v7199_v17 = vadd.f32 %v7198_v10, %v7196_v23 }
 0xf66   :  { %v7200_v15 = vadd.f32 %v7199_v17, %v7197_v12 }
 0xf68   :  { %7201 = vadd.xlane.f32.xlu0 %v7200_v15 }
 0xff5   :  { %v7202_v18 = vpop.xlane.xlu0 %7201 }
 0xff6   :  { %v7210_v22 = vadd.f32 %v8040_v29, %v7202_v18 }
 0xff8   :  { %7212 = vst.msk [vmem:[#allocation33] sm:$0xff] %vm7211_vm0, %v7210_v22 }
 0xff9   :  { %9870 = shalt.err (!%p9867_p2)
}
 0xffa   :  { %s11039_s23 = sld [smem:[#allocation68_spill]] }
0x1000   :  { %s9871_s12 = scalar_lea.hbm %s11039_s23, 128 }
0x1001   :  { %p9872_p3 = scmp.ne.s32.totalorder %s11039_s23, %s9871_s12  ;;  %p9875_p4 = scmp.lt.u32.totalorder %s9871_s12, %s11039_s23 }
0x1003   :  { %p9877_p5 = pnand %p9875_p4, %p9872_p3 }
0x1005   :  { %9880 = shalt.err (!%p9877_p5)
}
0x1006   :  { %7222 = dma.vmem_to_hbm [thread:$0]  %s7220_s26, 128, %s11039_s23, [#allocation5]  }
0x1007   :  { %9901 = dma.done.wait [#allocation5], 128  }
0x1008   :  { %9902 = vsyncadd [#allocation5], 4294967168 }
0x1009   :  { %7226 = vsyncpa [#allocation4], 1 }
0x100a   :  { %7227 = vsyncpa [#allocation7], 1 }
0x100b   :  { %7228 = vsyncpa [#allocation10], 1 }
0x100c   :  { %7229 = vsyncpa [#allocation13], 1 }
0x100d   :  { %7230 = vsyncpa [#allocation16], 1 }
0x100e   :  { %7231 = vsyncpa [#allocation19], 1 }
0x100f   :  { %7232 = vsyncpa [#allocation22], 1 }
0x1010   :  { %7233 = vsyncpa [#allocation25], 1 }
0x1011   :  { %7234 = vsyncpa [#allocation28], 1 }
0x1012   :  { %7235 = vsyncpa [#allocation31], 1 }
0x1013   :  { %7236 = vsyncpa [#allocation5], 1 }

</bundles_post_ra>
